<compile_context>
chip_gen: v7x
topology: tpu7x:2x2x1
jax: 0.10.0
libtpu: 0.0.40
codegen_flags: <defaults>
</compile_context>

<pallas_src>
import jax
import jax.numpy as jnp
from jax.experimental import pallas as pl
from jax.experimental.pallas import tpu as pltpu

LANE = 128            # TPU lane width: channel dims are padded to a multiple of this


def _round_up(x, m):
    return (x + m - 1) // m * m


def _vmem_cap_bytes():
    """<= 75% of physical VMEM (compiler headroom): ~48 MiB v7x, ~96 MiB v5e/v6e."""
    try:
        phys = int(pltpu.get_tpu_info().vmem_capacity_bytes)
    except Exception:
        phys = 64 << 20                      # conservative fallback, safe on all gens
    return (phys * 3) // 4


def _pick_row_tile(Ho, Wo, max_pixels=1024):
    best = 1
    for th in range(1, Ho + 1):
        if Ho % th == 0 and th * Wo <= max_pixels:
            best = th
    return best


def _pick_tiles(N, Ho, Wo, Cop):
    TH = _pick_row_tile(Ho, Wo)
    TCO = 256 if Cop % 256 == 0 else 128
    n_row, n_co = Ho // TH, Cop // TCO
    # v7x has 2 TensorCores: make sure at least 2 parallel grid tiles exist.
    if N * n_co * n_row < 2:
        if TCO > LANE:
            TCO = LANE
            n_co = Cop // TCO
        elif Ho > 1:
            for th in range(Ho - 1, 0, -1):
                if Ho % th == 0:
                    TH = th
                    break
            n_row = Ho // TH
    return TH, TCO, n_row, n_co


# ---------------------------------------------------------------------------
# Pallas kernel: fused stride-1 conv(KxK, BN-scale folded) + bias [+ res] [+ ReLU]
# ---------------------------------------------------------------------------
def _make_conv_kernel(K, TH, Wo, Cin_p, TCO, relu, has_residual, n_row):
    KK = K * K

    def kernel(*refs):
        x_ref, w_ref, b_ref = refs[0], refs[1], refs[2]
        idx = 3
        r_ref = None
        if has_residual:
            r_ref = refs[idx]
            idx += 1
        o_ref = refs[idx]
        idx += 1
        slab_ref = refs[idx] if KK > 1 else None

        # first output row of this row tile (static 0 when there is a single tile)
        r0 = pl.program_id(2) * TH if n_row > 1 else 0

        # Pack the K*K taps into a bf16 im2col slab (input is already bf16 ->
        # no per-tap cast), then issue ONE MXU matmul with contraction depth
        # K*K*Cin_p.  The f32 result is produced exactly once (no accumulator
        # read-modify-write through VMEM).
        if KK == 1:
            slab = x_ref[0, pl.ds(r0, TH), 0:Wo, :].reshape(TH * Wo, Cin_p)
        else:
            for t in range(KK):
                dy, dx = divmod(t, K)
                xs = x_ref[0, pl.ds(r0 + dy, TH), dx:dx + Wo, :]
                slab_ref[:, t * Cin_p:(t + 1) * Cin_p] = xs.reshape(TH * Wo, Cin_p)
            slab = slab_ref[...]

        y = jnp.dot(slab, w_ref[...], preferred_element_type=jnp.float32)
        y = (y + b_ref[...]).reshape(1, TH, Wo, TCO)       # folded-BN bias (f32)
        if has_residual:
            y = y + r_ref[...].astype(jnp.float32)
        if relu:
            y = jnp.maximum(y, 0.0)
        o_ref[...] = y.astype(o_ref.dtype)

    return kernel


def conv_bn_pallas(xpad, w2d, bias, *, K, Ho, Wo, relu, residual=None):
    """Fused stride-1 KxK conv (BN scale pre-folded into weights) + bias (+res)(+ReLU).

    xpad:  (N, Hp, Wp, Cin_p) bf16, spatially pre-padded so output (r, c), tap
           (dy, dx) reads xpad[r + dy, c + dx].
    w2d:   (K*K*Cin_p, Cop) bf16 (tap-major rows, BN scale folded in).
    bias:  (1, Cop) f32 (folded inference BatchNorm).
    residual: optional (N, Ho, Wo, Cop) bf16, added before the ReLU.
    Returns (N, Ho, Wo, Cop) bf16.
    """
    N, Hp, Wp, Cin_p = xpad.shape
    KK = K * K
    kdim, Cop = w2d.shape
    assert kdim == KK * Cin_p and Hp >= Ho + K - 1 and Wp >= Wo + K - 1
    assert Cin_p % LANE == 0 and Cop % LANE == 0

    TH, TCO, n_row, n_co = _pick_tiles(N, Ho, Wo, Cop)

    kernel = _make_conv_kernel(K, TH, Wo, Cin_p, TCO, relu,
                               residual is not None, n_row)

    in_specs = [
        # whole padded image per batch element: indexed only by n so Pallas keeps
        # it resident in VMEM across the Cout / row tiles.
        pl.BlockSpec((1, Hp, Wp, Cin_p), lambda n, c, r: (n, 0, 0, 0)),
        pl.BlockSpec((KK * Cin_p, TCO), lambda n, c, r: (0, c)),
        pl.BlockSpec((1, TCO), lambda n, c, r: (0, c)),
    ]
    args = [xpad, w2d, bias]
    io_aliases = {}
    if residual is not None:
        in_specs.append(pl.BlockSpec((1, TH, Wo, TCO), lambda n, c, r: (n, r, 0, c)))
        args.append(residual)
        io_aliases = {3: 0}          # consume the residual buffer in place as the output

    out_spec = pl.BlockSpec((1, TH, Wo, TCO), lambda n, c, r: (n, r, 0, c))

    scratch = []
    if KK > 1:
        scratch.append(pltpu.VMEM((TH * Wo, KK * Cin_p), jnp.bfloat16))

    # VMEM budget: double-buffered blocks + im2col slab + headroom, per-generation cap.
    blk = (Hp * Wp * Cin_p * 2                      # resident bf16 image block
           + KK * Cin_p * TCO * 2                   # weight slab block (bf16)
           + TCO * 4                                # bias block
           + TH * Wo * TCO * 2                      # output block (bf16)
           + (TH * Wo * TCO * 2 if residual is not None else 0))
    vmem = 2 * blk + (TH * Wo * KK * Cin_p * 2 if KK > 1 else 0) + (4 << 20)
    vmem = int(min(max(vmem, 16 << 20), _vmem_cap_bytes()))

    flops = 2 * N * Ho * Wo * KK * Cin_p * Cop
    bytes_accessed = (N * Hp * Wp * Cin_p * 2 + KK * Cin_p * Cop * 2 + Cop * 4
                      + N * Ho * Wo * Cop * 2 * (2 if residual is not None else 1))

    return pl.pallas_call(
        kernel,
        out_shape=jax.ShapeDtypeStruct((N, Ho, Wo, Cop), jnp.bfloat16),
        grid=(N, n_co, n_row),
        in_specs=in_specs,
        out_specs=out_spec,
        scratch_shapes=scratch,
        input_output_aliases=io_aliases,
        compiler_params=pltpu.CompilerParams(
            dimension_semantics=("parallel", "parallel", "parallel"),
            vmem_limit_bytes=vmem,
        ),
        cost_estimate=pl.CostEstimate(flops=flops, transcendentals=0,
                                      bytes_accessed=bytes_accessed),
    )(*args)


# ---------------------------------------------------------------------------
# Layout helpers (plain JAX glue, bf16 activations)
# ---------------------------------------------------------------------------
def _pad_channels(x, c_to):
    c = x.shape[-1]
    if c == c_to:
        return x
    pad = [(0, 0)] * (x.ndim - 1) + [(0, c_to - c)]
    return jnp.pad(x, pad)


def _space_to_depth(xpad):
    """(N, Hp, Wp, C) -> (N, ceil(Hp/2), ceil(Wp/2), 4*C), phase-major channels."""
    N, Hp, Wp, C = xpad.shape
    Hp2, Wp2 = _round_up(Hp, 2), _round_up(Wp, 2)
    if (Hp2, Wp2) != (Hp, Wp):
        xpad = jnp.pad(xpad, ((0, 0), (0, Hp2 - Hp), (0, Wp2 - Wp), (0, 0)))
    x = xpad.reshape(N, Hp2 // 2, 2, Wp2 // 2, 2, C)
    x = jnp.transpose(x, (0, 1, 3, 2, 4, 5))          # N, H/2, W/2, py, px, C
    return x.reshape(N, Hp2 // 2, Wp2 // 2, 4 * C)


# ---------------------------------------------------------------------------
# ResNetBasicBlock / ResNetLayer forward (composition of fused Pallas kernels)
# ---------------------------------------------------------------------------
def basic_block_forward(x, p):
    """x: (N, H, W, C) bf16 NHWC (lane-padded channels unless this block downsamples)."""
    N, H, W, _ = x.shape
    if p["downsample"]:
        Ho, Wo = (H - 1) // 2 + 1, (W - 1) // 2 + 1
        # One shared space-to-depth tensor: the 3x3/stride-2 conv becomes a
        # 2x2/stride-1 conv over 4*Cin phase channels, and the 1x1/stride-2
        # shortcut becomes a 1x1 conv selecting a single phase block.
        xpad = jnp.pad(x[..., :p["cin_raw"]], ((0, 0), (1, 1), (1, 1), (0, 0)))
        xs2d = _pad_channels(_space_to_depth(xpad), p["cs_p"])
        residual = conv_bn_pallas(xs2d, p["sc_w"], p["sc_b"],
                                  K=1, Ho=Ho, Wo=Wo, relu=False)
        h = conv_bn_pallas(xs2d, p["w1"], p["b1"], K=2, Ho=Ho, Wo=Wo, relu=True)
    else:
        Ho, Wo = H, W
        residual = x
        xpad = jnp.pad(x, ((0, 0), (1, 1), (1, 1), (0, 0)))
        h = conv_bn_pallas(xpad, p["w1"], p["b1"], K=3, Ho=Ho, Wo=Wo, relu=True)
    hpad = jnp.pad(h, ((0, 0), (1, 1), (1, 1), (0, 0)))
    return conv_bn_pallas(hpad, p["w2"], p["b2"], K=3, Ho=Ho, Wo=Wo, relu=True,
                          residual=residual)


def resnet_layer_forward(x_nchw, prepped):
    x = jnp.transpose(x_nchw, (0, 2, 3, 1)).astype(jnp.bfloat16)   # NCHW -> NHWC bf16
    if not prepped[0]["downsample"]:
        x = _pad_channels(x, prepped[0]["cop"])
    for p in prepped:
        x = basic_block_forward(x, p)
    x = x[..., :prepped[-1]["cout"]].astype(jnp.float32)           # drop lane padding
    return jnp.transpose(x, (0, 3, 1, 2))                          # NHWC -> NCHW


# ---------------------------------------------------------------------------
# Parameter preparation (BN fold into weights, lane padding, s2d rewrite, bf16)
# ---------------------------------------------------------------------------
def _prep_w(w_hwio, scale, cin_p, cop):
    """Fold BN scale into conv weights in f32, lane-pad, flatten taps, cast bf16."""
    K, _, ci, co = w_hwio.shape
    w = w_hwio.astype(jnp.float32) * scale.astype(jnp.float32)[None, None, None, :]
    w = jnp.pad(w, ((0, 0), (0, 0), (0, cin_p - ci), (0, cop - co)))
    return w.reshape(K * K * cin_p, cop).astype(jnp.bfloat16)


def _prep_b(bias, cop):
    c = bias.shape[0]
    return jnp.pad(bias, (0, cop - c)).reshape(1, cop).astype(jnp.float32)


def _s2d_weights(w):
    """(K, K, Cin, Cout) stride-2 weights -> (K2, K2, 4*Cin, Cout) stride-1 weights."""
    K, _, ci, co = w.shape
    K2 = (K + 1) // 2
    w2 = jnp.zeros((K2, K2, 4, ci, co), w.dtype)
    for oy in range(K2):
        for ox in range(K2):
            for py in range(2):
                for px in range(2):
                    dy, dx = 2 * oy + py, 2 * ox + px
                    if dy < K and dx < K:
                        w2 = w2.at[oy, ox, 2 * py + px].set(w[dy, dx])
    return w2.reshape(K2, K2, 4 * ci, co)


def _shortcut_s2d_weights(w_sc):
    """(1, 1, Cin, Cout) stride-2 1x1 weights -> (1, 1, 4*Cin, Cout) on the s2d input."""
    _, _, ci, co = w_sc.shape
    w2 = jnp.zeros((1, 1, 4, ci, co), w_sc.dtype)
    w2 = w2.at[0, 0, 3].set(w_sc[0, 0])              # phase (py, px) = (1, 1)
    return w2.reshape(1, 1, 4 * ci, co)


def prepare_layer_params(raw_params):
    """Raw (PyTorch-layout) params -> lane-padded, BN-folded bf16 kernel params."""
    prepped = []
    for p in raw_params:
        cin, cout = p["w1"].shape[2], p["w1"].shape[3]
        cop = _round_up(cout, LANE)
        q = {"downsample": p["downsampling"] == 2, "cin_raw": cin,
             "cout": cout, "cop": cop}
        if q["downsample"]:
            cs_p = _round_up(4 * cin, LANE)
            q["cs_p"] = cs_p
            q["w1"] = _prep_w(_s2d_weights(p["w1"]), p["s1"], cs_p, cop)
            q["sc_w"] = _prep_w(_shortcut_s2d_weights(p["sc_w"]), p["sc_s"], cs_p, cop)
            q["sc_b"] = _prep_b(p["sc_b"], cop)
        else:
            q["w1"] = _prep_w(p["w1"], p["s1"], _round_up(cin, LANE), cop)
        q["b1"] = _prep_b(p["b1"], cop)
        q["w2"] = _prep_w(p["w2"], p["s2"], cop, cop)
        q["b2"] = _prep_b(p["b2"], cop)
        prepped.append(q)
    return prepped


# ---------------------------------------------------------------------------
# Deterministic raw parameter init (inference-mode BatchNorm folded to scale/bias)
# ---------------------------------------------------------------------------
def init_resnet_layer_params(key, in_channels, out_channels, n_blocks):
    eps = 1e-5

    def conv_w(k, kh, kw, ci, co):
        return 0.1 * jax.random.normal(k, (kh, kw, ci, co), jnp.float32)

    def bn_fold(k, c):
        k1, k2, k3, k4 = jax.random.split(k, 4)
        gamma = 1.0 + 0.1 * jax.random.normal(k1, (c,), jnp.float32)
        beta = 0.1 * jax.random.normal(k2, (c,), jnp.float32)
        mean = 0.1 * jax.random.normal(k3, (c,), jnp.float32)
        var = jnp.abs(jax.random.normal(k4, (c,), jnp.float32)) + 0.5
        scale = gamma * jax.lax.rsqrt(var + eps)
        bias = beta - mean * scale
        return scale, bias

    params = []
    ch_in = in_channels
    ds_first = 2 if in_channels != out_channels else 1
    for i in range(n_blocks):
        ds = ds_first if i == 0 else 1
        key, k1, k2, k3, k4, k5, k6 = jax.random.split(key, 7)
        p = {"downsampling": ds}
        p["w1"] = conv_w(k1, 3, 3, ch_in, out_channels)
        p["s1"], p["b1"] = bn_fold(k2, out_channels)
        p["w2"] = conv_w(k3, 3, 3, out_channels, out_channels)
        p["s2"], p["b2"] = bn_fold(k4, out_channels)
        if ch_in != out_channels:                    # should_apply_shortcut (expansion=1)
            p["sc_w"] = conv_w(k5, 1, 1, ch_in, out_channels)
            p["sc_s"], p["sc_b"] = bn_fold(k6, out_channels)
        else:
            p["sc_w"] = None
        params.append(p)
        ch_in = out_channels
    return params


# ---------------------------------------------------------------------------
# Pure-JAX reference (bf16 MXU inputs / f32 accumulation)
# ---------------------------------------------------------------------------
def _conv_bn_ref(x, w, scale, bias, stride, relu, residual=None):
    K = w.shape[0]
    pad = K // 2
    y = jax.lax.conv_general_dilated(
        x.astype(jnp.bfloat16), w.astype(jnp.bfloat16),
        window_strides=(stride, stride),
        padding=((pad, pad), (pad, pad)),
        dimension_numbers=("NHWC", "HWIO", "NHWC"),
        preferred_element_type=jnp.float32,
    )
    y = y * scale + bias
    if residual is not None:
        y = y + residual
    if relu:
        y = jnp.maximum(y, 0.0)
    return y


def resnet_layer_ref(x_nchw, params):
    x = jnp.transpose(x_nchw, (0, 2, 3, 1))
    for p in params:
        ds = p["downsampling"]
        residual = (_conv_bn_ref(x, p["sc_w"], p["sc_s"], p["sc_b"], ds, False)
                    if p["sc_w"] is not None else x)
        h = _conv_bn_ref(x, p["w1"], p["s1"], p["b1"], ds, True)
        x = _conv_bn_ref(h, p["w2"], p["s2"], p["b2"], 1, True, residual=residual)
    return jnp.transpose(x, (0, 3, 1, 2))


# ---------------------------------------------------------------------------
if __name__ == "__main__":
    key = jax.random.PRNGKey(0)
    kx, kp = jax.random.split(key)

    N, C_IN, H, W = 2, 4, 16, 16
    C_OUT, N_BLOCKS = 8, 2            # in != out -> first block downsamples (stride 2)

    x = jax.random.normal(kx, (N, C_IN, H, W), jnp.float32)    # NCHW, like PyTorch
    raw_params = init_resnet_layer_params(kp, C_IN, C_OUT, N_BLOCKS)
    prepped = prepare_layer_params(raw_params)

    fwd = jax.jit(lambda inp: resnet_layer_forward(inp, prepped))
    out = jax.block_until_ready(fwd(x))

    ref = jax.block_until_ready(resnet_layer_ref(x, raw_params))

    assert out.shape == (N, C_OUT, H // 2, W // 2), out.shape
    max_err = float(jnp.max(jnp.abs(out - ref)))
    # bf16 inter-stage activations -> slightly looser tolerance than pure-f32 path
    assert jnp.allclose(out, ref, rtol=2e-2, atol=2e-2), max_err
    print("KERNEL_OK")
</pallas_src>

<mosaic_0001>
module attributes {stable_mosaic.version = 11 : i64} {
  func.func @kernel(%arg0: i32, %arg1: i32, %arg2: i32, %arg3: memref<1x9x9x128xbf16, #tpu.memory_space<vmem>>, %arg4: memref<128x128xbf16, #tpu.memory_space<vmem>>, %arg5: memref<1x128xf32, #tpu.memory_space<vmem>>, %arg6: memref<1x8x8x128xbf16, #tpu.memory_space<vmem>>) attributes {dimension_semantics = [#tpu.dimension_semantics<parallel>, #tpu.dimension_semantics<parallel>, #tpu.dimension_semantics<parallel>], iteration_bounds = array<i64: 2, 1, 1>, scalar_prefetch = 0 : i64, scratch_operands = 0 : i64, tpu.core_type = #tpu.core_type<tc>, window_params = [{transform_indices = @transform_0, window_bounds = array<i64: 1, 9, 9, 128>}, {transform_indices = @transform_1, window_bounds = array<i64: 128, 128>}, {transform_indices = @transform_2, window_bounds = array<i64: 1, 128>}, {transform_indices = @transform_3, window_bounds = array<i64: 1, 8, 8, 128>}]} {
    %c0 = arith.constant 0 : index
    %c0_0 = arith.constant 0 : index
    %c0_1 = arith.constant 0 : index
    %c0_2 = arith.constant 0 : index
    %0 = vector.load %arg3[%c0, %c0_0, %c0_1, %c0_2] : memref<1x9x9x128xbf16, #tpu.memory_space<vmem>>, vector<1x8x8x128xbf16>
    %1 = vector.shape_cast %0 : vector<1x8x8x128xbf16> to vector<8x8x128xbf16>
    %2 = vector.shape_cast %1 : vector<8x8x128xbf16> to vector<64x128xbf16>
    %c0_3 = arith.constant 0 : index
    %c0_4 = arith.constant 0 : index
    %3 = vector.load %arg4[%c0_3, %c0_4] : memref<128x128xbf16, #tpu.memory_space<vmem>>, vector<128x128xbf16>
    %cst = arith.constant dense<0.000000e+00> : vector<64x128xf32>
    %4 = tpu.matmul %2, %3, %cst {dimension_numbers = #tpu.dot_dimension_numbers<[1], [0], [0], [1], [0, 0, 1, 1], [], []>} : vector<64x128xbf16>, vector<128x128xbf16>, vector<64x128xf32> -> vector<64x128xf32>
    %c0_5 = arith.constant 0 : index
    %c0_6 = arith.constant 0 : index
    %5 = vector.load %arg5[%c0_5, %c0_6] : memref<1x128xf32, #tpu.memory_space<vmem>>, vector<1x128xf32>
    %6 = vector.broadcast %5 : vector<1x128xf32> to vector<64x128xf32>
    %7 = arith.addf %4, %6 : vector<64x128xf32>
    %8 = vector.shape_cast %7 : vector<64x128xf32> to vector<1x8x8x128xf32>
    %9 = arith.truncf %8 : vector<1x8x8x128xf32> to vector<1x8x8x128xbf16>
    %c0_7 = arith.constant 0 : index
    %c0_8 = arith.constant 0 : index
    %c0_9 = arith.constant 0 : index
    %c0_10 = arith.constant 0 : index
    %10 = vector.load %arg6[%c0_7, %c0_8, %c0_9, %c0_10] : memref<1x8x8x128xbf16, #tpu.memory_space<vmem>>, vector<1x8x8x128xbf16>
    tpu.vector_store %arg6[%c0_7, %c0_8, %c0_9, %c0_10], %9 {strides = array<i32>} : memref<1x8x8x128xbf16, #tpu.memory_space<vmem>>, vector<1x8x8x128xbf16>,
    return
  }
  func.func @transform_0(%arg0: i32, %arg1: i32, %arg2: i32) -> (i32, i32, i32, i32) {
    %c0_i32 = arith.constant 0 : i32
    %c0_i32_0 = arith.constant 0 : i32
    %c0_i32_1 = arith.constant 0 : i32
    %c0_i32_2 = arith.constant 0 : i32
    return %arg0, %c0_i32, %c0_i32_0, %c0_i32_1 : i32, i32, i32, i32
  }
  func.func @transform_1(%arg0: i32, %arg1: i32, %arg2: i32) -> (i32, i32) {
    %c0_i32 = arith.constant 0 : i32
    %c0_i32_0 = arith.constant 0 : i32
    return %c0_i32, %arg1 : i32, i32
  }
  func.func @transform_2(%arg0: i32, %arg1: i32, %arg2: i32) -> (i32, i32) {
    %c0_i32 = arith.constant 0 : i32
    %c0_i32_0 = arith.constant 0 : i32
    return %c0_i32, %arg1 : i32, i32
  }
  func.func @transform_3(%arg0: i32, %arg1: i32, %arg2: i32) -> (i32, i32, i32, i32) {
    %c0_i32 = arith.constant 0 : i32
    %c0_i32_0 = arith.constant 0 : i32
    return %arg0, %arg2, %c0_i32, %arg1 : i32, i32, i32, i32
  }
}

module attributes {stable_mosaic.version = 11 : i64} {
  func.func @kernel(%arg0: i32, %arg1: i32, %arg2: i32, %arg3: memref<1x9x9x128xbf16, #tpu.memory_space<vmem>>, %arg4: memref<512x128xbf16, #tpu.memory_space<vmem>>, %arg5: memref<1x128xf32, #tpu.memory_space<vmem>>, %arg6: memref<1x8x8x128xbf16, #tpu.memory_space<vmem>>, %arg7: memref<64x512xbf16, #tpu.memory_space<vmem>>) attributes {dimension_semantics = [#tpu.dimension_semantics<parallel>, #tpu.dimension_semantics<parallel>, #tpu.dimension_semantics<parallel>], iteration_bounds = array<i64: 2, 1, 1>, scalar_prefetch = 0 : i64, scratch_operands = 1 : i64, tpu.core_type = #tpu.core_type<tc>, window_params = [{transform_indices = @transform_0, window_bounds = array<i64: 1, 9, 9, 128>}, {transform_indices = @transform_1, window_bounds = array<i64: 512, 128>}, {transform_indices = @transform_2, window_bounds = array<i64: 1, 128>}, {transform_indices = @transform_3, window_bounds = array<i64: 1, 8, 8, 128>}]} {
    %c0 = arith.constant 0 : index
    %c0_0 = arith.constant 0 : index
    %c0_1 = arith.constant 0 : index
    %c0_2 = arith.constant 0 : index
    %0 = vector.load %arg3[%c0, %c0_0, %c0_1, %c0_2] : memref<1x9x9x128xbf16, #tpu.memory_space<vmem>>, vector<1x8x8x128xbf16>
    %1 = vector.shape_cast %0 : vector<1x8x8x128xbf16> to vector<8x8x128xbf16>
    %2 = vector.shape_cast %1 : vector<8x8x128xbf16> to vector<64x128xbf16>
    %c0_3 = arith.constant 0 : index
    %c0_4 = arith.constant 0 : index
    %3 = vector.load %arg7[%c0_3, %c0_4] : memref<64x512xbf16, #tpu.memory_space<vmem>>, vector<64x128xbf16>
    tpu.vector_store %arg7[%c0_3, %c0_4], %2 {strides = array<i32>} : memref<64x512xbf16, #tpu.memory_space<vmem>>, vector<64x128xbf16>,
    %c0_5 = arith.constant 0 : index
    %c0_6 = arith.constant 0 : index
    %c1 = arith.constant 1 : index
    %c0_7 = arith.constant 0 : index
    %4 = vector.load %arg3[%c0_5, %c0_6, %c1, %c0_7] : memref<1x9x9x128xbf16, #tpu.memory_space<vmem>>, vector<1x8x8x128xbf16>
    %5 = vector.shape_cast %4 : vector<1x8x8x128xbf16> to vector<8x8x128xbf16>
    %6 = vector.shape_cast %5 : vector<8x8x128xbf16> to vector<64x128xbf16>
    %c0_8 = arith.constant 0 : index
    %c128 = arith.constant 128 : index
    %7 = vector.load %arg7[%c0_8, %c128] : memref<64x512xbf16, #tpu.memory_space<vmem>>, vector<64x128xbf16>
    tpu.vector_store %arg7[%c0_8, %c128], %6 {strides = array<i32>} : memref<64x512xbf16, #tpu.memory_space<vmem>>, vector<64x128xbf16>,
    %c0_9 = arith.constant 0 : index
    %c1_10 = arith.constant 1 : index
    %c0_11 = arith.constant 0 : index
    %c0_12 = arith.constant 0 : index
    %8 = vector.load %arg3[%c0_9, %c1_10, %c0_11, %c0_12] : memref<1x9x9x128xbf16, #tpu.memory_space<vmem>>, vector<1x8x8x128xbf16>
    %9 = vector.shape_cast %8 : vector<1x8x8x128xbf16> to vector<8x8x128xbf16>
    %10 = vector.shape_cast %9 : vector<8x8x128xbf16> to vector<64x128xbf16>
    %c0_13 = arith.constant 0 : index
    %c256 = arith.constant 256 : index
    %11 = vector.load %arg7[%c0_13, %c256] : memref<64x512xbf16, #tpu.memory_space<vmem>>, vector<64x128xbf16>
    tpu.vector_store %arg7[%c0_13, %c256], %10 {strides = array<i32>} : memref<64x512xbf16, #tpu.memory_space<vmem>>, vector<64x128xbf16>,
    %c0_14 = arith.constant 0 : index
    %c1_15 = arith.constant 1 : index
    %c1_16 = arith.constant 1 : index
    %c0_17 = arith.constant 0 : index
    %12 = vector.load %arg3[%c0_14, %c1_15, %c1_16, %c0_17] : memref<1x9x9x128xbf16, #tpu.memory_space<vmem>>, vector<1x8x8x128xbf16>
    %13 = vector.shape_cast %12 : vector<1x8x8x128xbf16> to vector<8x8x128xbf16>
    %14 = vector.shape_cast %13 : vector<8x8x128xbf16> to vector<64x128xbf16>
    %c0_18 = arith.constant 0 : index
    %c384 = arith.constant 384 : index
    %15 = vector.load %arg7[%c0_18, %c384] : memref<64x512xbf16, #tpu.memory_space<vmem>>, vector<64x128xbf16>
    tpu.vector_store %arg7[%c0_18, %c384], %14 {strides = array<i32>} : memref<64x512xbf16, #tpu.memory_space<vmem>>, vector<64x128xbf16>,
    %c0_19 = arith.constant 0 : index
    %c0_20 = arith.constant 0 : index
    %16 = vector.load %arg7[%c0_19, %c0_20] : memref<64x512xbf16, #tpu.memory_space<vmem>>, vector<64x512xbf16>
    %c0_21 = arith.constant 0 : index
    %c0_22 = arith.constant 0 : index
    %17 = vector.load %arg4[%c0_21, %c0_22] : memref<512x128xbf16, #tpu.memory_space<vmem>>, vector<512x128xbf16>
    %cst = arith.constant dense<0.000000e+00> : vector<64x128xf32>
    %18 = tpu.matmul %16, %17, %cst {dimension_numbers = #tpu.dot_dimension_numbers<[1], [0], [0], [1], [0, 0, 1, 1], [], []>} : vector<64x512xbf16>, vector<512x128xbf16>, vector<64x128xf32> -> vector<64x128xf32>
    %c0_23 = arith.constant 0 : index
    %c0_24 = arith.constant 0 : index
    %19 = vector.load %arg5[%c0_23, %c0_24] : memref<1x128xf32, #tpu.memory_space<vmem>>, vector<1x128xf32>
    %20 = vector.broadcast %19 : vector<1x128xf32> to vector<64x128xf32>
    %21 = arith.addf %18, %20 : vector<64x128xf32>
    %22 = vector.shape_cast %21 : vector<64x128xf32> to vector<1x8x8x128xf32>
    %cst_25 = arith.constant 0.000000e+00 : f32
    %23 = vector.broadcast %cst_25 : f32 to vector<1x8x8x128xf32>
    %24 = arith.maximumf %22, %23 : vector<1x8x8x128xf32>
    %25 = arith.truncf %24 : vector<1x8x8x128xf32> to vector<1x8x8x128xbf16>
    %c0_26 = arith.constant 0 : index
    %c0_27 = arith.constant 0 : index
    %c0_28 = arith.constant 0 : index
    %c0_29 = arith.constant 0 : index
    %26 = vector.load %arg6[%c0_26, %c0_27, %c0_28, %c0_29] : memref<1x8x8x128xbf16, #tpu.memory_space<vmem>>, vector<1x8x8x128xbf16>
    tpu.vector_store %arg6[%c0_26, %c0_27, %c0_28, %c0_29], %25 {strides = array<i32>} : memref<1x8x8x128xbf16, #tpu.memory_space<vmem>>, vector<1x8x8x128xbf16>,
    return
  }
  func.func @transform_0(%arg0: i32, %arg1: i32, %arg2: i32) -> (i32, i32, i32, i32) {
    %c0_i32 = arith.constant 0 : i32
    %c0_i32_0 = arith.constant 0 : i32
    %c0_i32_1 = arith.constant 0 : i32
    %c0_i32_2 = arith.constant 0 : i32
    return %arg0, %c0_i32, %c0_i32_0, %c0_i32_1 : i32, i32, i32, i32
  }
  func.func @transform_1(%arg0: i32, %arg1: i32, %arg2: i32) -> (i32, i32) {
    %c0_i32 = arith.constant 0 : i32
    %c0_i32_0 = arith.constant 0 : i32
    return %c0_i32, %arg1 : i32, i32
  }
  func.func @transform_2(%arg0: i32, %arg1: i32, %arg2: i32) -> (i32, i32) {
    %c0_i32 = arith.constant 0 : i32
    %c0_i32_0 = arith.constant 0 : i32
    return %c0_i32, %arg1 : i32, i32
  }
  func.func @transform_3(%arg0: i32, %arg1: i32, %arg2: i32) -> (i32, i32, i32, i32) {
    %c0_i32 = arith.constant 0 : i32
    %c0_i32_0 = arith.constant 0 : i32
    return %arg0, %arg2, %c0_i32, %arg1 : i32, i32, i32, i32
  }
}

module attributes {stable_mosaic.version = 11 : i64} {
  func.func @kernel(%arg0: i32, %arg1: i32, %arg2: i32, %arg3: memref<1x10x10x128xbf16, #tpu.memory_space<vmem>>, %arg4: memref<1152x128xbf16, #tpu.memory_space<vmem>>, %arg5: memref<1x128xf32, #tpu.memory_space<vmem>>, %arg6: memref<1x8x8x128xbf16, #tpu.memory_space<vmem>>, %arg7: memref<1x8x8x128xbf16, #tpu.memory_space<vmem>>, %arg8: memref<64x1152xbf16, #tpu.memory_space<vmem>>) attributes {dimension_semantics = [#tpu.dimension_semantics<parallel>, #tpu.dimension_semantics<parallel>, #tpu.dimension_semantics<parallel>], iteration_bounds = array<i64: 2, 1, 1>, scalar_prefetch = 0 : i64, scratch_operands = 1 : i64, tpu.core_type = #tpu.core_type<tc>, window_params = [{transform_indices = @transform_0, window_bounds = array<i64: 1, 10, 10, 128>}, {transform_indices = @transform_1, window_bounds = array<i64: 1152, 128>}, {transform_indices = @transform_2, window_bounds = array<i64: 1, 128>}, {transform_indices = @transform_3, window_bounds = array<i64: 1, 8, 8, 128>}, {transform_indices = @transform_4, window_bounds = array<i64: 1, 8, 8, 128>}]} {
    %c0 = arith.constant 0 : index
    %c0_0 = arith.constant 0 : index
    %c0_1 = arith.constant 0 : index
    %c0_2 = arith.constant 0 : index
    %0 = vector.load %arg3[%c0, %c0_0, %c0_1, %c0_2] : memref<1x10x10x128xbf16, #tpu.memory_space<vmem>>, vector<1x8x8x128xbf16>
    %1 = vector.shape_cast %0 : vector<1x8x8x128xbf16> to vector<8x8x128xbf16>
    %2 = vector.shape_cast %1 : vector<8x8x128xbf16> to vector<64x128xbf16>
    %c0_3 = arith.constant 0 : index
    %c0_4 = arith.constant 0 : index
    %3 = vector.load %arg8[%c0_3, %c0_4] : memref<64x1152xbf16, #tpu.memory_space<vmem>>, vector<64x128xbf16>
    tpu.vector_store %arg8[%c0_3, %c0_4], %2 {strides = array<i32>} : memref<64x1152xbf16, #tpu.memory_space<vmem>>, vector<64x128xbf16>,
    %c0_5 = arith.constant 0 : index
    %c0_6 = arith.constant 0 : index
    %c1 = arith.constant 1 : index
    %c0_7 = arith.constant 0 : index
    %4 = vector.load %arg3[%c0_5, %c0_6, %c1, %c0_7] : memref<1x10x10x128xbf16, #tpu.memory_space<vmem>>, vector<1x8x8x128xbf16>
    %5 = vector.shape_cast %4 : vector<1x8x8x128xbf16> to vector<8x8x128xbf16>
    %6 = vector.shape_cast %5 : vector<8x8x128xbf16> to vector<64x128xbf16>
    %c0_8 = arith.constant 0 : index
    %c128 = arith.constant 128 : index
    %7 = vector.load %arg8[%c0_8, %c128] : memref<64x1152xbf16, #tpu.memory_space<vmem>>, vector<64x128xbf16>
    tpu.vector_store %arg8[%c0_8, %c128], %6 {strides = array<i32>} : memref<64x1152xbf16, #tpu.memory_space<vmem>>, vector<64x128xbf16>,
    %c0_9 = arith.constant 0 : index
    %c0_10 = arith.constant 0 : index
    %c2 = arith.constant 2 : index
    %c0_11 = arith.constant 0 : index
    %8 = vector.load %arg3[%c0_9, %c0_10, %c2, %c0_11] : memref<1x10x10x128xbf16, #tpu.memory_space<vmem>>, vector<1x8x8x128xbf16>
    %9 = vector.shape_cast %8 : vector<1x8x8x128xbf16> to vector<8x8x128xbf16>
    %10 = vector.shape_cast %9 : vector<8x8x128xbf16> to vector<64x128xbf16>
    %c0_12 = arith.constant 0 : index
    %c256 = arith.constant 256 : index
    %11 = vector.load %arg8[%c0_12, %c256] : memref<64x1152xbf16, #tpu.memory_space<vmem>>, vector<64x128xbf16>
    tpu.vector_store %arg8[%c0_12, %c256], %10 {strides = array<i32>} : memref<64x1152xbf16, #tpu.memory_space<vmem>>, vector<64x128xbf16>,
    %c0_13 = arith.constant 0 : index
    %c1_14 = arith.constant 1 : index
    %c0_15 = arith.constant 0 : index
    %c0_16 = arith.constant 0 : index
    %12 = vector.load %arg3[%c0_13, %c1_14, %c0_15, %c0_16] : memref<1x10x10x128xbf16, #tpu.memory_space<vmem>>, vector<1x8x8x128xbf16>
    %13 = vector.shape_cast %12 : vector<1x8x8x128xbf16> to vector<8x8x128xbf16>
    %14 = vector.shape_cast %13 : vector<8x8x128xbf16> to vector<64x128xbf16>
    %c0_17 = arith.constant 0 : index
    %c384 = arith.constant 384 : index
    %15 = vector.load %arg8[%c0_17, %c384] : memref<64x1152xbf16, #tpu.memory_space<vmem>>, vector<64x128xbf16>
    tpu.vector_store %arg8[%c0_17, %c384], %14 {strides = array<i32>} : memref<64x1152xbf16, #tpu.memory_space<vmem>>, vector<64x128xbf16>,
    %c0_18 = arith.constant 0 : index
    %c1_19 = arith.constant 1 : index
    %c1_20 = arith.constant 1 : index
    %c0_21 = arith.constant 0 : index
    %16 = vector.load %arg3[%c0_18, %c1_19, %c1_20, %c0_21] : memref<1x10x10x128xbf16, #tpu.memory_space<vmem>>, vector<1x8x8x128xbf16>
    %17 = vector.shape_cast %16 : vector<1x8x8x128xbf16> to vector<8x8x128xbf16>
    %18 = vector.shape_cast %17 : vector<8x8x128xbf16> to vector<64x128xbf16>
    %c0_22 = arith.constant 0 : index
    %c512 = arith.constant 512 : index
    %19 = vector.load %arg8[%c0_22, %c512] : memref<64x1152xbf16, #tpu.memory_space<vmem>>, vector<64x128xbf16>
    tpu.vector_store %arg8[%c0_22, %c512], %18 {strides = array<i32>} : memref<64x1152xbf16, #tpu.memory_space<vmem>>, vector<64x128xbf16>,
    %c0_23 = arith.constant 0 : index
    %c1_24 = arith.constant 1 : index
    %c2_25 = arith.constant 2 : index
    %c0_26 = arith.constant 0 : index
    %20 = vector.load %arg3[%c0_23, %c1_24, %c2_25, %c0_26] : memref<1x10x10x128xbf16, #tpu.memory_space<vmem>>, vector<1x8x8x128xbf16>
    %21 = vector.shape_cast %20 : vector<1x8x8x128xbf16> to vector<8x8x128xbf16>
    %22 = vector.shape_cast %21 : vector<8x8x128xbf16> to vector<64x128xbf16>
    %c0_27 = arith.constant 0 : index
    %c640 = arith.constant 640 : index
    %23 = vector.load %arg8[%c0_27, %c640] : memref<64x1152xbf16, #tpu.memory_space<vmem>>, vector<64x128xbf16>
    tpu.vector_store %arg8[%c0_27, %c640], %22 {strides = array<i32>} : memref<64x1152xbf16, #tpu.memory_space<vmem>>, vector<64x128xbf16>,
    %c0_28 = arith.constant 0 : index
    %c2_29 = arith.constant 2 : index
    %c0_30 = arith.constant 0 : index
    %c0_31 = arith.constant 0 : index
    %24 = vector.load %arg3[%c0_28, %c2_29, %c0_30, %c0_31] : memref<1x10x10x128xbf16, #tpu.memory_space<vmem>>, vector<1x8x8x128xbf16>
    %25 = vector.shape_cast %24 : vector<1x8x8x128xbf16> to vector<8x8x128xbf16>
    %26 = vector.shape_cast %25 : vector<8x8x128xbf16> to vector<64x128xbf16>
    %c0_32 = arith.constant 0 : index
    %c768 = arith.constant 768 : index
    %27 = vector.load %arg8[%c0_32, %c768] : memref<64x1152xbf16, #tpu.memory_space<vmem>>, vector<64x128xbf16>
    tpu.vector_store %arg8[%c0_32, %c768], %26 {strides = array<i32>} : memref<64x1152xbf16, #tpu.memory_space<vmem>>, vector<64x128xbf16>,
    %c0_33 = arith.constant 0 : index
    %c2_34 = arith.constant 2 : index
    %c1_35 = arith.constant 1 : index
    %c0_36 = arith.constant 0 : index
    %28 = vector.load %arg3[%c0_33, %c2_34, %c1_35, %c0_36] : memref<1x10x10x128xbf16, #tpu.memory_space<vmem>>, vector<1x8x8x128xbf16>
    %29 = vector.shape_cast %28 : vector<1x8x8x128xbf16> to vector<8x8x128xbf16>
    %30 = vector.shape_cast %29 : vector<8x8x128xbf16> to vector<64x128xbf16>
    %c0_37 = arith.constant 0 : index
    %c896 = arith.constant 896 : index
    %31 = vector.load %arg8[%c0_37, %c896] : memref<64x1152xbf16, #tpu.memory_space<vmem>>, vector<64x128xbf16>
    tpu.vector_store %arg8[%c0_37, %c896], %30 {strides = array<i32>} : memref<64x1152xbf16, #tpu.memory_space<vmem>>, vector<64x128xbf16>,
    %c0_38 = arith.constant 0 : index
    %c2_39 = arith.constant 2 : index
    %c2_40 = arith.constant 2 : index
    %c0_41 = arith.constant 0 : index
    %32 = vector.load %arg3[%c0_38, %c2_39, %c2_40, %c0_41] : memref<1x10x10x128xbf16, #tpu.memory_space<vmem>>, vector<1x8x8x128xbf16>
    %33 = vector.shape_cast %32 : vector<1x8x8x128xbf16> to vector<8x8x128xbf16>
    %34 = vector.shape_cast %33 : vector<8x8x128xbf16> to vector<64x128xbf16>
    %c0_42 = arith.constant 0 : index
    %c1024 = arith.constant 1024 : index
    %35 = vector.load %arg8[%c0_42, %c1024] : memref<64x1152xbf16, #tpu.memory_space<vmem>>, vector<64x128xbf16>
    tpu.vector_store %arg8[%c0_42, %c1024], %34 {strides = array<i32>} : memref<64x1152xbf16, #tpu.memory_space<vmem>>, vector<64x128xbf16>,
    %c0_43 = arith.constant 0 : index
    %c0_44 = arith.constant 0 : index
    %36 = vector.load %arg8[%c0_43, %c0_44] : memref<64x1152xbf16, #tpu.memory_space<vmem>>, vector<64x1152xbf16>
    %c0_45 = arith.constant 0 : index
    %c0_46 = arith.constant 0 : index
    %37 = vector.load %arg4[%c0_45, %c0_46] : memref<1152x128xbf16, #tpu.memory_space<vmem>>, vector<1152x128xbf16>
    %cst = arith.constant dense<0.000000e+00> : vector<64x128xf32>
    %38 = tpu.matmul %36, %37, %cst {dimension_numbers = #tpu.dot_dimension_numbers<[1], [0], [0], [1], [0, 0, 1, 1], [], []>} : vector<64x1152xbf16>, vector<1152x128xbf16>, vector<64x128xf32> -> vector<64x128xf32>
    %c0_47 = arith.constant 0 : index
    %c0_48 = arith.constant 0 : index
    %39 = vector.load %arg5[%c0_47, %c0_48] : memref<1x128xf32, #tpu.memory_space<vmem>>, vector<1x128xf32>
    %40 = vector.broadcast %39 : vector<1x128xf32> to vector<64x128xf32>
    %41 = arith.addf %38, %40 : vector<64x128xf32>
    %42 = vector.shape_cast %41 : vector<64x128xf32> to vector<1x8x8x128xf32>
    %c0_49 = arith.constant 0 : index
    %c0_50 = arith.constant 0 : index
    %c0_51 = arith.constant 0 : index
    %c0_52 = arith.constant 0 : index
    %43 = vector.load %arg6[%c0_49, %c0_50, %c0_51, %c0_52] : memref<1x8x8x128xbf16, #tpu.memory_space<vmem>>, vector<1x8x8x128xbf16>
    %44 = arith.extf %43 : vector<1x8x8x128xbf16> to vector<1x8x8x128xf32>
    %45 = arith.addf %42, %44 : vector<1x8x8x128xf32>
    %cst_53 = arith.constant 0.000000e+00 : f32
    %46 = vector.broadcast %cst_53 : f32 to vector<1x8x8x128xf32>
    %47 = arith.maximumf %45, %46 : vector<1x8x8x128xf32>
    %48 = arith.truncf %47 : vector<1x8x8x128xf32> to vector<1x8x8x128xbf16>
    %c0_54 = arith.constant 0 : index
    %c0_55 = arith.constant 0 : index
    %c0_56 = arith.constant 0 : index
    %c0_57 = arith.constant 0 : index
    %49 = vector.load %arg7[%c0_54, %c0_55, %c0_56, %c0_57] : memref<1x8x8x128xbf16, #tpu.memory_space<vmem>>, vector<1x8x8x128xbf16>
    tpu.vector_store %arg7[%c0_54, %c0_55, %c0_56, %c0_57], %48 {strides = array<i32>} : memref<1x8x8x128xbf16, #tpu.memory_space<vmem>>, vector<1x8x8x128xbf16>,
    return
  }
  func.func @transform_0(%arg0: i32, %arg1: i32, %arg2: i32) -> (i32, i32, i32, i32) {
    %c0_i32 = arith.constant 0 : i32
    %c0_i32_0 = arith.constant 0 : i32
    %c0_i32_1 = arith.constant 0 : i32
    %c0_i32_2 = arith.constant 0 : i32
    return %arg0, %c0_i32, %c0_i32_0, %c0_i32_1 : i32, i32, i32, i32
  }
  func.func @transform_1(%arg0: i32, %arg1: i32, %arg2: i32) -> (i32, i32) {
    %c0_i32 = arith.constant 0 : i32
    %c0_i32_0 = arith.constant 0 : i32
    return %c0_i32, %arg1 : i32, i32
  }
  func.func @transform_2(%arg0: i32, %arg1: i32, %arg2: i32) -> (i32, i32) {
    %c0_i32 = arith.constant 0 : i32
    %c0_i32_0 = arith.constant 0 : i32
    return %c0_i32, %arg1 : i32, i32
  }
  func.func @transform_3(%arg0: i32, %arg1: i32, %arg2: i32) -> (i32, i32, i32, i32) {
    %c0_i32 = arith.constant 0 : i32
    %c0_i32_0 = arith.constant 0 : i32
    return %arg0, %arg2, %c0_i32, %arg1 : i32, i32, i32, i32
  }
  func.func @transform_4(%arg0: i32, %arg1: i32, %arg2: i32) -> (i32, i32, i32, i32) {
    %c0_i32 = arith.constant 0 : i32
    %c0_i32_0 = arith.constant 0 : i32
    return %arg0, %arg2, %c0_i32, %arg1 : i32, i32, i32, i32
  }
}

module attributes {stable_mosaic.version = 11 : i64} {
  func.func @kernel(%arg0: i32, %arg1: i32, %arg2: i32, %arg3: memref<1x10x10x128xbf16, #tpu.memory_space<vmem>>, %arg4: memref<1152x128xbf16, #tpu.memory_space<vmem>>, %arg5: memref<1x128xf32, #tpu.memory_space<vmem>>, %arg6: memref<1x8x8x128xbf16, #tpu.memory_space<vmem>>, %arg7: memref<64x1152xbf16, #tpu.memory_space<vmem>>) attributes {dimension_semantics = [#tpu.dimension_semantics<parallel>, #tpu.dimension_semantics<parallel>, #tpu.dimension_semantics<parallel>], iteration_bounds = array<i64: 2, 1, 1>, scalar_prefetch = 0 : i64, scratch_operands = 1 : i64, tpu.core_type = #tpu.core_type<tc>, window_params = [{transform_indices = @transform_0, window_bounds = array<i64: 1, 10, 10, 128>}, {transform_indices = @transform_1, window_bounds = array<i64: 1152, 128>}, {transform_indices = @transform_2, window_bounds = array<i64: 1, 128>}, {transform_indices = @transform_3, window_bounds = array<i64: 1, 8, 8, 128>}]} {
    %c0 = arith.constant 0 : index
    %c0_0 = arith.constant 0 : index
    %c0_1 = arith.constant 0 : index
    %c0_2 = arith.constant 0 : index
    %0 = vector.load %arg3[%c0, %c0_0, %c0_1, %c0_2] : memref<1x10x10x128xbf16, #tpu.memory_space<vmem>>, vector<1x8x8x128xbf16>
    %1 = vector.shape_cast %0 : vector<1x8x8x128xbf16> to vector<8x8x128xbf16>
    %2 = vector.shape_cast %1 : vector<8x8x128xbf16> to vector<64x128xbf16>
    %c0_3 = arith.constant 0 : index
    %c0_4 = arith.constant 0 : index
    %3 = vector.load %arg7[%c0_3, %c0_4] : memref<64x1152xbf16, #tpu.memory_space<vmem>>, vector<64x128xbf16>
    tpu.vector_store %arg7[%c0_3, %c0_4], %2 {strides = array<i32>} : memref<64x1152xbf16, #tpu.memory_space<vmem>>, vector<64x128xbf16>,
    %c0_5 = arith.constant 0 : index
    %c0_6 = arith.constant 0 : index
    %c1 = arith.constant 1 : index
    %c0_7 = arith.constant 0 : index
    %4 = vector.load %arg3[%c0_5, %c0_6, %c1, %c0_7] : memref<1x10x10x128xbf16, #tpu.memory_space<vmem>>, vector<1x8x8x128xbf16>
    %5 = vector.shape_cast %4 : vector<1x8x8x128xbf16> to vector<8x8x128xbf16>
    %6 = vector.shape_cast %5 : vector<8x8x128xbf16> to vector<64x128xbf16>
    %c0_8 = arith.constant 0 : index
    %c128 = arith.constant 128 : index
    %7 = vector.load %arg7[%c0_8, %c128] : memref<64x1152xbf16, #tpu.memory_space<vmem>>, vector<64x128xbf16>
    tpu.vector_store %arg7[%c0_8, %c128], %6 {strides = array<i32>} : memref<64x1152xbf16, #tpu.memory_space<vmem>>, vector<64x128xbf16>,
    %c0_9 = arith.constant 0 : index
    %c0_10 = arith.constant 0 : index
    %c2 = arith.constant 2 : index
    %c0_11 = arith.constant 0 : index
    %8 = vector.load %arg3[%c0_9, %c0_10, %c2, %c0_11] : memref<1x10x10x128xbf16, #tpu.memory_space<vmem>>, vector<1x8x8x128xbf16>
    %9 = vector.shape_cast %8 : vector<1x8x8x128xbf16> to vector<8x8x128xbf16>
    %10 = vector.shape_cast %9 : vector<8x8x128xbf16> to vector<64x128xbf16>
    %c0_12 = arith.constant 0 : index
    %c256 = arith.constant 256 : index
    %11 = vector.load %arg7[%c0_12, %c256] : memref<64x1152xbf16, #tpu.memory_space<vmem>>, vector<64x128xbf16>
    tpu.vector_store %arg7[%c0_12, %c256], %10 {strides = array<i32>} : memref<64x1152xbf16, #tpu.memory_space<vmem>>, vector<64x128xbf16>,
    %c0_13 = arith.constant 0 : index
    %c1_14 = arith.constant 1 : index
    %c0_15 = arith.constant 0 : index
    %c0_16 = arith.constant 0 : index
    %12 = vector.load %arg3[%c0_13, %c1_14, %c0_15, %c0_16] : memref<1x10x10x128xbf16, #tpu.memory_space<vmem>>, vector<1x8x8x128xbf16>
    %13 = vector.shape_cast %12 : vector<1x8x8x128xbf16> to vector<8x8x128xbf16>
    %14 = vector.shape_cast %13 : vector<8x8x128xbf16> to vector<64x128xbf16>
    %c0_17 = arith.constant 0 : index
    %c384 = arith.constant 384 : index
    %15 = vector.load %arg7[%c0_17, %c384] : memref<64x1152xbf16, #tpu.memory_space<vmem>>, vector<64x128xbf16>
    tpu.vector_store %arg7[%c0_17, %c384], %14 {strides = array<i32>} : memref<64x1152xbf16, #tpu.memory_space<vmem>>, vector<64x128xbf16>,
    %c0_18 = arith.constant 0 : index
    %c1_19 = arith.constant 1 : index
    %c1_20 = arith.constant 1 : index
    %c0_21 = arith.constant 0 : index
    %16 = vector.load %arg3[%c0_18, %c1_19, %c1_20, %c0_21] : memref<1x10x10x128xbf16, #tpu.memory_space<vmem>>, vector<1x8x8x128xbf16>
    %17 = vector.shape_cast %16 : vector<1x8x8x128xbf16> to vector<8x8x128xbf16>
    %18 = vector.shape_cast %17 : vector<8x8x128xbf16> to vector<64x128xbf16>
    %c0_22 = arith.constant 0 : index
    %c512 = arith.constant 512 : index
    %19 = vector.load %arg7[%c0_22, %c512] : memref<64x1152xbf16, #tpu.memory_space<vmem>>, vector<64x128xbf16>
    tpu.vector_store %arg7[%c0_22, %c512], %18 {strides = array<i32>} : memref<64x1152xbf16, #tpu.memory_space<vmem>>, vector<64x128xbf16>,
    %c0_23 = arith.constant 0 : index
    %c1_24 = arith.constant 1 : index
    %c2_25 = arith.constant 2 : index
    %c0_26 = arith.constant 0 : index
    %20 = vector.load %arg3[%c0_23, %c1_24, %c2_25, %c0_26] : memref<1x10x10x128xbf16, #tpu.memory_space<vmem>>, vector<1x8x8x128xbf16>
    %21 = vector.shape_cast %20 : vector<1x8x8x128xbf16> to vector<8x8x128xbf16>
    %22 = vector.shape_cast %21 : vector<8x8x128xbf16> to vector<64x128xbf16>
    %c0_27 = arith.constant 0 : index
    %c640 = arith.constant 640 : index
    %23 = vector.load %arg7[%c0_27, %c640] : memref<64x1152xbf16, #tpu.memory_space<vmem>>, vector<64x128xbf16>
    tpu.vector_store %arg7[%c0_27, %c640], %22 {strides = array<i32>} : memref<64x1152xbf16, #tpu.memory_space<vmem>>, vector<64x128xbf16>,
    %c0_28 = arith.constant 0 : index
    %c2_29 = arith.constant 2 : index
    %c0_30 = arith.constant 0 : index
    %c0_31 = arith.constant 0 : index
    %24 = vector.load %arg3[%c0_28, %c2_29, %c0_30, %c0_31] : memref<1x10x10x128xbf16, #tpu.memory_space<vmem>>, vector<1x8x8x128xbf16>
    %25 = vector.shape_cast %24 : vector<1x8x8x128xbf16> to vector<8x8x128xbf16>
    %26 = vector.shape_cast %25 : vector<8x8x128xbf16> to vector<64x128xbf16>
    %c0_32 = arith.constant 0 : index
    %c768 = arith.constant 768 : index
    %27 = vector.load %arg7[%c0_32, %c768] : memref<64x1152xbf16, #tpu.memory_space<vmem>>, vector<64x128xbf16>
    tpu.vector_store %arg7[%c0_32, %c768], %26 {strides = array<i32>} : memref<64x1152xbf16, #tpu.memory_space<vmem>>, vector<64x128xbf16>,
    %c0_33 = arith.constant 0 : index
    %c2_34 = arith.constant 2 : index
    %c1_35 = arith.constant 1 : index
    %c0_36 = arith.constant 0 : index
    %28 = vector.load %arg3[%c0_33, %c2_34, %c1_35, %c0_36] : memref<1x10x10x128xbf16, #tpu.memory_space<vmem>>, vector<1x8x8x128xbf16>
    %29 = vector.shape_cast %28 : vector<1x8x8x128xbf16> to vector<8x8x128xbf16>
    %30 = vector.shape_cast %29 : vector<8x8x128xbf16> to vector<64x128xbf16>
    %c0_37 = arith.constant 0 : index
    %c896 = arith.constant 896 : index
    %31 = vector.load %arg7[%c0_37, %c896] : memref<64x1152xbf16, #tpu.memory_space<vmem>>, vector<64x128xbf16>
    tpu.vector_store %arg7[%c0_37, %c896], %30 {strides = array<i32>} : memref<64x1152xbf16, #tpu.memory_space<vmem>>, vector<64x128xbf16>,
    %c0_38 = arith.constant 0 : index
    %c2_39 = arith.constant 2 : index
    %c2_40 = arith.constant 2 : index
    %c0_41 = arith.constant 0 : index
    %32 = vector.load %arg3[%c0_38, %c2_39, %c2_40, %c0_41] : memref<1x10x10x128xbf16, #tpu.memory_space<vmem>>, vector<1x8x8x128xbf16>
    %33 = vector.shape_cast %32 : vector<1x8x8x128xbf16> to vector<8x8x128xbf16>
    %34 = vector.shape_cast %33 : vector<8x8x128xbf16> to vector<64x128xbf16>
    %c0_42 = arith.constant 0 : index
    %c1024 = arith.constant 1024 : index
    %35 = vector.load %arg7[%c0_42, %c1024] : memref<64x1152xbf16, #tpu.memory_space<vmem>>, vector<64x128xbf16>
    tpu.vector_store %arg7[%c0_42, %c1024], %34 {strides = array<i32>} : memref<64x1152xbf16, #tpu.memory_space<vmem>>, vector<64x128xbf16>,
    %c0_43 = arith.constant 0 : index
    %c0_44 = arith.constant 0 : index
    %36 = vector.load %arg7[%c0_43, %c0_44] : memref<64x1152xbf16, #tpu.memory_space<vmem>>, vector<64x1152xbf16>
    %c0_45 = arith.constant 0 : index
    %c0_46 = arith.constant 0 : index
    %37 = vector.load %arg4[%c0_45, %c0_46] : memref<1152x128xbf16, #tpu.memory_space<vmem>>, vector<1152x128xbf16>
    %cst = arith.constant dense<0.000000e+00> : vector<64x128xf32>
    %38 = tpu.matmul %36, %37, %cst {dimension_numbers = #tpu.dot_dimension_numbers<[1], [0], [0], [1], [0, 0, 1, 1], [], []>} : vector<64x1152xbf16>, vector<1152x128xbf16>, vector<64x128xf32> -> vector<64x128xf32>
    %c0_47 = arith.constant 0 : index
    %c0_48 = arith.constant 0 : index
    %39 = vector.load %arg5[%c0_47, %c0_48] : memref<1x128xf32, #tpu.memory_space<vmem>>, vector<1x128xf32>
    %40 = vector.broadcast %39 : vector<1x128xf32> to vector<64x128xf32>
    %41 = arith.addf %38, %40 : vector<64x128xf32>
    %42 = vector.shape_cast %41 : vector<64x128xf32> to vector<1x8x8x128xf32>
    %cst_49 = arith.constant 0.000000e+00 : f32
    %43 = vector.broadcast %cst_49 : f32 to vector<1x8x8x128xf32>
    %44 = arith.maximumf %42, %43 : vector<1x8x8x128xf32>
    %45 = arith.truncf %44 : vector<1x8x8x128xf32> to vector<1x8x8x128xbf16>
    %c0_50 = arith.constant 0 : index
    %c0_51 = arith.constant 0 : index
    %c0_52 = arith.constant 0 : index
    %c0_53 = arith.constant 0 : index
    %46 = vector.load %arg6[%c0_50, %c0_51, %c0_52, %c0_53] : memref<1x8x8x128xbf16, #tpu.memory_space<vmem>>, vector<1x8x8x128xbf16>
    tpu.vector_store %arg6[%c0_50, %c0_51, %c0_52, %c0_53], %45 {strides = array<i32>} : memref<1x8x8x128xbf16, #tpu.memory_space<vmem>>, vector<1x8x8x128xbf16>,
    return
  }
  func.func @transform_0(%arg0: i32, %arg1: i32, %arg2: i32) -> (i32, i32, i32, i32) {
    %c0_i32 = arith.constant 0 : i32
    %c0_i32_0 = arith.constant 0 : i32
    %c0_i32_1 = arith.constant 0 : i32
    %c0_i32_2 = arith.constant 0 : i32
    return %arg0, %c0_i32, %c0_i32_0, %c0_i32_1 : i32, i32, i32, i32
  }
  func.func @transform_1(%arg0: i32, %arg1: i32, %arg2: i32) -> (i32, i32) {
    %c0_i32 = arith.constant 0 : i32
    %c0_i32_0 = arith.constant 0 : i32
    return %c0_i32, %arg1 : i32, i32
  }
  func.func @transform_2(%arg0: i32, %arg1: i32, %arg2: i32) -> (i32, i32) {
    %c0_i32 = arith.constant 0 : i32
    %c0_i32_0 = arith.constant 0 : i32
    return %c0_i32, %arg1 : i32, i32
  }
  func.func @transform_3(%arg0: i32, %arg1: i32, %arg2: i32) -> (i32, i32, i32, i32) {
    %c0_i32 = arith.constant 0 : i32
    %c0_i32_0 = arith.constant 0 : i32
    return %arg0, %arg2, %c0_i32, %arg1 : i32, i32, i32, i32
  }
}

</mosaic_0001>

<bundles_post_ra>
// kernel: _lambda_.5
= control target key start
LH: loop header
LB: loop body
LE: loop exit
PB: predicated region body
PF: predicated region fallthrough
CT: control target
= control target key end

     0   :  { %s728_s12 = smov 0   ;;  %s730_s13 = smov 0   ;;  %s798_s0 = inlined_call_operand.vmem [shape: bf16[2,9,9,128], index: 0, kind: input, shape index: {}]   ;;  %s799_s1 = inlined_call_operand.vmem [shape: bf16[128,128], index: 1, kind: input, shape index: {}]   ;;  %s800_s2 = inlined_call_operand.vmem [shape: f32[1,128], index: 2, kind: input, shape index: {}]   ;;  %s801_s3 = inlined_call_operand.vmem [shape: bf16[2,8,8,128], index: 3, kind: output, shape index: {}]  }
   0x1   :  { %s732_s14 = smov 0  }
   0x2 LB: > { %s32_s15 = sadd.s32 1, %s702_s13  ;;  %p552_p0 = scmp.ge.s32.totalorder %s706_s14, 1  ;;  %s706_s14 = sphi %s732_s14, %s13_s14   ;;  %s702_s13 = sphi %s730_s13, %s803_s13   ;;  %s698_s12 = sphi %s728_s12, %s802_s12  }
   0x3   : > { %p34_p1 = scmp.ge.s32.totalorder %s32_s15, 2  ;;  %p177_p2 = scmp.lt.s32.totalorder %s706_s14, 3 }
   0x5   : > { %s805_s15 = smov (%p34_p1, %s32_s15), 0  ;;  %p178_p3 = pnand %p552_p0, %p177_p2 }
   0x6   : > { %v672_v0 = vld [vmem:[%s799_s1] sm:$0xff] (!%p178_p3)   ;;  %p215_p4 = scmp.lt.s32.totalorder (!%p178_p3), %s698_s12, 1  ;;  %v673_v1 = vld [vmem:[%s799_s1 + $0x8] sm:$0xff] (!%p178_p3)   ;;  %v674_v2 = vld [vmem:[%s799_s1 + $0x10] sm:$0xff] (!%p178_p3)  }
   0x7   : > { %181 = sbr.rel (%p178_p3) target bundleno = 260 (0x104), region = 32  ;;  %607 = vmatprep.subr.bf16.mxu0 (!%p178_p3), %v672_v0  ;;  %631 = vmatprep.subr.bf16.mxu1 (!%p178_p3), %v672_v0  ;;  %v675_v3 = vld [vmem:[%s799_s1 + $0x18] sm:$0xff] (!%p178_p3)   ;;  %v676_v6 = vld [vmem:[%s799_s1 + $0x20] sm:$0xff] (!%p178_p3)   ;;  %v677_v7 = vld [vmem:[%s799_s1 + $0x28] sm:$0xff] (!%p178_p3)  }
   0x8   : > { %608 = vmatpush3.bf16.msra.mxu0 (!%p178_p3), %v672_v0  ;;  %639 = vmatpush3.bf16.msra.mxu1 (!%p178_p3), %v672_v0  ;;  %v678_v8 = vld [vmem:[%s799_s1 + $0x30] sm:$0xff] (!%p178_p3)   ;;  %v679_v9 = vld [vmem:[%s799_s1 + $0x38] sm:$0xff] (!%p178_p3)   ;;  %v556_v13 = vld [vmem:[%s800_s2] ss:$0 sm:$0xff] (!%p178_p3) }
   0x9   : > { %609 = vmatprep.subr.bf16.mxu0 (!%p178_p3), %v673_v1  ;;  %632 = vmatprep.subr.bf16.mxu1 (!%p178_p3), %v673_v1 }
   0xc   : > { %610 = vmatpush3.bf16.msra.mxu0 (!%p178_p3), %v673_v1  ;;  %640 = vmatpush3.bf16.msra.mxu1 (!%p178_p3), %v673_v1 }
   0xd   : > { %611 = vmatprep.subr.bf16.mxu0 (!%p178_p3), %v674_v2  ;;  %633 = vmatprep.subr.bf16.mxu1 (!%p178_p3), %v674_v2 }
   0xe   : > { %s807_s12 = smov (!%p215_p4, %s698_s12), 1 }
   0xf   : > { %s647_s22 = smul.u32 72, %s807_s12  ;;  %s571_s11 = sshll.u32 %s807_s12, 5 }
  0x10   : > { %612 = vmatpush3.bf16.msra.mxu0 %v674_v2  ;;  %641 = vmatpush3.bf16.msra.mxu1 %v674_v2  ;;  %s238_s18 = scalar_lea.vmem %s801_s3, %s571_s11 }
  0x11   : > { %s761_s25 = scalar_lea.vmem %s798_s0, %s647_s22  ;;  %613 = vmatprep.subr.bf16.mxu0 %v675_v3  ;;  %634 = vmatprep.subr.bf16.mxu1 %v675_v3 }
  0x12   : > { %v680_v4 = vld [vmem:[%s761_s25] ss:$8 sps:$4 sm:$0xff]   ;;  %v682_v10 = vld [vmem:[%s761_s25 + $0x10] ss:$8 sps:$4 sm:$0xff]  }
  0x13   : > { %v681_v5 = vld [vmem:[%s761_s25 + $0x20] ss:$8 sps:$4 sm:$0xff]   ;;  %623 = vmatprep.mubr.bf16.mxu0 %v680_v4  ;;  %v683_v11 = vld [vmem:[%s761_s25 + $0x30] ss:$8 sps:$4 sm:$0xff]  }
  0x14   : > { %627 = vmatprep.mubr.bf16.mxu1 %v681_v5  ;;  %614 = vmatpush3.bf16.msra.mxu0 %v675_v3 }
  0x15   : > { %642 = vmatpush3.bf16.msra.mxu1 %v675_v3  ;;  %615 = vmatprep.subr.bf16.mxu0 %v676_v6 }
  0x16   : > { %635 = vmatprep.subr.bf16.mxu1 %v676_v6 }
  0x18   : > { %616 = vmatpush3.bf16.msra.mxu0 %v676_v6 }
  0x19   : > { %643 = vmatpush3.bf16.msra.mxu1 %v676_v6  ;;  %617 = vmatprep.subr.bf16.mxu0 %v677_v7 }
  0x1a   : > { %636 = vmatprep.subr.bf16.mxu1 %v677_v7 }
  0x1c   : > { %618 = vmatpush3.bf16.msra.mxu0 %v677_v7 }
  0x1d   : > { %644 = vmatpush3.bf16.msra.mxu1 %v677_v7  ;;  %619 = vmatprep.subr.bf16.mxu0 %v678_v8 }
  0x1e   : > { %637 = vmatprep.subr.bf16.mxu1 %v678_v8 }
  0x20   : > { %620 = vmatpush3.bf16.msra.mxu0 %v678_v8 }
  0x21   : > { %645 = vmatpush3.bf16.msra.mxu1 %v678_v8  ;;  %621 = vmatprep.subr.bf16.mxu0 %v679_v9 }
  0x22   : > { %638 = vmatprep.subr.bf16.mxu1 %v679_v9 }
  0x24   : > { %622 = vmatpush3.bf16.msra.mxu0 %v679_v9 }
  0x25   : > { %646 = vmatpush3.bf16.msra.mxu1 %v679_v9 }
  0x27   : > { %624 = vmatmul.mubr.bf16.vlgmr.msra.gmra.mrb[0].mxu0 %v682_v10 }
  0x28   : > { %628 = vmatmul.mubr.bf16.vlgmr.msra.gmra.mrb[0].mxu1 %v683_v11 }
  0xfa   : > { %v625_v12 = vpop.f32.mrb[0].mxu0 }
  0xfb   : > { %v629_v14 = vpop.f32.mrb[0].mxu1  ;;  %v378_v15 = vpop.f32.mrb[1].mxu0  ;;  %v387_v19 = vadd.f32 %v625_v12, %v556_v13 }
  0xfc   : > { %v394_v16 = vpop.f32.mrb[1].mxu1  ;;  %v626_v17 = vpop.f32.mrb[2].mxu0  ;;  %v403_v20 = vadd.f32 %v629_v14, %v556_v13  ;;  %v379_v25 = vadd.f32 %v556_v13, %v378_v15 }
  0xfd   : > { %v630_v18 = vpop.f32.mrb[2].mxu1  ;;  %v390_v21 = vadd.f32 %v626_v17, %v556_v13  ;;  %v381_v23 = vpop.f32.mrb[3].mxu0  ;;  %v395_v26 = vadd.f32 %v556_v13, %v394_v16 }
  0xfe   : > { %v406_v22 = vadd.f32 %v630_v18, %v556_v13  ;;  %v397_v24 = vpop.f32.mrb[3].mxu1  ;;  %v382_v27 = vadd.f32 %v556_v13, %v381_v23 }
  0xff   : > { %v398_v28 = vadd.f32 %v556_v13, %v397_v24  ;;  %v580_v29 = vpack.c.bf16 %v390_v21, %v387_v19 }
 0x100   : > { %v590_v30 = vpack.c.bf16 %v406_v22, %v403_v20  ;;  %v575_v31 = vpack.c.bf16 %v382_v27, %v379_v25 }
 0x101   : > { %v585_v32 = vpack.c.bf16 %v398_v28, %v395_v26  ;;  %592 = vst [vmem:[%s238_s18 + $0x8] sm:$0xff] %v580_v29  }
 0x102   : > { %594 = vst [vmem:[%s238_s18 + $0x18] sm:$0xff] %v590_v30   ;;  %576 = vst [vmem:[%s238_s18] sm:$0xff] %v575_v31  }
 0x103   : > { %593 = vst [vmem:[%s238_s18 + $0x10] sm:$0xff] %v585_v32  }
 0x104 PF: > { %s13_s14 = sadd.s32 1, %s706_s14   ;;  %s802_s12 = smov %s702_s13 }
 0x105   : > { %p10_p5 = scmp.ge.s32.totalorder %s13_s14, 4   ;;  %s803_s13 = smov %s805_s15 }
 0x107   :  { %12 = sbr.rel (!%p10_p5) target bundleno = 2 (0x2), region = 68 }

// kernel: _lambda_.6
= control target key start
LH: loop header
LB: loop body
LE: loop exit
PB: predicated region body
PF: predicated region fallthrough
CT: control target
= control target key end

     0   :  { %s1465_s12 = smov 0   ;;  %s1467_s13 = smov 0   ;;  %s1701_s0 = inlined_call_operand.vmem [shape: bf16[2,9,9,128], index: 0, kind: input, shape index: {}]   ;;  %s1702_s1 = inlined_call_operand.vmem [shape: bf16[512,128], index: 1, kind: input, shape index: {}]   ;;  %s1703_s2 = inlined_call_operand.vmem [shape: f32[1,128], index: 2, kind: input, shape index: {}]   ;;  %s1704_s3 = inlined_call_operand.vmem [shape: bf16[2,8,8,128], index: 3, kind: output, shape index: {}]  }
   0x1   :  { %s1469_s14 = smov 0  }
   0x2 LB: > { %s32_s15 = sadd.s32 1, %s1439_s13  ;;  %p1173_p0 = scmp.ge.s32.totalorder %s1443_s14, 1  ;;  %s1443_s14 = sphi %s1469_s14, %s13_s14   ;;  %s1439_s13 = sphi %s1467_s13, %s1708_s13   ;;  %s1435_s12 = sphi %s1465_s12, %s1707_s12  }
   0x3   : > { %p34_p1 = scmp.ge.s32.totalorder %s32_s15, 2  ;;  %p177_p2 = scmp.lt.s32.totalorder %s1443_s14, 3 }
   0x5   : > { %s1710_s15 = smov (%p34_p1, %s32_s15), 0  ;;  %p178_p3 = pnand %p1173_p0, %p177_p2 }
   0x6   : > { %v1381_v0 = vld [vmem:[%s1702_s1 + $0x40] sm:$0xff] (!%p178_p3)   ;;  %v1385_v4 = vld [vmem:[%s1702_s1 + $0x48] sm:$0xff] (!%p178_p3)   ;;  %v1389_v8 = vld [vmem:[%s1702_s1 + $0x50] sm:$0xff] (!%p178_p3)   ;;  %p215_p4 = scmp.lt.s32.totalorder (!%p178_p3), %s1435_s12, 1  ;;  %vm293_vm0 = vsmask.f32 (!%p178_p3), 3328 }
   0x7   : > { %181 = sbr.rel (%p178_p3) target bundleno = 290 (0x122), region = 32  ;;  %v1382_v1 = vld [vmem:[%s1702_s1 + $0xc0] sm:$0xff] (!%p178_p3)   ;;  %1276 = vmatprep.subr.bf16.mxu0 (!%p178_p3), %v1381_v0  ;;  %v1386_v5 = vld [vmem:[%s1702_s1 + $0xc8] sm:$0xff] (!%p178_p3)   ;;  %v1390_v9 = vld [vmem:[%s1702_s1 + $0xd0] sm:$0xff] (!%p178_p3)   ;;  %vm294_vm1 = vsmask.f32 (!%p178_p3), 7440 }
   0x8   : > { %v1383_v2 = vld [vmem:[%s1702_s1] sm:$0xff] (!%p178_p3)   ;;  %1316 = vmatprep.subr.bf16.mxu1 (!%p178_p3), %v1382_v1  ;;  %v1387_v6 = vld [vmem:[%s1702_s1 + $0x8] sm:$0xff] (!%p178_p3)   ;;  %v1391_v10 = vld [vmem:[%s1702_s1 + $0x10] sm:$0xff] (!%p178_p3)  }
   0x9   : > { %v1384_v3 = vld [vmem:[%s1702_s1 + $0x80] sm:$0xff] (!%p178_p3)   ;;  %1277 = vmatpush3.bf16.msra.mxu0 (!%p178_p3), %v1383_v2  ;;  %v1388_v7 = vld [vmem:[%s1702_s1 + $0x88] sm:$0xff] (!%p178_p3)   ;;  %v1392_v11 = vld [vmem:[%s1702_s1 + $0x90] sm:$0xff] (!%p178_p3)  }
   0xa   : > { %1317 = vmatpush3.bf16.msra.mxu1 (!%p178_p3), %v1384_v3  ;;  %1278 = vmatprep.subr.bf16.mxu0 (!%p178_p3), %v1385_v4  ;;  %v1393_v12 = vld [vmem:[%s1702_s1 + $0x58] sm:$0xff] (!%p178_p3)   ;;  %v1397_v16 = vld [vmem:[%s1702_s1 + $0x60] sm:$0xff] (!%p178_p3)   ;;  %v1401_v20 = vld [vmem:[%s1702_s1 + $0x68] sm:$0xff] (!%p178_p3)  }
   0xb   : > { %1318 = vmatprep.subr.bf16.mxu1 (!%p178_p3), %v1386_v5  ;;  %v1394_v13 = vld [vmem:[%s1702_s1 + $0xd8] sm:$0xff] (!%p178_p3)   ;;  %v1398_v17 = vld [vmem:[%s1702_s1 + $0xe0] sm:$0xff] (!%p178_p3)   ;;  %v1402_v21 = vld [vmem:[%s1702_s1 + $0xe8] sm:$0xff] (!%p178_p3)  }
   0xc   : > { %v1395_v14 = vld [vmem:[%s1702_s1 + $0x18] sm:$0xff] (!%p178_p3)   ;;  %v1399_v18 = vld [vmem:[%s1702_s1 + $0x20] sm:$0xff] (!%p178_p3)   ;;  %v1403_v22 = vld [vmem:[%s1702_s1 + $0x28] sm:$0xff] (!%p178_p3)  }
   0xd   : > { %1279 = vmatpush3.bf16.msra.mxu0 (!%p178_p3), %v1387_v6  ;;  %v1396_v15 = vld [vmem:[%s1702_s1 + $0x98] sm:$0xff] (!%p178_p3)   ;;  %v1400_v19 = vld [vmem:[%s1702_s1 + $0xa0] sm:$0xff] (!%p178_p3)   ;;  %v1404_v23 = vld [vmem:[%s1702_s1 + $0xa8] sm:$0xff] (!%p178_p3)  }
   0xe   : > { %1319 = vmatpush3.bf16.msra.mxu1 %v1388_v7  ;;  %1280 = vmatprep.subr.bf16.mxu0 %v1389_v8  ;;  %s1712_s12 = smov (!%p215_p4, %s1435_s12), 1  ;;  %v1405_v24 = vld [vmem:[%s1702_s1 + $0x70] sm:$0xff]   ;;  %v1409_v28 = vld [vmem:[%s1702_s1 + $0x78] sm:$0xff]   ;;  %vm1601_vm2 = vmor %vm293_vm0, %vm294_vm1 }
   0xf   : > { %1320 = vmatprep.subr.bf16.mxu1 %v1390_v9  ;;  %v1406_v25 = vld [vmem:[%s1702_s1 + $0xf0] sm:$0xff]   ;;  %s1356_s22 = smul.u32 72, %s1712_s12  ;;  %v1410_v29 = vld [vmem:[%s1702_s1 + $0xf8] sm:$0xff]   ;;  %s1252_s17 = sshll.u32 %s1712_s12, 5 }
  0x10   : > { %v1407_v26 = vld [vmem:[%s1702_s1 + $0x30] sm:$0xff]   ;;  %v1411_v30 = vld [vmem:[%s1702_s1 + $0x38] sm:$0xff]   ;;  %s1680_s20 = scalar_lea.vmem %s1704_s3, %s1252_s17 }
  0x11   : > { %1281 = vmatpush3.bf16.msra.mxu0 %v1391_v10  ;;  %v1408_v27 = vld [vmem:[%s1702_s1 + $0xb0] sm:$0xff]   ;;  %s1583_s6 = scalar_lea.vmem %s1701_s0, %s1356_s22  ;;  %v1412_v31 = vld [vmem:[%s1702_s1 + $0xb8] sm:$0xff]  }
  0x12   : > { %1321 = vmatpush3.bf16.msra.mxu1 %v1392_v11  ;;  %1282 = vmatprep.subr.bf16.mxu0 %v1393_v12  ;;  %v277_v32 = vld [vmem:[%s1583_s6] sm:$0xf]  ;;  %v278_v33 = vld [vmem:[%s1583_s6 + $0x4] sm:$0x1]  ;;  %v279_v34 = vld [vmem:[%s1583_s6 + $0x8] sm:$0xf] }
  0x13   : > { %1322 = vmatprep.subr.bf16.mxu1 %v1394_v13  ;;  %v280_v35 = vld [vmem:[%s1583_s6 + $0xc] sm:$0x1]  ;;  %v297_v36 = vshrl.u32 %v277_v32, 16  ;;  %v300_v37 = vshll.u32 %v277_v32, 16  ;;  %v306_v38 = vshll.u32 %v278_v33, 16  ;;  %v311_v39 = vshrl.u32 %v279_v34, 16 }
  0x14   : > { %v1197_v40 = vld [vmem:[%s1583_s6 + $0x8] sm:$0xf]  ;;  %v314_v41 = vshll.u32 %v279_v34, 16  ;;  %v320_v42 = vshll.u32 %v280_v35, 16  ;;  %v1198_v43 = vld [vmem:[%s1583_s6 + $0xc] sm:$0x1] }
  0x15   : > { %1283 = vmatpush3.bf16.msra.mxu0 %v1395_v14  ;;  %v1199_v44 = vld [vmem:[%s1583_s6 + $0x10] sm:$0xf]  ;;  %v299_v45 = vrot.slane %v297_v36, 4  ;;  %v302_v46 = vrot.slane %v300_v37, 5  ;;  %v308_v47 = vrot.slane %v306_v38, 5  ;;  %v313_v48 = vrot.slane %v311_v39, 4 }
  0x16   : > { %1323 = vmatpush3.bf16.msra.mxu1 %v1396_v15  ;;  %1284 = vmatprep.subr.bf16.mxu0 %v1397_v16  ;;  %v1200_v49 = vld [vmem:[%s1583_s6 + $0x14] sm:$0x1]  ;;  %v316_v50 = vrot.slane %v314_v41, 5  ;;  %v322_v51 = vrot.slane %v320_v42, 5  ;;  %v482_v52 = vshrl.u32 %v1197_v40, 16  ;;  %v485_v53 = vshll.u32 %v1197_v40, 16 }
  0x17   : > { %1324 = vmatprep.subr.bf16.mxu1 %v1398_v17  ;;  %v303_v54 = vor.u32 %v302_v46, %v299_v45  ;;  %v491_v55 = vshll.u32 %v1198_v43, 16  ;;  %v496_v56 = vshrl.u32 %v1199_v44, 16  ;;  %v499_v57 = vshll.u32 %v1199_v44, 16  ;;  %v1413_v6 = vld [vmem:[%s1583_s6] ss:$8 sps:$4 sm:$0xff]  }
  0x18   : > { %v317_v59 = vor.u32 %v316_v50, %v313_v48  ;;  %v484_v60 = vrot.slane %v482_v52, 4  ;;  %v487_v61 = vrot.slane %v485_v53, 5  ;;  %v505_v62 = vshll.u32 %v1200_v49, 16  ;;  %v281_v9 = vld [vmem:[%s1583_s6 + $0x10] sm:$0xf] }
  0x19   : > { %1285 = vmatpush3.bf16.msra.mxu0 %v1399_v18  ;;  %v304_v63 = vrot.slane %v303_v54, 4  ;;  %v498_v0 = vrot.slane %v496_v56, 4  ;;  %v501_v1 = vrot.slane %v499_v57, 5  ;;  %v493_v4 = vrot.slane %v491_v55, 5  ;;  %v282_v10 = vld [vmem:[%s1583_s6 + $0x14] sm:$0x1] }
  0x1a   : > { %1325 = vmatpush3.bf16.msra.mxu1 %v1400_v19  ;;  %1286 = vmatprep.subr.bf16.mxu0 %v1401_v20  ;;  %v318_v2 = vrot.slane %v317_v59, 4  ;;  %v488_v3 = vor.u32 %v487_v61, %v484_v60  ;;  %v507_v5 = vrot.slane %v505_v62, 5  ;;  %v283_v11 = vld [vmem:[%s1583_s6 + $0x18] sm:$0xf]  ;;  %v284_v14 = vld [vmem:[%s1583_s6 + $0x1c] sm:$0x1] }
  0x1b   : > { %1326 = vmatprep.subr.bf16.mxu1 %v1402_v21  ;;  %v309_v7 = vsel %vm1601_vm2, %v304_v63, %v308_v47  ;;  %v502_v8 = vor.u32 %v501_v1, %v498_v0  ;;  %v325_v15 = vshrl.u32 %v281_v9, 16  ;;  %v328_v16 = vshll.u32 %v281_v9, 16  ;;  %v1414_v19 = vld [vmem:[%s1583_s6 + $0x8] ss:$8 sps:$4 sm:$0xff]   ;;  %v1203_v32 = vld [vmem:[%s1583_s6 + $0x20] sm:$0xf] }
  0x1c   : > { %v323_v12 = vsel %vm1601_vm2, %v318_v2, %v322_v51  ;;  %v489_v13 = vrot.slane %v488_v3, 4  ;;  %v334_v20 = vshll.u32 %v282_v10, 16  ;;  %v339_v21 = vshrl.u32 %v283_v11, 16  ;;  %v1204_v36 = vld [vmem:[%s1583_s6 + $0x24] sm:$0x1] }
  0x1d   : > { %1287 = vmatpush3.bf16.msra.mxu0 %v1403_v22  ;;  %v1181_v17 = vcombine.low %v309_v7, %v323_v12  ;;  %v503_v18 = vrot.slane %v502_v8, 4  ;;  %v1201_v22 = vld [vmem:[%s1583_s6 + $0x18] sm:$0xf]  ;;  %v524_v41 = vshrl.u32 %v1203_v32, 16  ;;  %v527_v45 = vshll.u32 %v1203_v32, 16 }
  0x1e   : > { %1327 = vmatpush3.bf16.msra.mxu1 %v1404_v23  ;;  %1288 = vmatprep.subr.bf16.mxu0 %v1405_v24  ;;  %v494_v23 = vsel %vm1601_vm2, %v489_v13, %v493_v4  ;;  %v327_v24 = vrot.slane %v325_v15, 4  ;;  %v510_v37 = vshrl.u32 %v1201_v22, 16  ;;  %v513_v39 = vshll.u32 %v1201_v22, 16  ;;  %v1415_v52 = vld [vmem:[%s1583_s6 + $0x10] ss:$8 sps:$4 sm:$0xff]  }
  0x1f   : > { %1328 = vmatprep.subr.bf16.mxu1 %v1406_v25  ;;  %v330_v25 = vrot.slane %v328_v16, 5  ;;  %924 = vmatprep.mubr.bf16.mxu0 %v1181_v17  ;;  %v526_v47 = vrot.slane %v524_v41, 4  ;;  %v533_v48 = vshll.u32 %v1204_v36, 16  ;;  %v529_v51 = vrot.slane %v527_v45, 5  ;;  %v285_v56 = vld [vmem:[%s1583_s6 + $0x20] sm:$0xf] }
  0x20   : > { %v512_v44 = vrot.slane %v510_v37, 4  ;;  %v515_v46 = vrot.slane %v513_v39, 5  ;;  %v286_v57 = vld [vmem:[%s1583_s6 + $0x24] sm:$0x1]  ;;  %v287_v61 = vld [vmem:[%s1583_s6 + $0x28] sm:$0xf] }
  0x21   : > { %1289 = vmatpush3.bf16.msra.mxu0 %v1407_v26  ;;  %v342_v26 = vshll.u32 %v283_v11, 16  ;;  %v331_v34 = vor.u32 %v330_v25, %v327_v24  ;;  %v535_v55 = vrot.slane %v533_v48, 5  ;;  %v530_v60 = vor.u32 %v529_v51, %v526_v47  ;;  %v288_v62 = vld [vmem:[%s1583_s6 + $0x2c] sm:$0x1]  ;;  %v1416_v7 = vld [vmem:[%s1583_s6 + $0x18] ss:$8 sps:$4 sm:$0xff]  }
  0x22   : > { %1329 = vmatpush3.bf16.msra.mxu1 %v1408_v27  ;;  %1290 = vmatprep.subr.bf16.mxu0 %v1409_v28  ;;  %v1202_v27 = vld [vmem:[%s1583_s6 + $0x1c] sm:$0x1]  ;;  %v508_v28 = vsel %vm1601_vm2, %v503_v18, %v507_v5  ;;  %v516_v53 = vor.u32 %v515_v46, %v512_v44  ;;  %v353_v63 = vshrl.u32 %v285_v56, 16  ;;  %v356_v0 = vshll.u32 %v285_v56, 16  ;;  %v1205_v5 = vld [vmem:[%s1583_s6 + $0x28] sm:$0xf] }
  0x23   : > { %1330 = vmatprep.subr.bf16.mxu1 %v1410_v29  ;;  %v336_v29 = vrot.slane %v334_v20, 5  ;;  %v1213_v33 = vcombine.low %v494_v23, %v508_v28  ;;  %v344_v35 = vrot.slane %v342_v26, 5  ;;  %v519_v40 = vshll.u32 %v1202_v27, 16  ;;  %v1206_v11 = vld [vmem:[%s1583_s6 + $0x2c] sm:$0x1] }
  0x24   : > { %v332_v42 = vrot.slane %v331_v34, 4  ;;  %v517_v2 = vrot.slane %v516_v53, 4  ;;  %v362_v3 = vshll.u32 %v286_v57, 16  ;;  %v367_v4 = vshrl.u32 %v287_v61, 16  ;;  %v1207_v16 = vld [vmem:[%s1583_s6 + $0x30] sm:$0xf] }
  0x25   : > { %1291 = vmatpush3.bf16.msra.mxu0 %v1411_v30  ;;  %v341_v30 = vrot.slane %v339_v21, 4  ;;  %989 = vmatprep.mubr.bf16.mxu1 %v1213_v33  ;;  %v521_v54 = vrot.slane %v519_v40, 5  ;;  %v355_v8 = vrot.slane %v353_v63, 4  ;;  %v358_v9 = vrot.slane %v356_v0, 5  ;;  %v1208_v20 = vld [vmem:[%s1583_s6 + $0x34] sm:$0x1] }
  0x26   : > { %1331 = vmatpush3.bf16.msra.mxu1 %v1412_v31  ;;  %v348_v31 = vshll.u32 %v284_v14, 16  ;;  %v337_v49 = vsel %vm1601_vm2, %v332_v42, %v336_v29  ;;  %v370_v10 = vshll.u32 %v287_v61, 16  ;;  %v364_v13 = vrot.slane %v362_v3, 5  ;;  %v1417_v37 = vld [vmem:[%s1583_s6 + $0x20] ss:$8 sps:$4 sm:$0xff]  }
  0x27   : > { %v345_v43 = vor.u32 %v344_v35, %v341_v30  ;;  %v522_v12 = vsel %vm1601_vm2, %v517_v2, %v521_v54  ;;  %v369_v14 = vrot.slane %v367_v4, 4  ;;  %v376_v15 = vshll.u32 %v288_v62, 16  ;;  %v289_v41 = vld [vmem:[%s1583_s6 + $0x30] sm:$0xf]  ;;  %v290_v42 = vld [vmem:[%s1583_s6 + $0x34] sm:$0x1] }
  0x28   : > { %925 = vmatmul.mubr.bf16.vlgmr.msra.gmra.mrb[0].mxu0 %v1413_v6  ;;  %v350_v38 = vrot.slane %v348_v31, 5  ;;  %v531_v6 = vrot.slane %v530_v60, 4  ;;  %v359_v18 = vor.u32 %v358_v9, %v355_v8  ;;  %v538_v21 = vshrl.u32 %v1205_v5, 16  ;;  %v291_v44 = vld [vmem:[%s1583_s6 + $0x38] sm:$0xf] }
  0x29   : > { %990 = vmatmul.mubr.bf16.vlgmr.msra.gmra.mrb[0].mxu1 %v1414_v19  ;;  %v346_v50 = vrot.slane %v345_v43, 4  ;;  %v372_v19 = vrot.slane %v370_v10, 5  ;;  %v378_v23 = vrot.slane %v376_v15, 5  ;;  %v541_v24 = vshll.u32 %v1205_v5, 16  ;;  %v292_v45 = vld [vmem:[%s1583_s6 + $0x3c] sm:$0x1] }
  0x2a   : > { %v536_v17 = vsel %vm1601_vm2, %v531_v6, %v535_v55  ;;  %v547_v25 = vshll.u32 %v1206_v11, 16  ;;  %v360_v26 = vrot.slane %v359_v18, 4  ;;  %v540_v28 = vrot.slane %v538_v21, 4  ;;  %v1210_v53 = vld [vmem:[%s1583_s6 + $0x3c] sm:$0x1] }
  0x2b   : > { %v351_v59 = vsel %vm1601_vm2, %v346_v50, %v350_v38  ;;  %v1214_v22 = vcombine.low %v522_v12, %v536_v17  ;;  %v373_v27 = vor.u32 %v372_v19, %v369_v14  ;;  %v552_v29 = vshrl.u32 %v1207_v16, 16  ;;  %v1418_v62 = vld [vmem:[%s1583_s6 + $0x28] ss:$8 sps:$4 sm:$0xff]  }
  0x2c   : > { %v1182_v1 = vcombine.low %v337_v49, %v351_v59  ;;  %v543_v30 = vrot.slane %v541_v24, 5  ;;  %v555_v31 = vshll.u32 %v1207_v16, 16  ;;  %v561_v32 = vshll.u32 %v1208_v20, 16  ;;  %v1211_v59 = vld [vmem:[%s1583_s6 + $0x40] sm:$0xf] }
  0x2d   : > { %997 = vmatprep.mubr.bf16.mxu1 %v1214_v22  ;;  %v365_v33 = vsel %vm1601_vm2, %v360_v26, %v364_v13  ;;  %v374_v34 = vrot.slane %v373_v27, 4  ;;  %v549_v35 = vrot.slane %v547_v25, 5  ;;  %v554_v36 = vrot.slane %v552_v29, 4  ;;  %v1419_v25 = vld [vmem:[%s1583_s6 + $0x30] ss:$8 sps:$4 sm:$0xff]  }
  0x2e   : > { %932 = vmatprep.mubr.bf16.mxu0 %v1182_v1  ;;  %v544_v38 = vor.u32 %v543_v30, %v540_v28  ;;  %v557_v39 = vrot.slane %v555_v31, 5  ;;  %v563_v40 = vrot.slane %v561_v32, 5  ;;  %v381_v46 = vshrl.u32 %v289_v41, 16  ;;  %v1212_v1 = vld [vmem:[%s1583_s6 + $0x44] sm:$0x1] }
  0x2f   : > { %v379_v43 = vsel %vm1601_vm2, %v374_v34, %v378_v23  ;;  %v384_v47 = vshll.u32 %v289_v41, 16  ;;  %v390_v51 = vshll.u32 %v290_v42, 16  ;;  %v395_v56 = vshrl.u32 %v291_v44, 16 }
  0x30   : > { %933 = vmatmul.mubr.bf16.gmra.mrb[4].mxu0 %v1415_v52  ;;  %v1183_v48 = vcombine.low %v365_v33, %v379_v43  ;;  %v545_v49 = vrot.slane %v544_v38, 4  ;;  %v558_v50 = vor.u32 %v557_v39, %v554_v36  ;;  %v1209_v52 = vld [vmem:[%s1583_s6 + $0x38] sm:$0xf]  ;;  %v383_v54 = vrot.slane %v381_v46, 4  ;;  %v1672_v36 = vld [vmem:[%s1703_s2] ss:$0 sm:$0xff] }
  0x31   : > { %998 = vmatmul.mubr.bf16.gmra.mrb[4].mxu1 %v1416_v7  ;;  %v386_v55 = vrot.slane %v384_v47, 5  ;;  %v398_v57 = vshll.u32 %v291_v44, 16  ;;  %v392_v63 = vrot.slane %v390_v51, 5  ;;  %v404_v0 = vshll.u32 %v292_v45, 16  ;;  %v1420_v33 = vld [vmem:[%s1583_s6 + $0x38] ss:$8 sps:$4 sm:$0xff]  }
  0x32   : > { %940 = vmatprep.mubr.bf16.mxu0 %v1183_v48  ;;  %v550_v60 = vsel %vm1601_vm2, %v545_v49, %v549_v35  ;;  %v559_v61 = vrot.slane %v558_v50, 4  ;;  %v397_v3 = vrot.slane %v395_v56, 4  ;;  %v566_v5 = vshrl.u32 %v1209_v52, 16 }
  0x33   : > { %v387_v2 = vor.u32 %v386_v55, %v383_v54  ;;  %v400_v4 = vrot.slane %v398_v57, 5  ;;  %v406_v7 = vrot.slane %v404_v0, 5  ;;  %v569_v8 = vshll.u32 %v1209_v52, 16 }
  0x34   : > { %v564_v6 = vsel %vm1601_vm2, %v559_v61, %v563_v40  ;;  %v575_v9 = vshll.u32 %v1210_v53, 16  ;;  %v568_v13 = vrot.slane %v566_v5, 4  ;;  %v580_v15 = vshrl.u32 %v1211_v59, 16 }
  0x35   : > { %v1215_v10 = vcombine.low %v550_v60, %v564_v6  ;;  %v388_v11 = vrot.slane %v387_v2, 4  ;;  %v401_v12 = vor.u32 %v400_v4, %v397_v3  ;;  %v571_v14 = vrot.slane %v569_v8, 5 }
  0x36   : > { %v583_v16 = vshll.u32 %v1211_v59, 16  ;;  %v589_v19 = vshll.u32 %v1212_v1, 16  ;;  %v577_v21 = vrot.slane %v575_v9, 5  ;;  %v582_v22 = vrot.slane %v580_v15, 4 }
  0x37   : > { %1005 = vmatprep.mubr.bf16.mxu1 %v1215_v10  ;;  %v393_v17 = vsel %vm1601_vm2, %v388_v11, %v392_v63  ;;  %v402_v18 = vrot.slane %v401_v12, 4  ;;  %v572_v20 = vor.u32 %v571_v14, %v568_v13 }
  0x38   : > { %941 = vmatmul.mubr.bf16.gmra.mrb[8].mxu0 %v1417_v37  ;;  %v585_v23 = vrot.slane %v583_v16, 5  ;;  %v591_v29 = vrot.slane %v589_v19, 5 }
  0x39   : > { %1006 = vmatmul.mubr.bf16.gmra.mrb[8].mxu1 %v1418_v62  ;;  %v407_v24 = vsel %vm1601_vm2, %v402_v18, %v406_v7  ;;  %v573_v27 = vrot.slane %v572_v20, 4 }
  0x3a   : > { %v1184_v26 = vcombine.low %v393_v17, %v407_v24  ;;  %v586_v28 = vor.u32 %v585_v23, %v582_v22 }
  0x3b   : > { %v578_v30 = vsel %vm1601_vm2, %v573_v27, %v577_v21 }
  0x3c   : > { %948 = vmatprep.mubr.bf16.mxu0 %v1184_v26  ;;  %v587_v31 = vrot.slane %v586_v28, 4 }
  0x3e   : > { %v592_v32 = vsel %vm1601_vm2, %v587_v31, %v591_v29 }
  0x3f   : > { %v1216_v34 = vcombine.low %v578_v30, %v592_v32 }
  0x40   : > { %949 = vmatmul.mubr.bf16.gmra.mrb[12].mxu0 %v1419_v25 }
  0x41   : > { %1013 = vmatprep.mubr.bf16.mxu1 %v1216_v34 }
  0x42   : > { %1014 = vmatmul.mubr.bf16.gmra.mrb[12].mxu1 %v1420_v33 }
  0xfb   : > { %v1292_v35 = vpop.f32.mrb[0].mxu0 }
  0xfc   : > { %v1293_v37 = vpop.f32.mrb[1].mxu0  ;;  %v1332_v40 = vpop.f32.mrb[0].mxu1 }
  0xfd   : > { %v1294_v38 = vadd.f32 %v1293_v37, %v1292_v35  ;;  %v1295_v39 = vpop.f32.mrb[2].mxu0  ;;  %v1333_v58 = vpop.f32.mrb[1].mxu1 }
  0xfe   : > { %v1296_v41 = vpop.f32.mrb[3].mxu0  ;;  %v1334_v44 = vadd.f32 %v1333_v58, %v1332_v40  ;;  %v1335_v45 = vpop.f32.mrb[2].mxu1 }
  0xff   : > { %v927_v42 = vadd.f32 %v1294_v38, %v1672_v36  ;;  %v1297_v43 = vadd.f32 %v1296_v41, %v1295_v39  ;;  %v1336_v47 = vpop.f32.mrb[3].mxu1 }
 0x100   : > { %v1337_v49 = vadd.f32 %v1336_v47, %v1335_v45 }
 0x101   : > { %v930_v46 = vadd.f32 %v1297_v43, %v1672_v36  ;;  %v992_v48 = vadd.f32 %v1334_v44, %v927_v42 }
 0x103   : > { %v995_v50 = vadd.f32 %v1337_v49, %v930_v46  ;;  %v1298_v51 = vpop.f32.mrb[4].mxu0  ;;  %v1022_v52 = vmax.f32 %v992_v48, 0.0 }
 0x104   : > { %v1299_v54 = vpop.f32.mrb[5].mxu0  ;;  %v1338_v60 = vpop.f32.mrb[4].mxu1 }
 0x105   : > { %v1023_v53 = vmax.f32 %v995_v50, 0.0  ;;  %v1300_v55 = vadd.f32 %v1299_v54, %v1298_v51  ;;  %v1301_v56 = vpop.f32.mrb[6].mxu0  ;;  %v1339_v63 = vpop.f32.mrb[5].mxu1 }
 0x106   : > { %v1302_v59 = vpop.f32.mrb[7].mxu0  ;;  %v1340_v0 = vadd.f32 %v1339_v63, %v1338_v60  ;;  %v1341_v1 = vpop.f32.mrb[6].mxu1 }
 0x107   : > { %v1256_v57 = vpack.c.bf16 %v1023_v53, %v1022_v52  ;;  %v935_v61 = vadd.f32 %v1300_v55, %v1672_v36  ;;  %v1303_v62 = vadd.f32 %v1302_v59, %v1301_v56  ;;  %v1342_v3 = vpop.f32.mrb[7].mxu1 }
 0x108   : > { %v1343_v5 = vadd.f32 %v1342_v3, %v1341_v1 }
 0x109   : > { %1257 = vst [vmem:[%s1680_s20] sm:$0xff] %v1256_v57   ;;  %v938_v2 = vadd.f32 %v1303_v62, %v1672_v36  ;;  %v1000_v4 = vadd.f32 %v1340_v0, %v935_v61 }
 0x10b   : > { %v1003_v6 = vadd.f32 %v1343_v5, %v938_v2  ;;  %v1304_v7 = vpop.f32.mrb[8].mxu0  ;;  %v1024_v9 = vmax.f32 %v1000_v4, 0.0 }
 0x10c   : > { %v1305_v8 = vpop.f32.mrb[9].mxu0  ;;  %v1344_v16 = vpop.f32.mrb[8].mxu1 }
 0x10d   : > { %v1025_v10 = vmax.f32 %v1003_v6, 0.0  ;;  %v1306_v11 = vadd.f32 %v1305_v8, %v1304_v7  ;;  %v1307_v12 = vpop.f32.mrb[10].mxu0  ;;  %v1345_v18 = vpop.f32.mrb[9].mxu1 }
 0x10e   : > { %v1308_v13 = vpop.f32.mrb[11].mxu0  ;;  %v1346_v19 = vadd.f32 %v1345_v18, %v1344_v16  ;;  %v1347_v20 = vpop.f32.mrb[10].mxu1 }
 0x10f   : > { %v1261_v14 = vpack.c.bf16 %v1025_v10, %v1024_v9  ;;  %v1309_v15 = vadd.f32 %v1308_v13, %v1307_v12  ;;  %v943_v17 = vadd.f32 %v1306_v11, %v1672_v36  ;;  %v1348_v22 = vpop.f32.mrb[11].mxu1 }
 0x110   : > { %v1349_v24 = vadd.f32 %v1348_v22, %v1347_v20 }
 0x111   : > { %1273 = vst [vmem:[%s1680_s20 + $0x8] sm:$0xff] %v1261_v14   ;;  %v946_v21 = vadd.f32 %v1309_v15, %v1672_v36  ;;  %v1008_v23 = vadd.f32 %v1346_v19, %v943_v17 }
 0x113   : > { %v1310_v25 = vpop.f32.mrb[12].mxu0  ;;  %v1011_v26 = vadd.f32 %v1349_v24, %v946_v21  ;;  %v1026_v30 = vmax.f32 %v1008_v23, 0.0 }
 0x114   : > { %v1311_v27 = vpop.f32.mrb[13].mxu0 }
 0x115   : > { %v1312_v28 = vadd.f32 %v1311_v27, %v1310_v25  ;;  %v1313_v29 = vpop.f32.mrb[14].mxu0  ;;  %v1027_v31 = vmax.f32 %v1011_v26, 0.0  ;;  %v1350_v35 = vpop.f32.mrb[12].mxu1 }
 0x116   : > { %v1314_v32 = vpop.f32.mrb[15].mxu0  ;;  %v1351_v38 = vpop.f32.mrb[13].mxu1 }
 0x117   : > { %v1315_v33 = vadd.f32 %v1314_v32, %v1313_v29  ;;  %v1266_v34 = vpack.c.bf16 %v1027_v31, %v1026_v30  ;;  %v951_v37 = vadd.f32 %v1312_v28, %v1672_v36  ;;  %v1352_v39 = vadd.f32 %v1351_v38, %v1350_v35  ;;  %v1353_v40 = vpop.f32.mrb[14].mxu1 }
 0x118   : > { %v1354_v42 = vpop.f32.mrb[15].mxu1 }
 0x119   : > { %1274 = vst [vmem:[%s1680_s20 + $0x10] sm:$0xff] %v1266_v34   ;;  %v954_v41 = vadd.f32 %v1315_v33, %v1672_v36  ;;  %v1016_v58 = vadd.f32 %v1352_v39, %v951_v37  ;;  %v1355_v43 = vadd.f32 %v1354_v42, %v1353_v40 }
 0x11b   : > { %v1019_v44 = vadd.f32 %v1355_v43, %v954_v41  ;;  %v1028_v45 = vmax.f32 %v1016_v58, 0.0 }
 0x11d   : > { %v1029_v46 = vmax.f32 %v1019_v44, 0.0 }
 0x11f   : > { %v1271_v47 = vpack.c.bf16 %v1029_v46, %v1028_v45 }
 0x121   : > { %1275 = vst [vmem:[%s1680_s20 + $0x18] sm:$0xff] %v1271_v47  }
 0x122 PF: > { %s13_s14 = sadd.s32 1, %s1443_s14   ;;  %s1707_s12 = smov %s1439_s13 }
 0x123   : > { %p10_p5 = scmp.ge.s32.totalorder %s13_s14, 4   ;;  %s1708_s13 = smov %s1710_s15 }
 0x125   :  { %12 = sbr.rel (!%p10_p5) target bundleno = 2 (0x2), region = 69 }

// kernel: _lambda_.7
= control target key start
LH: loop header
LB: loop body
LE: loop exit
PB: predicated region body
PF: predicated region fallthrough
CT: control target
= control target key end

     0   :  { %s2902_s15 = smov 0   ;;  %s2904_s16 = smov 0   ;;  %s3405_s0 = inlined_call_operand.vmem [shape: bf16[2,10,10,128], index: 0, kind: input, shape index: {}]   ;;  %s3406_s1 = inlined_call_operand.vmem [shape: bf16[1152,128], index: 1, kind: input, shape index: {}]   ;;  %s3407_s2 = inlined_call_operand.vmem [shape: f32[1,128], index: 2, kind: input, shape index: {}]   ;;  %s3408_s3 = inlined_call_operand.vmem [shape: bf16[2,8,8,128], index: 3, kind: input, shape index: {}, may-alias: {3,4}]   ;;  %s3409_s4 = inlined_call_operand.vmem [shape: bf16[2,8,8,128], index: 4, kind: output, shape index: {}, may-alias: {3,4}]  }
   0x1   :  { %s2906_s17 = smov 0  }
   0x2 LB: > { %s33_s18 = sadd.s32 1, %s2871_s16  ;;  %p2267_p0 = scmp.ge.s32.totalorder %s2875_s17, 1  ;;  %s2875_s17 = sphi %s2906_s17, %s14_s17   ;;  %s2871_s16 = sphi %s2904_s16, %s3415_s16   ;;  %s2867_s15 = sphi %s2902_s15, %s3414_s15  }
   0x3   : > { %p35_p1 = scmp.ge.s32.totalorder %s33_s18, 2  ;;  %p224_p2 = scmp.lt.s32.totalorder %s2875_s17, 3 }
   0x5   : > { %s3417_s18 = smov (%p35_p1, %s33_s18), 0  ;;  %p225_p3 = pnand %p2267_p0, %p224_p2 }
   0x6   : > { %v2769_v0 = vld [vmem:[%s3406_s1 + $0x40] sm:$0xff] (!%p225_p3)   ;;  %v2773_v4 = vld [vmem:[%s3406_s1 + $0x48] sm:$0xff] (!%p225_p3)   ;;  %v2777_v8 = vld [vmem:[%s3406_s1 + $0x50] sm:$0xff] (!%p225_p3)   ;;  %p276_p4 = scmp.lt.s32.totalorder (!%p225_p3), %s2867_s15, 1  ;;  %vm534_vm0 = vcmask (!%p225_p3), 1042432   ;;  %vm535_vm1 = vcmask (!%p225_p3), 1046532  }
   0x7   : > { %228 = sbr.rel (%p225_p3) target bundleno = 338 (0x152), region = 36  ;;  %v2770_v1 = vld [vmem:[%s3406_s1 + $0xc0] sm:$0xff] (!%p225_p3)   ;;  %2532 = vmatprep.subr.bf16.mxu0 (!%p225_p3), %v2769_v0  ;;  %v2774_v5 = vld [vmem:[%s3406_s1 + $0xc8] sm:$0xff] (!%p225_p3)   ;;  %v2778_v9 = vld [vmem:[%s3406_s1 + $0xd0] sm:$0xff] (!%p225_p3)   ;;  %vm367_vm2 = vsmask.f32 (!%p225_p3), 3328 }
   0x8   : > { %v2771_v2 = vld [vmem:[%s3406_s1] sm:$0xff] (!%p225_p3)   ;;  %2572 = vmatprep.subr.bf16.mxu1 (!%p225_p3), %v2770_v1  ;;  %v2775_v6 = vld [vmem:[%s3406_s1 + $0x8] sm:$0xff] (!%p225_p3)   ;;  %v2779_v10 = vld [vmem:[%s3406_s1 + $0x10] sm:$0xff] (!%p225_p3)   ;;  %vm368_vm3 = vsmask.f32 (!%p225_p3), 7440 }
   0x9   : > { %v2772_v3 = vld [vmem:[%s3406_s1 + $0x80] sm:$0xff] (!%p225_p3)   ;;  %2533 = vmatpush3.bf16.msra.mxu0 (!%p225_p3), %v2771_v2  ;;  %v2776_v7 = vld [vmem:[%s3406_s1 + $0x88] sm:$0xff] (!%p225_p3)   ;;  %v2780_v11 = vld [vmem:[%s3406_s1 + $0x90] sm:$0xff] (!%p225_p3)  }
   0xa   : > { %2573 = vmatpush3.bf16.msra.mxu1 (!%p225_p3), %v2772_v3  ;;  %2534 = vmatprep.subr.bf16.mxu0 (!%p225_p3), %v2773_v4  ;;  %v2781_v12 = vld [vmem:[%s3406_s1 + $0x58] sm:$0xff] (!%p225_p3)   ;;  %v2785_v16 = vld [vmem:[%s3406_s1 + $0x60] sm:$0xff] (!%p225_p3)   ;;  %v2789_v20 = vld [vmem:[%s3406_s1 + $0x68] sm:$0xff] (!%p225_p3)  }
   0xb   : > { %2574 = vmatprep.subr.bf16.mxu1 (!%p225_p3), %v2774_v5  ;;  %v2782_v13 = vld [vmem:[%s3406_s1 + $0xd8] sm:$0xff] (!%p225_p3)   ;;  %v2786_v17 = vld [vmem:[%s3406_s1 + $0xe0] sm:$0xff] (!%p225_p3)   ;;  %v2790_v21 = vld [vmem:[%s3406_s1 + $0xe8] sm:$0xff] (!%p225_p3)  }
   0xc   : > { %v2783_v14 = vld [vmem:[%s3406_s1 + $0x18] sm:$0xff] (!%p225_p3)   ;;  %v2787_v18 = vld [vmem:[%s3406_s1 + $0x20] sm:$0xff] (!%p225_p3)   ;;  %v2791_v22 = vld [vmem:[%s3406_s1 + $0x28] sm:$0xff] (!%p225_p3)  }
   0xd   : > { %2535 = vmatpush3.bf16.msra.mxu0 (!%p225_p3), %v2775_v6  ;;  %v2784_v15 = vld [vmem:[%s3406_s1 + $0x98] sm:$0xff] (!%p225_p3)   ;;  %v2788_v19 = vld [vmem:[%s3406_s1 + $0xa0] sm:$0xff] (!%p225_p3)   ;;  %v2792_v23 = vld [vmem:[%s3406_s1 + $0xa8] sm:$0xff] (!%p225_p3)  }
   0xe   : > { %2575 = vmatpush3.bf16.msra.mxu1 %v2776_v7  ;;  %2536 = vmatprep.subr.bf16.mxu0 %v2777_v8  ;;  %s3419_s15 = smov (!%p276_p4, %s2867_s15), 1  ;;  %v2793_v24 = vld [vmem:[%s3406_s1 + $0x70] sm:$0xff]   ;;  %v2797_v28 = vld [vmem:[%s3406_s1 + $0x78] sm:$0xff]   ;;  %vm3035_vm4 = vmor %vm534_vm0, %vm535_vm1 }
   0xf   : > { %2576 = vmatprep.subr.bf16.mxu1 %v2778_v9  ;;  %v2794_v25 = vld [vmem:[%s3406_s1 + $0xf0] sm:$0xff]   ;;  %s2744_s27 = smul.u32 80, %s3419_s15  ;;  %v2798_v29 = vld [vmem:[%s3406_s1 + $0xf8] sm:$0xff]   ;;  %vm3044_vm5 = vmor %vm367_vm2, %vm368_vm3  ;;  %s2488_s14 = sshll.u32 %s3419_s15, 5 }
  0x10   : > { %v2795_v26 = vld [vmem:[%s3406_s1 + $0x30] sm:$0xff]   ;;  %v2799_v30 = vld [vmem:[%s3406_s1 + $0x38] sm:$0xff]   ;;  %v2803_v60 = vld [vmem:[%s3406_s1 + $0x140] sm:$0xff]   ;;  %s299_s21 = scalar_lea.vmem %s3408_s3, %s2488_s14  ;;  %s312_s24 = scalar_lea.vmem %s3409_s4, %s2488_s14 }
  0x11   : > { %2537 = vmatpush3.bf16.msra.mxu0 %v2779_v10  ;;  %v2796_v27 = vld [vmem:[%s3406_s1 + $0xb0] sm:$0xff]   ;;  %s3020_s12 = scalar_lea.vmem %s3405_s0, %s2744_s27  ;;  %v2800_v31 = vld [vmem:[%s3406_s1 + $0xb8] sm:$0xff]   ;;  %v2804_v2 = vld [vmem:[%s3406_s1 + $0x1c0] sm:$0xff]  }
  0x12   : > { %2577 = vmatpush3.bf16.msra.mxu1 %v2780_v11  ;;  %2538 = vmatprep.subr.bf16.mxu0 %v2781_v12  ;;  %v351_v32 = vld [vmem:[%s3020_s12] sm:$0xf]  ;;  %v352_v33 = vld [vmem:[%s3020_s12 + $0x4] sm:$0x1]  ;;  %v353_v34 = vld [vmem:[%s3020_s12 + $0x8] sm:$0xf] }
  0x13   : > { %2578 = vmatprep.subr.bf16.mxu1 %v2782_v13  ;;  %v354_v35 = vld [vmem:[%s3020_s12 + $0xc] sm:$0x1]  ;;  %v371_v36 = vshrl.u32 %v351_v32, 16  ;;  %v374_v37 = vshll.u32 %v351_v32, 16  ;;  %v380_v38 = vshll.u32 %v352_v33, 16  ;;  %v385_v39 = vshrl.u32 %v353_v34, 16 }
  0x14   : > { %v388_v40 = vshll.u32 %v353_v34, 16  ;;  %v394_v41 = vshll.u32 %v354_v35, 16  ;;  %v2801_v42 = vld [vmem:[%s3020_s12 + $0x8] ss:$8 sps:$4 sm:$0xff]   ;;  %v502_v51 = vld [vmem:[%s3020_s12] sm:$0xe] }
  0x15   : > { %2539 = vmatpush3.bf16.msra.mxu0 %v2783_v14  ;;  %v373_v43 = vrot.slane %v371_v36, 4  ;;  %v376_v44 = vrot.slane %v374_v37, 5  ;;  %v387_v45 = vrot.slane %v385_v39, 4  ;;  %v382_v46 = vrot.slane %v380_v38, 5  ;;  %1843 = vmatprep.mubr.bf16.mxu1 %v2801_v42  ;;  %v503_v52 = vld [vmem:[%s3020_s12 + $0x4] sm:$0x1] }
  0x16   : > { %2579 = vmatpush3.bf16.msra.mxu1 %v2784_v15  ;;  %2540 = vmatprep.subr.bf16.mxu0 %v2785_v16  ;;  %v390_v47 = vrot.slane %v388_v40, 5  ;;  %v396_v48 = vrot.slane %v394_v41, 5  ;;  %v504_v53 = vld [vmem:[%s3020_s12 + $0x8] sm:$0xe]  ;;  %v505_v56 = vld [vmem:[%s3020_s12 + $0xc] sm:$0x1] }
  0x17   : > { %2580 = vmatprep.subr.bf16.mxu1 %v2786_v17  ;;  %v377_v50 = vor.u32 %v376_v44, %v373_v43  ;;  %v2281_v57 = vrot.slane %v502_v51, 9  ;;  %v539_v58 = vrot.slane %v503_v52, 5  ;;  %v2282_v59 = vrot.slane %v504_v53, 9  ;;  %v2802_v0 = vld [vmem:[%s3020_s12] ss:$8 sps:$4 sm:$0xff]   ;;  %v2813_v42 = vld [vmem:[%s3406_s1 + $0x150] sm:$0xff]  }
  0x18   : > { %v391_v55 = vor.u32 %v390_v47, %v387_v45  ;;  %v543_v62 = vrot.slane %v505_v56, 5  ;;  %v2805_v5 = vld [vmem:[%s3406_s1 + $0x100] sm:$0xff]   ;;  %v2807_v10 = vld [vmem:[%s3406_s1 + $0x148] sm:$0xff]   ;;  %v355_v14 = vld [vmem:[%s3020_s12 + $0x10] sm:$0xf] }
  0x19   : > { %2541 = vmatpush3.bf16.msra.mxu0 %v2787_v18  ;;  %v378_v61 = vrot.slane %v377_v50, 4  ;;  %v540_v1 = vsel %vm3035_vm4, %v2281_v57, %v539_v58  ;;  %v2806_v8 = vld [vmem:[%s3406_s1 + $0x180] sm:$0xff]   ;;  %v2808_v11 = vld [vmem:[%s3406_s1 + $0x1c8] sm:$0xff]   ;;  %v356_v15 = vld [vmem:[%s3020_s12 + $0x14] sm:$0x1]  ;;  %v399_v18 = vshrl.u32 %v355_v14, 16 }
  0x1a   : > { %2581 = vmatpush3.bf16.msra.mxu1 %v2788_v19  ;;  %2542 = vmatprep.subr.bf16.mxu0 %v2789_v20  ;;  %v392_v63 = vrot.slane %v391_v55, 4  ;;  %v544_v4 = vsel %vm3035_vm4, %v2282_v59, %v543_v62  ;;  %v2809_v12 = vld [vmem:[%s3406_s1 + $0x108] sm:$0xff]   ;;  %v357_v16 = vld [vmem:[%s3020_s12 + $0x18] sm:$0xf]  ;;  %v358_v17 = vld [vmem:[%s3020_s12 + $0x1c] sm:$0x1] }
  0x1b   : > { %2582 = vmatprep.subr.bf16.mxu1 %v2790_v21  ;;  %v383_v3 = vsel %vm3044_vm5, %v378_v61, %v382_v46  ;;  %v2289_v7 = vcombine.low %v540_v1, %v544_v4  ;;  %v2810_v13 = vld [vmem:[%s3406_s1 + $0x188] sm:$0xff]   ;;  %v402_v19 = vshll.u32 %v355_v14, 16  ;;  %v408_v20 = vshll.u32 %v356_v15, 16  ;;  %v506_v32 = vld [vmem:[%s3020_s12 + $0x10] sm:$0xe]  ;;  %v2817_v56 = vld [vmem:[%s3406_s1 + $0x158] sm:$0xff]  }
  0x1c   : > { %v397_v6 = vsel %vm3044_vm5, %v392_v63, %v396_v48  ;;  %v413_v21 = vshrl.u32 %v357_v16, 16  ;;  %v507_v33 = vld [vmem:[%s3020_s12 + $0x14] sm:$0x1]  ;;  %v508_v35 = vld [vmem:[%s3020_s12 + $0x18] sm:$0xe]  ;;  %v2283_v37 = vrot.slane %v506_v32, 9 }
  0x1d   : > { %2543 = vmatpush3.bf16.msra.mxu0 %v2791_v22  ;;  %v2277_v9 = vcombine.low %v383_v3, %v397_v6  ;;  %v416_v22 = vshll.u32 %v357_v16, 16  ;;  %v509_v36 = vld [vmem:[%s3020_s12 + $0x1c] sm:$0x1]  ;;  %v547_v38 = vrot.slane %v507_v33, 5  ;;  %v2284_v40 = vrot.slane %v508_v35, 9  ;;  %v2814_v46 = vld [vmem:[%s3406_s1 + $0x1d0] sm:$0xff]  }
  0x1e   : > { %2583 = vmatpush3.bf16.msra.mxu1 %v2792_v23  ;;  %2544 = vmatprep.subr.bf16.mxu0 %v2793_v24  ;;  %v422_v23 = vshll.u32 %v358_v17, 16  ;;  %v401_v24 = vrot.slane %v399_v18, 4  ;;  %v551_v41 = vrot.slane %v509_v36, 5  ;;  %v2812_v44 = vld [vmem:[%s3020_s12 + $0x10] ss:$8 sps:$4 sm:$0xff]   ;;  %v2825_v32 = vld [vmem:[%s3406_s1 + $0x120] sm:$0xff]  }
  0x1f   : > { %2584 = vmatprep.subr.bf16.mxu1 %v2794_v25  ;;  %1778 = vmatprep.mubr.bf16.mxu0 %v2277_v9  ;;  %v404_v25 = vrot.slane %v402_v19, 5  ;;  %v548_v45 = vsel %vm3035_vm4, %v2283_v37, %v547_v38  ;;  %v2815_v52 = vld [vmem:[%s3406_s1 + $0x110] sm:$0xff]   ;;  %v2818_v57 = vld [vmem:[%s3406_s1 + $0x1d8] sm:$0xff]   ;;  %v360_v61 = vld [vmem:[%s3020_s12 + $0x24] sm:$0x1] }
  0x20   : > { %v552_v48 = vsel %vm3035_vm4, %v2284_v40, %v551_v41  ;;  %v2816_v55 = vld [vmem:[%s3406_s1 + $0x190] sm:$0xff]   ;;  %v2819_v58 = vld [vmem:[%s3406_s1 + $0x118] sm:$0xff]   ;;  %v361_v62 = vld [vmem:[%s3020_s12 + $0x28] sm:$0xf] }
  0x21   : > { %2545 = vmatpush3.bf16.msra.mxu0 %v2795_v26  ;;  %v415_v26 = vrot.slane %v413_v21, 4  ;;  %v2290_v51 = vcombine.low %v548_v45, %v552_v48  ;;  %v2820_v59 = vld [vmem:[%s3406_s1 + $0x198] sm:$0xff]   ;;  %v362_v63 = vld [vmem:[%s3020_s12 + $0x2c] sm:$0x1]  ;;  %v441_v3 = vshrl.u32 %v361_v62, 16  ;;  %v444_v4 = vshll.u32 %v361_v62, 16 }
  0x22   : > { %2585 = vmatpush3.bf16.msra.mxu1 %v2796_v27  ;;  %2546 = vmatprep.subr.bf16.mxu0 %v2797_v28  ;;  %v2811_v27 = vld [vmem:[%s3020_s12 + $0x18] ss:$8 sps:$4 sm:$0xff]   ;;  %v418_v28 = vrot.slane %v416_v22, 5  ;;  %v511_v16 = vld [vmem:[%s3020_s12 + $0x24] sm:$0x1]  ;;  %v2827_v36 = vld [vmem:[%s3406_s1 + $0x168] sm:$0xff]  }
  0x23   : > { %2586 = vmatprep.subr.bf16.mxu1 %v2798_v29  ;;  %v405_v29 = vor.u32 %v404_v25, %v401_v24  ;;  %v443_v9 = vrot.slane %v441_v3, 4  ;;  %v510_v14 = vld [vmem:[%s3020_s12 + $0x20] sm:$0xe]  ;;  %v512_v17 = vld [vmem:[%s3020_s12 + $0x28] sm:$0xe]  ;;  %v555_v21 = vrot.slane %v511_v16, 5 }
  0x24   : > { %v419_v34 = vor.u32 %v418_v28, %v415_v26  ;;  %v513_v18 = vld [vmem:[%s3020_s12 + $0x2c] sm:$0x1]  ;;  %v2286_v22 = vrot.slane %v512_v17, 9  ;;  %v2822_v24 = vld [vmem:[%s3020_s12 + $0x20] ss:$8 sps:$4 sm:$0xff]   ;;  %v2836_v16 = vld [vmem:[%s3406_s1 + $0x1b0] sm:$0xff]  }
  0x25   : > { %2547 = vmatpush3.bf16.msra.mxu0 %v2799_v30  ;;  %v410_v30 = vrot.slane %v408_v20, 5  ;;  %v406_v39 = vrot.slane %v405_v29, 4  ;;  %v2285_v20 = vrot.slane %v510_v14, 9  ;;  %v559_v25 = vrot.slane %v513_v18, 5  ;;  %v2823_v26 = vld [vmem:[%s3406_s1 + $0x160] sm:$0xff]   ;;  %v2828_v37 = vld [vmem:[%s3406_s1 + $0x1e8] sm:$0xff]  }
  0x26   : > { %2587 = vmatpush3.bf16.msra.mxu1 %v2800_v31  ;;  %2612 = vmatprep.subr.bf16.mxu0 %v2803_v60  ;;  %v424_v31 = vrot.slane %v422_v23, 5  ;;  %v420_v43 = vrot.slane %v419_v34, 4  ;;  %v359_v60 = vld [vmem:[%s3020_s12 + $0x20] sm:$0xf]  ;;  %v2829_v38 = vld [vmem:[%s3406_s1 + $0x128] sm:$0xff]   ;;  %v2837_v18 = vld [vmem:[%s3406_s1 + $0x178] sm:$0xff]  }
  0x27   : > { %2652 = vmatprep.subr.bf16.mxu1 %v2804_v2  ;;  %v411_v47 = vsel %vm3044_vm5, %v406_v39, %v410_v30  ;;  %v430_v1 = vshll.u32 %v359_v60, 16  ;;  %v436_v2 = vshll.u32 %v360_v61, 16  ;;  %v556_v29 = vsel %vm3035_vm4, %v2285_v20, %v555_v21  ;;  %v2826_v35 = vld [vmem:[%s3406_s1 + $0x1a0] sm:$0xff]   ;;  %v2830_v39 = vld [vmem:[%s3406_s1 + $0x1a8] sm:$0xff]   ;;  %v363_v40 = vld [vmem:[%s3020_s12 + $0x30] sm:$0xf] }
  0x28   : > { %1779 = vmatmul.mubr.bf16.vlgmr.msra.gmra.mrb[0].mxu0 %v2802_v0  ;;  %v425_v50 = vsel %vm3044_vm5, %v420_v43, %v424_v31  ;;  %v427_v0 = vshrl.u32 %v359_v60, 16  ;;  %v560_v31 = vsel %vm3035_vm4, %v2286_v22, %v559_v25  ;;  %v364_v41 = vld [vmem:[%s3020_s12 + $0x34] sm:$0x1]  ;;  %v366_v43 = vld [vmem:[%s3020_s12 + $0x3c] sm:$0x1]  ;;  %v458_v45 = vshll.u32 %v363_v40, 16 }
  0x29   : > { %1844 = vmatmul.mubr.bf16.vlgmr.msra.gmra.mrb[0].mxu1 %v2289_v7  ;;  %2613 = vmatpush3.bf16.msra.mxu0 %v2805_v5  ;;  %v2278_v53 = vcombine.low %v411_v47, %v425_v50  ;;  %v450_v5 = vshll.u32 %v362_v63, 16  ;;  %v432_v7 = vrot.slane %v430_v1, 5  ;;  %v2291_v34 = vcombine.low %v556_v29, %v560_v31  ;;  %v514_v60 = vld [vmem:[%s3020_s12 + $0x30] sm:$0xe]  ;;  %v515_v61 = vld [vmem:[%s3020_s12 + $0x34] sm:$0x1] }
  0x2a   : > { %2653 = vmatpush3.bf16.msra.mxu1 %v2806_v8  ;;  %2614 = vmatprep.subr.bf16.mxu0 %v2807_v10  ;;  %v429_v6 = vrot.slane %v427_v0, 4  ;;  %v2821_v8 = vld [vmem:[%s3020_s12 + $0x28] ss:$8 sps:$4 sm:$0xff]   ;;  %v446_v10 = vrot.slane %v444_v4, 5  ;;  %v478_v50 = vshll.u32 %v366_v43, 16  ;;  %v2287_v1 = vrot.slane %v514_v60, 9 }
  0x2b   : > { %2654 = vmatprep.subr.bf16.mxu1 %v2808_v11  ;;  %1851 = vmatprep.mubr.bf16.mxu1 %v2811_v27  ;;  %v2824_v27 = vld [vmem:[%s3406_s1 + $0x1e0] sm:$0xff]   ;;  %v516_v62 = vld [vmem:[%s3020_s12 + $0x38] sm:$0xe]  ;;  %v517_v0 = vld [vmem:[%s3020_s12 + $0x3c] sm:$0x1] }
  0x2c   : > { %1786 = vmatprep.mubr.bf16.mxu0 %v2278_v53  ;;  %v433_v11 = vor.u32 %v432_v7, %v429_v6  ;;  %v447_v15 = vor.u32 %v446_v10, %v443_v9  ;;  %v460_v53 = vrot.slane %v458_v45, 5  ;;  %v2288_v3 = vrot.slane %v516_v62, 9  ;;  %v2833_v4 = vld [vmem:[%s3406_s1 + $0x170] sm:$0xff]   ;;  %v2839_v20 = vld [vmem:[%s3406_s1 + $0x138] sm:$0xff]   ;;  %v2325_v22 = vld [vmem:[%s3020_s12 + $0x8] sm:$0xe] }
  0x2d   : > { %2615 = vmatpush3.bf16.msra.mxu0 %v2809_v12  ;;  %v438_v12 = vrot.slane %v436_v2, 5  ;;  %v563_v2 = vrot.slane %v515_v61, 5  ;;  %v567_v6 = vrot.slane %v517_v0, 5  ;;  %v2834_v10 = vld [vmem:[%s3406_s1 + $0x1f0] sm:$0xff]   ;;  %v2840_v21 = vld [vmem:[%s3406_s1 + $0x1b8] sm:$0xff]   ;;  %v3215_v29 = vld [vmem:[%s3406_s1 + $0x200] sm:$0xff]  }
  0x2e   : > { %2655 = vmatpush3.bf16.msra.mxu1 %v2810_v13  ;;  %2616 = vmatprep.subr.bf16.mxu0 %v2813_v42  ;;  %v452_v13 = vrot.slane %v450_v5, 5  ;;  %v434_v19 = vrot.slane %v433_v11, 4  ;;  %v448_v23 = vrot.slane %v447_v15, 4  ;;  %v365_v42 = vld [vmem:[%s3020_s12 + $0x38] sm:$0xf] }
  0x2f   : > { %2656 = vmatprep.subr.bf16.mxu1 %v2814_v46  ;;  %v464_v46 = vshll.u32 %v364_v41, 16  ;;  %v469_v47 = vshrl.u32 %v365_v42, 16  ;;  %v472_v48 = vshll.u32 %v365_v42, 16  ;;  %v564_v9 = vsel %vm3035_vm4, %v2287_v1, %v563_v2  ;;  %v2328_v25 = vld [vmem:[%s3020_s12 + $0x14] sm:$0x1] }
  0x30   : > { %1787 = vmatmul.mubr.bf16.gmra.mrb[4].mxu0 %v2812_v44  ;;  %v439_v28 = vsel %vm3044_vm5, %v434_v19, %v438_v12  ;;  %v453_v30 = vsel %vm3044_vm5, %v448_v23, %v452_v13  ;;  %v455_v44 = vshrl.u32 %v363_v40, 16  ;;  %v568_v12 = vsel %vm3035_vm4, %v2288_v3, %v567_v6  ;;  %v2835_v13 = vld [vmem:[%s3406_s1 + $0x130] sm:$0xff]   ;;  %v2838_v19 = vld [vmem:[%s3406_s1 + $0x1f8] sm:$0xff]   ;;  %v2326_v23 = vld [vmem:[%s3020_s12 + $0xc] sm:$0x1] }
  0x31   : > { %1852 = vmatmul.mubr.bf16.gmra.mrb[4].mxu1 %v2290_v51  ;;  %2617 = vmatpush3.bf16.msra.mxu0 %v2815_v52  ;;  %v2279_v33 = vcombine.low %v439_v28, %v453_v30  ;;  %v2831_v51 = vld [vmem:[%s3020_s12 + $0x38] ss:$8 sps:$4 sm:$0xff]   ;;  %v2292_v15 = vcombine.low %v564_v9, %v568_v12  ;;  %v812_v30 = vrot.slane %v2328_v25, 5  ;;  %v2365_v31 = vld [vmem:[%s3020_s12 + $0x10] sm:$0xf] }
  0x32   : > { %2657 = vmatpush3.bf16.msra.mxu1 %v2816_v55  ;;  %2618 = vmatprep.subr.bf16.mxu0 %v2817_v56  ;;  %v457_v52 = vrot.slane %v455_v44, 4  ;;  %v471_v55 = vrot.slane %v469_v47, 4  ;;  %v466_v56 = vrot.slane %v464_v46, 5  ;;  %v2305_v42 = vld [vmem:[%s3020_s12 + $0x8] sm:$0xf] }
  0x33   : > { %2658 = vmatprep.subr.bf16.mxu1 %v2818_v57  ;;  %1859 = vmatprep.mubr.bf16.mxu1 %v2821_v8  ;;  %v474_v57 = vrot.slane %v472_v48, 5  ;;  %v2832_v8 = vld [vmem:[%s3020_s12 + $0x30] ss:$8 sps:$4 sm:$0xff]   ;;  %v2306_v47 = vld [vmem:[%s3020_s12 + $0xc] sm:$0x1] }
  0x34   : > { %1794 = vmatprep.mubr.bf16.mxu0 %v2279_v33  ;;  %v2841_v6 = vld [vmem:[%s3020_s12 + $0x10] ss:$8 sps:$4 sm:$0xff]   ;;  %v2389_v54 = vld [vmem:[%s3020_s12 + $0x20] sm:$0xe] }
  0x35   : > { %2619 = vmatpush3.bf16.msra.mxu0 %v2819_v58  ;;  %v480_v58 = vrot.slane %v478_v50, 5  ;;  %v475_v63 = vor.u32 %v474_v57, %v471_v55  ;;  %v2308_v57 = vld [vmem:[%s3020_s12 + $0x14] sm:$0x1] }
  0x36   : > { %2659 = vmatpush3.bf16.msra.mxu1 %v2820_v59  ;;  %2620 = vmatprep.subr.bf16.mxu0 %v2823_v26  ;;  %v461_v59 = vor.u32 %v460_v53, %v457_v52  ;;  %v2341_v26 = vrot.slane %v2325_v22, 9  ;;  %v2307_v52 = vld [vmem:[%s3020_s12 + $0x10] sm:$0xf]  ;;  %v643_v53 = vshrl.u32 %v2305_v42, 16  ;;  %v666_v2 = vshll.u32 %v2308_v57, 16 }
  0x37   : > { %2660 = vmatprep.subr.bf16.mxu1 %v2824_v27  ;;  %v476_v7 = vrot.slane %v475_v63, 4  ;;  %v808_v27 = vrot.slane %v2326_v23, 5  ;;  %v657_v62 = vshrl.u32 %v2307_v52, 16  ;;  %v660_v63 = vshll.u32 %v2307_v52, 16 }
  0x38   : > { %1795 = vmatmul.mubr.bf16.gmra.mrb[8].mxu0 %v2822_v24  ;;  %v462_v5 = vrot.slane %v461_v59, 4  ;;  %v2327_v24 = vld [vmem:[%s3020_s12 + $0x10] sm:$0xe]  ;;  %v652_v59 = vshll.u32 %v2306_v47, 16  ;;  %v645_v61 = vrot.slane %v643_v53, 4 }
  0x39   : > { %2621 = vmatpush3.bf16.msra.mxu0 %v2825_v32  ;;  %1860 = vmatmul.mubr.bf16.gmra.mrb[8].mxu1 %v2291_v34  ;;  %v481_v14 = vsel %vm3044_vm5, %v476_v7, %v480_v58  ;;  %v2342_v28 = vrot.slane %v2327_v24, 9  ;;  %v2366_v32 = vld [vmem:[%s3020_s12 + $0x14] sm:$0x1]  ;;  %v809_v33 = vsel %vm3035_vm4, %v2341_v26, %v808_v27  ;;  %v2367_v34 = vld [vmem:[%s3020_s12 + $0x18] sm:$0xf]  ;;  %v646_v58 = vshll.u32 %v2305_v42, 16 }
  0x3a   : > { %2661 = vmatpush3.bf16.msra.mxu1 %v2826_v35  ;;  %2622 = vmatprep.subr.bf16.mxu0 %v2827_v36  ;;  %v467_v11 = vsel %vm3044_vm5, %v462_v5, %v466_v56  ;;  %v2368_v35 = vld [vmem:[%s3020_s12 + $0x1c] sm:$0x1]  ;;  %v912_v36 = vshrl.u32 %v2365_v31, 16  ;;  %v926_v40 = vshrl.u32 %v2367_v34, 16  ;;  %v929_v41 = vshll.u32 %v2367_v34, 16 }
  0x3b   : > { %2662 = vmatprep.subr.bf16.mxu1 %v2828_v37  ;;  %1867 = vmatprep.mubr.bf16.mxu1 %v2831_v51  ;;  %v2280_v17 = vcombine.low %v467_v11, %v481_v14  ;;  %v915_v37 = vshll.u32 %v2365_v31, 16  ;;  %v935_v46 = vshll.u32 %v2368_v35, 16  ;;  %v648_v1 = vrot.slane %v646_v58, 5  ;;  %v2369_v26 = vld [vmem:[%s3020_s12 + $0x20] sm:$0xf] }
  0x3c   : > { %v914_v44 = vrot.slane %v912_v36, 4  ;;  %v928_v50 = vrot.slane %v926_v40, 4  ;;  %v931_v51 = vrot.slane %v929_v41, 5  ;;  %v662_v5 = vrot.slane %v660_v63, 5  ;;  %v2370_v27 = vld [vmem:[%s3020_s12 + $0x24] sm:$0x1] }
  0x3d   : > { %2623 = vmatpush3.bf16.msra.mxu0 %v2829_v38  ;;  %1802 = vmatprep.mubr.bf16.mxu0 %v2280_v17  ;;  %v813_v38 = vsel %vm3035_vm4, %v2342_v28, %v812_v30  ;;  %v917_v45 = vrot.slane %v915_v37, 5  ;;  %v937_v56 = vrot.slane %v935_v46, 5  ;;  %v654_v9 = vrot.slane %v652_v59, 5  ;;  %v2331_v17 = vld [vmem:[%s3020_s12 + $0x20] sm:$0xe]  ;;  %v2845_v46 = vld [vmem:[%s3406_s1 + $0x210] sm:$0xff]  }
  0x3e   : > { %2663 = vmatpush3.bf16.msra.mxu1 %v2830_v39  ;;  %2624 = vmatprep.subr.bf16.mxu0 %v2833_v4  ;;  %v921_v39 = vshll.u32 %v2366_v32, 16  ;;  %v2349_v43 = vcombine.low %v809_v33, %v813_v38  ;;  %v932_v60 = vor.u32 %v931_v51, %v928_v50  ;;  %v659_v4 = vrot.slane %v657_v62, 4  ;;  %v2371_v31 = vld [vmem:[%s3020_s12 + $0x28] sm:$0xf]  ;;  %v2372_v32 = vld [vmem:[%s3020_s12 + $0x2c] sm:$0x1] }
  0x3f   : > { %2664 = vmatprep.subr.bf16.mxu1 %v2834_v10  ;;  %v918_v55 = vor.u32 %v917_v45, %v914_v44  ;;  %v668_v10 = vrot.slane %v666_v2, 5  ;;  %v2344_v23 = vrot.slane %v2331_v17, 9  ;;  %v940_v33 = vshrl.u32 %v2369_v26, 16  ;;  %v2310_v40 = vld [vmem:[%s3020_s12 + $0x1c] sm:$0x1] }
  0x40   : > { %1803 = vmatmul.mubr.bf16.gmra.mrb[12].mxu0 %v2832_v8  ;;  %v923_v48 = vrot.slane %v921_v39, 5  ;;  %v933_v3 = vrot.slane %v932_v60, 4  ;;  %v649_v8 = vor.u32 %v648_v1, %v645_v61  ;;  %v663_v12 = vor.u32 %v662_v5, %v659_v4  ;;  %v2309_v39 = vld [vmem:[%s3020_s12 + $0x18] sm:$0xf]  ;;  %v2311_v45 = vld [vmem:[%s3020_s12 + $0x20] sm:$0xf] }
  0x41   : > { %2625 = vmatpush3.bf16.msra.mxu0 %v2835_v13  ;;  %1868 = vmatmul.mubr.bf16.gmra.mrb[12].mxu1 %v2292_v15  ;;  %v919_v0 = vrot.slane %v918_v55, 4  ;;  %v2329_v13 = vld [vmem:[%s3020_s12 + $0x18] sm:$0xe]  ;;  %v943_v34 = vshll.u32 %v2369_v26, 16  ;;  %v949_v37 = vshll.u32 %v2370_v27, 16  ;;  %v954_v38 = vshrl.u32 %v2371_v31, 16 }
  0x42   : > { %2665 = vmatpush3.bf16.msra.mxu1 %v2836_v16  ;;  %2626 = vmatprep.subr.bf16.mxu0 %v2837_v18  ;;  %v938_v11 = vsel %vm3044_vm5, %v933_v3, %v937_v56  ;;  %v650_v15 = vrot.slane %v649_v8, 4  ;;  %v2330_v16 = vld [vmem:[%s3020_s12 + $0x1c] sm:$0x1]  ;;  %v2343_v18 = vrot.slane %v2329_v13, 9  ;;  %v942_v42 = vrot.slane %v940_v33, 4  ;;  %v2848_v26 = vld [vmem:[%s3406_s1 + $0x220] sm:$0xff]  }
  0x43   : > { %2666 = vmatprep.subr.bf16.mxu1 %v2838_v19  ;;  %1908 = vmatprep.mubr.bf16.mxu0 %v2349_v43  ;;  %v924_v7 = vsel %vm3044_vm5, %v919_v0, %v923_v48  ;;  %v664_v19 = vrot.slane %v663_v12, 4  ;;  %v816_v22 = vrot.slane %v2330_v16, 5  ;;  %v945_v43 = vrot.slane %v943_v34, 5  ;;  %v2312_v51 = vld [vmem:[%s3020_s12 + $0x24] sm:$0x1] }
  0x44   : > { %v2381_v14 = vcombine.low %v924_v7, %v938_v11  ;;  %v655_v24 = vsel %vm3044_vm5, %v650_v15, %v654_v9  ;;  %v957_v44 = vshll.u32 %v2371_v31, 16  ;;  %v951_v47 = vrot.slane %v949_v37, 5  ;;  %v2844_v8 = vld [vmem:[%s3020_s12 + $0x20] ss:$8 sps:$4 sm:$0xff]   ;;  %v2335_v15 = vld [vmem:[%s3020_s12 + $0x30] sm:$0xe] }
  0x45   : > { %2627 = vmatpush3.bf16.msra.mxu0 %v2839_v20  ;;  %v2843_v20 = vld [vmem:[%s3406_s1 + $0x208] sm:$0xff]   ;;  %v669_v28 = vsel %vm3044_vm5, %v664_v19, %v668_v10  ;;  %v817_v30 = vsel %vm3035_vm4, %v2343_v18, %v816_v22  ;;  %v956_v48 = vrot.slane %v954_v38, 4  ;;  %v963_v50 = vshll.u32 %v2372_v32, 16  ;;  %v2336_v19 = vld [vmem:[%s3020_s12 + $0x34] sm:$0x1] }
  0x46   : > { %2667 = vmatpush3.bf16.msra.mxu1 %v2840_v21  ;;  %2704 = vmatprep.subr.bf16.mxu0 %v3215_v29  ;;  %v2332_v21 = vld [vmem:[%s3020_s12 + $0x24] sm:$0x1]  ;;  %v2321_v35 = vcombine.low %v655_v24, %v669_v28  ;;  %v671_v52 = vshrl.u32 %v2309_v39, 16  ;;  %v946_v53 = vor.u32 %v945_v43, %v942_v42  ;;  %v959_v55 = vrot.slane %v957_v44, 5  ;;  %v2333_v11 = vld [vmem:[%s3020_s12 + $0x28] sm:$0xe] }
  0x47   : > { %2728 = vmatprep.subr.bf16.mxu1 %v3215_v29  ;;  %1973 = vmatprep.mubr.bf16.mxu1 %v2381_v14  ;;  %v820_v25 = vrot.slane %v2332_v21, 5  ;;  %v674_v56 = vshll.u32 %v2309_v39, 16  ;;  %v680_v57 = vshll.u32 %v2310_v40, 16  ;;  %v685_v59 = vshrl.u32 %v2311_v45, 16  ;;  %v2334_v14 = vld [vmem:[%s3020_s12 + $0x2c] sm:$0x1] }
  0x48   : > { %1909 = vmatmul.mubr.bf16.vlgmr.msra.gmra.mrb[16].mxu0 %v2321_v35  ;;  %v673_v58 = vrot.slane %v671_v52, 4  ;;  %v688_v60 = vshll.u32 %v2311_v45, 16  ;;  %v947_v61 = vrot.slane %v946_v53, 4  ;;  %v960_v62 = vor.u32 %v959_v55, %v956_v48  ;;  %v2373_v24 = vld [vmem:[%s3020_s12 + $0x30] sm:$0xf]  ;;  %v2849_v45 = vld [vmem:[%s3406_s1 + $0x228] sm:$0xff]  }
  0x49   : > { %1974 = vmatmul.mubr.bf16.vlgmr.msra.gmra.mrb[16].mxu1 %v2841_v6  ;;  %v821_v36 = vsel %vm3035_vm4, %v2344_v23, %v820_v25  ;;  %2705 = vmatpush3.bf16.msra.mxu0 %v3215_v29  ;;  %v965_v63 = vrot.slane %v963_v50, 5  ;;  %v676_v0 = vrot.slane %v674_v56, 5  ;;  %v687_v1 = vrot.slane %v685_v59, 4  ;;  %v2374_v25 = vld [vmem:[%s3020_s12 + $0x34] sm:$0x1] }
  0x4a   : > { %2736 = vmatpush3.bf16.msra.mxu1 %v3215_v29  ;;  %v2350_v41 = vcombine.low %v817_v30, %v821_v36  ;;  %2706 = vmatprep.subr.bf16.mxu0 %v2843_v20  ;;  %v2846_v29 = vld [vmem:[%s3406_s1 + $0x218] sm:$0xff]   ;;  %v690_v2 = vrot.slane %v688_v60, 5  ;;  %v694_v3 = vshll.u32 %v2312_v51, 16  ;;  %v952_v4 = vsel %vm3044_vm5, %v947_v61, %v951_v47  ;;  %v2313_v38 = vld [vmem:[%s3020_s12 + $0x28] sm:$0xf] }
  0x4b   : > { %2729 = vmatprep.subr.bf16.mxu1 %v2843_v20  ;;  %v961_v5 = vrot.slane %v960_v62, 4  ;;  %v677_v6 = vor.u32 %v676_v0, %v673_v58  ;;  %v682_v7 = vrot.slane %v680_v57, 5  ;;  %v2345_v16 = vrot.slane %v2333_v11, 9  ;;  %v2375_v30 = vld [vmem:[%s3020_s12 + $0x38] sm:$0xf] }
  0x4c   : > { %1916 = vmatprep.mubr.bf16.mxu0 %v2350_v41  ;;  %v691_v9 = vor.u32 %v690_v2, %v687_v1  ;;  %v696_v10 = vrot.slane %v694_v3, 5  ;;  %v2346_v21 = vrot.slane %v2335_v15, 9  ;;  %v828_v23 = vrot.slane %v2336_v19, 5  ;;  %v2376_v31 = vld [vmem:[%s3020_s12 + $0x3c] sm:$0x1] }
  0x4d   : > { %2707 = vmatpush3.bf16.msra.mxu0 %v2843_v20  ;;  %v966_v12 = vsel %vm3044_vm5, %v961_v5, %v965_v63  ;;  %v678_v13 = vrot.slane %v677_v6, 4  ;;  %v968_v32 = vshrl.u32 %v2373_v24, 16  ;;  %v971_v33 = vshll.u32 %v2373_v24, 16  ;;  %v2314_v39 = vld [vmem:[%s3020_s12 + $0x2c] sm:$0x1] }
  0x4e   : > { %2737 = vmatpush3.bf16.msra.mxu1 %v2843_v20  ;;  %2708 = vmatprep.subr.bf16.mxu0 %v2845_v46  ;;  %v2382_v17 = vcombine.low %v952_v4, %v966_v12  ;;  %v692_v18 = vrot.slane %v691_v9, 4  ;;  %v824_v20 = vrot.slane %v2334_v14, 5  ;;  %v829_v35 = vsel %vm3035_vm4, %v2346_v21, %v828_v23  ;;  %v2315_v44 = vld [vmem:[%s3020_s12 + $0x30] sm:$0xf]  ;;  %v2316_v50 = vld [vmem:[%s3020_s12 + $0x34] sm:$0x1] }
  0x4f   : > { %2730 = vmatprep.subr.bf16.mxu1 %v2845_v46  ;;  %v683_v22 = vsel %vm3044_vm5, %v678_v13, %v682_v7  ;;  %v977_v36 = vshll.u32 %v2374_v25, 16  ;;  %v982_v37 = vshrl.u32 %v2375_v30, 16  ;;  %v970_v41 = vrot.slane %v968_v32, 4  ;;  %v2847_v7 = vld [vmem:[%s3020_s12 + $0x30] ss:$8 sps:$4 sm:$0xff]  }
  0x50   : > { %1981 = vmatprep.mubr.bf16.mxu1 %v2382_v17  ;;  %v697_v27 = vsel %vm3044_vm5, %v692_v18, %v696_v10  ;;  %v825_v28 = vsel %vm3035_vm4, %v2345_v16, %v824_v20  ;;  %v973_v42 = vrot.slane %v971_v33, 5  ;;  %v985_v43 = vshll.u32 %v2375_v30, 16  ;;  %v2337_v10 = vld [vmem:[%s3020_s12 + $0x38] sm:$0xe]  ;;  %v2338_v13 = vld [vmem:[%s3020_s12 + $0x3c] sm:$0x1] }
  0x51   : > { %2709 = vmatpush3.bf16.msra.mxu0 %v2845_v46  ;;  %v2322_v34 = vcombine.low %v683_v22, %v697_v27  ;;  %1982 = vmatmul.mubr.bf16.gmra.mrb[20].mxu1 %v2844_v8  ;;  %v2351_v40 = vcombine.low %v825_v28, %v829_v35  ;;  %v984_v47 = vrot.slane %v982_v37, 4  ;;  %v991_v48 = vshll.u32 %v2376_v31, 16  ;;  %v2339_v14 = vld [vmem:[%s3020_s12 + $0x40] sm:$0xe]  ;;  %v2340_v18 = vld [vmem:[%s3020_s12 + $0x44] sm:$0x1] }
  0x52   : > { %2738 = vmatpush3.bf16.msra.mxu1 %v2845_v46  ;;  %2710 = vmatprep.subr.bf16.mxu0 %v2846_v29  ;;  %v979_v46 = vrot.slane %v977_v36, 5  ;;  %v699_v51 = vshrl.u32 %v2313_v38, 16  ;;  %v974_v52 = vor.u32 %v973_v42, %v970_v41  ;;  %v987_v53 = vrot.slane %v985_v43, 5  ;;  %v2377_v23 = vld [vmem:[%s3020_s12 + $0x40] sm:$0xf]  ;;  %v2852_v25 = vld [vmem:[%s3406_s1 + $0x238] sm:$0xff]  }
  0x53   : > { %2731 = vmatprep.subr.bf16.mxu1 %v2846_v29  ;;  %1917 = vmatmul.mubr.bf16.gmra.mrb[20].mxu0 %v2322_v34  ;;  %v702_v55 = vshll.u32 %v2313_v38, 16  ;;  %v708_v56 = vshll.u32 %v2314_v39, 16  ;;  %v713_v58 = vshrl.u32 %v2315_v44, 16  ;;  %v716_v59 = vshll.u32 %v2315_v44, 16  ;;  %v2378_v24 = vld [vmem:[%s3020_s12 + $0x44] sm:$0x1] }
  0x54   : > { %1924 = vmatprep.mubr.bf16.mxu0 %v2351_v40  ;;  %v701_v57 = vrot.slane %v699_v51, 4  ;;  %v975_v60 = vrot.slane %v974_v52, 4  ;;  %v988_v61 = vor.u32 %v987_v53, %v984_v47  ;;  %v993_v62 = vrot.slane %v991_v48, 5  ;;  %v2379_v28 = vld [vmem:[%s3020_s12 + $0x48] sm:$0xf] }
  0x55   : > { %2711 = vmatpush3.bf16.msra.mxu0 %v2846_v29  ;;  %v704_v63 = vrot.slane %v702_v55, 5  ;;  %v715_v0 = vrot.slane %v713_v58, 4  ;;  %v718_v1 = vrot.slane %v716_v59, 5  ;;  %v722_v2 = vshll.u32 %v2316_v50, 16  ;;  %v2380_v30 = vld [vmem:[%s3020_s12 + $0x4c] sm:$0x1] }
  0x56   : > { %2739 = vmatpush3.bf16.msra.mxu1 %v2846_v29  ;;  %2712 = vmatprep.subr.bf16.mxu0 %v2848_v26  ;;  %v2851_v29 = vld [vmem:[%s3406_s1 + $0x230] sm:$0xff]   ;;  %v980_v3 = vsel %vm3044_vm5, %v975_v60, %v979_v46  ;;  %v989_v4 = vrot.slane %v988_v61, 4  ;;  %v710_v6 = vrot.slane %v708_v56, 5  ;;  %v2347_v15 = vrot.slane %v2337_v10, 9  ;;  %v2317_v37 = vld [vmem:[%s3020_s12 + $0x38] sm:$0xf] }
  0x57   : > { %2732 = vmatprep.subr.bf16.mxu1 %v2848_v26  ;;  %v705_v5 = vor.u32 %v704_v63, %v701_v57  ;;  %v719_v8 = vor.u32 %v718_v1, %v715_v0  ;;  %v724_v9 = vrot.slane %v722_v2, 5  ;;  %v832_v19 = vrot.slane %v2338_v13, 5  ;;  %v2318_v38 = vld [vmem:[%s3020_s12 + $0x3c] sm:$0x1]  ;;  %v2319_v43 = vld [vmem:[%s3020_s12 + $0x40] sm:$0xf] }
  0x58   : > { %v994_v11 = vsel %vm3044_vm5, %v989_v4, %v993_v62  ;;  %v2348_v20 = vrot.slane %v2339_v14, 9  ;;  %v836_v22 = vrot.slane %v2340_v18, 5  ;;  %v996_v31 = vshrl.u32 %v2377_v23, 16  ;;  %v2320_v47 = vld [vmem:[%s3020_s12 + $0x44] sm:$0x1] }
  0x59   : > { %2713 = vmatpush3.bf16.msra.mxu0 %v2848_v26  ;;  %v706_v12 = vrot.slane %v705_v5, 4  ;;  %v2383_v16 = vcombine.low %v980_v3, %v994_v11  ;;  %v720_v17 = vrot.slane %v719_v8, 4  ;;  %v833_v27 = vsel %vm3035_vm4, %v2347_v15, %v832_v19  ;;  %v2850_v4 = vld [vmem:[%s3020_s12 + $0x40] ss:$8 sps:$4 sm:$0xff]   ;;  %v2386_v10 = vld [vmem:[%s3020_s12 + $0x14] sm:$0x1] }
  0x5a   : > { %2740 = vmatpush3.bf16.msra.mxu1 %v2848_v26  ;;  %2714 = vmatprep.subr.bf16.mxu0 %v2849_v45  ;;  %v999_v32 = vshll.u32 %v2377_v23, 16  ;;  %v837_v34 = vsel %vm3035_vm4, %v2348_v20, %v836_v22  ;;  %v1005_v35 = vshll.u32 %v2378_v24, 16  ;;  %v1010_v36 = vshrl.u32 %v2379_v28, 16  ;;  %v2387_v11 = vld [vmem:[%s3020_s12 + $0x18] sm:$0xe] }
  0x5b   : > { %2733 = vmatprep.subr.bf16.mxu1 %v2849_v45  ;;  %v711_v21 = vsel %vm3044_vm5, %v706_v12, %v710_v6  ;;  %1989 = vmatprep.mubr.bf16.mxu1 %v2383_v16  ;;  %v725_v26 = vsel %vm3044_vm5, %v720_v17, %v724_v9  ;;  %v2352_v39 = vcombine.low %v833_v27, %v837_v34  ;;  %v998_v40 = vrot.slane %v996_v31, 4  ;;  %v2388_v15 = vld [vmem:[%s3020_s12 + $0x1c] sm:$0x1]  ;;  %v2393_v20 = vld [vmem:[%s3020_s12 + $0x30] sm:$0xe] }
  0x5c   : > { %v2323_v33 = vcombine.low %v711_v21, %v725_v26  ;;  %1990 = vmatmul.mubr.bf16.gmra.mrb[24].mxu1 %v2847_v7  ;;  %v1001_v41 = vrot.slane %v999_v32, 5  ;;  %v1013_v42 = vshll.u32 %v2379_v28, 16  ;;  %v1007_v44 = vrot.slane %v1005_v35, 5  ;;  %v2385_v7 = vld [vmem:[%s3020_s12 + $0x10] sm:$0xe] }
  0x5d   : > { %2715 = vmatpush3.bf16.msra.mxu0 %v2849_v45  ;;  %v1019_v46 = vshll.u32 %v2380_v30, 16  ;;  %v727_v48 = vshrl.u32 %v2317_v37, 16  ;;  %v730_v52 = vshll.u32 %v2317_v37, 16  ;;  %v736_v53 = vshll.u32 %v2318_v38, 16  ;;  %v2394_v21 = vld [vmem:[%s3020_s12 + $0x34] sm:$0x1] }
  0x5e   : > { %2741 = vmatpush3.bf16.msra.mxu1 %v2849_v45  ;;  %2716 = vmatprep.subr.bf16.mxu0 %v2851_v29  ;;  %v1012_v45 = vrot.slane %v1010_v36, 4  ;;  %v1002_v50 = vor.u32 %v1001_v41, %v998_v40  ;;  %v1015_v51 = vrot.slane %v1013_v42, 5  ;;  %v741_v56 = vshrl.u32 %v2319_v43, 16  ;;  %v2395_v24 = vld [vmem:[%s3020_s12 + $0x38] sm:$0xe] }
  0x5f   : > { %2734 = vmatprep.subr.bf16.mxu1 %v2851_v29  ;;  %1925 = vmatmul.mubr.bf16.gmra.mrb[24].mxu0 %v2323_v33  ;;  %v729_v55 = vrot.slane %v727_v48, 4  ;;  %v744_v57 = vshll.u32 %v2319_v43, 16  ;;  %v1021_v60 = vrot.slane %v1019_v46, 5  ;;  %v732_v61 = vrot.slane %v730_v52, 5  ;;  %v2390_v33 = vld [vmem:[%s3020_s12 + $0x24] sm:$0x1] }
  0x60   : > { %1932 = vmatprep.mubr.bf16.mxu0 %v2352_v39  ;;  %v1003_v58 = vrot.slane %v1002_v50, 4  ;;  %v1016_v59 = vor.u32 %v1015_v51, %v1012_v45  ;;  %v743_v62 = vrot.slane %v741_v56, 4  ;;  %v750_v0 = vshll.u32 %v2320_v47, 16  ;;  %v2391_v36 = vld [vmem:[%s3020_s12 + $0x28] sm:$0xe] }
  0x61   : > { %2717 = vmatpush3.bf16.msra.mxu0 %v2851_v29  ;;  %v746_v63 = vrot.slane %v744_v57, 5  ;;  %v738_v3 = vrot.slane %v736_v53, 5  ;;  %v2401_v12 = vrot.slane %v2385_v7, 9  ;;  %v1077_v16 = vrot.slane %v2386_v10, 5  ;;  %v2392_v37 = vld [vmem:[%s3020_s12 + $0x2c] sm:$0x1] }
  0x62   : > { %2742 = vmatpush3.bf16.msra.mxu1 %v2851_v29  ;;  %2718 = vmatprep.subr.bf16.mxu0 %v2852_v25  ;;  %v1008_v1 = vsel %vm3044_vm5, %v1003_v58, %v1007_v44  ;;  %v1017_v2 = vrot.slane %v1016_v59, 4  ;;  %v733_v29 = vor.u32 %v732_v61, %v729_v55  ;;  %v752_v6 = vrot.slane %v750_v0, 5  ;;  %v2397_v43 = vld [vmem:[%s3020_s12 + $0x40] sm:$0xe]  ;;  %v2398_v44 = vld [vmem:[%s3020_s12 + $0x44] sm:$0x1] }
  0x63   : > { %2735 = vmatprep.subr.bf16.mxu1 %v2852_v25  ;;  %v747_v5 = vor.u32 %v746_v63, %v743_v62  ;;  %v2402_v17 = vrot.slane %v2387_v11, 9  ;;  %v1081_v19 = vrot.slane %v2388_v15, 5  ;;  %v1078_v23 = vsel %vm3035_vm4, %v2401_v12, %v1077_v16  ;;  %v2399_v47 = vld [vmem:[%s3020_s12 + $0x48] sm:$0xe]  ;;  %v2400_v48 = vld [vmem:[%s3020_s12 + $0x4c] sm:$0x1] }
  0x64   : > { %v1022_v8 = vsel %vm3044_vm5, %v1017_v2, %v1021_v60  ;;  %v734_v9 = vrot.slane %v733_v29, 4  ;;  %v2405_v26 = vrot.slane %v2393_v20, 9  ;;  %v1093_v27 = vrot.slane %v2394_v21, 5 }
  0x65   : > { %2719 = vmatpush3.bf16.msra.mxu0 %v2852_v25  ;;  %v2384_v13 = vcombine.low %v1008_v1, %v1022_v8  ;;  %v748_v14 = vrot.slane %v747_v5, 4  ;;  %v1082_v30 = vsel %vm3035_vm4, %v2402_v17, %v1081_v19  ;;  %v2406_v31 = vrot.slane %v2395_v24, 9  ;;  %v2413_v1 = vld [vmem:[%s3407_s2] ss:$0 sm:$0xff] }
  0x66   : > { %2743 = vmatpush3.bf16.msra.mxu1 %v2852_v25  ;;  %v739_v18 = vsel %vm3044_vm5, %v734_v9, %v738_v3  ;;  %v2396_v25 = vld [vmem:[%s3020_s12 + $0x3c] sm:$0x1]  ;;  %v2409_v34 = vcombine.low %v1078_v23, %v1082_v30  ;;  %v1094_v35 = vsel %vm3035_vm4, %v2405_v26, %v1093_v27  ;;  %v2403_v38 = vrot.slane %v2389_v54, 9 }
  0x67   : > { %1997 = vmatprep.mubr.bf16.mxu1 %v2384_v13  ;;  %v753_v22 = vsel %vm3044_vm5, %v748_v14, %v752_v6  ;;  %v1097_v32 = vrot.slane %v2396_v25, 5  ;;  %v1085_v39 = vrot.slane %v2390_v33, 5  ;;  %v2404_v41 = vrot.slane %v2391_v36, 9 }
  0x68   : > { %v2324_v28 = vcombine.low %v739_v18, %v753_v22  ;;  %1998 = vmatmul.mubr.bf16.gmra.mrb[28].mxu1 %v2850_v4  ;;  %v1089_v42 = vrot.slane %v2392_v37, 5  ;;  %v2407_v50 = vrot.slane %v2397_v43, 9  ;;  %v1101_v51 = vrot.slane %v2398_v44, 5 }
  0x69   : > { %v1098_v40 = vsel %vm3035_vm4, %v2406_v31, %v1097_v32  ;;  %v1086_v46 = vsel %vm3035_vm4, %v2403_v38, %v1085_v39  ;;  %v2408_v53 = vrot.slane %v2399_v47, 9  ;;  %v1105_v55 = vrot.slane %v2400_v48, 5 }
  0x6a   : > { %1933 = vmatmul.mubr.bf16.gmra.mrb[28].mxu0 %v2324_v28  ;;  %v2411_v45 = vcombine.low %v1094_v35, %v1098_v40  ;;  %v1090_v52 = vsel %vm3035_vm4, %v2404_v41, %v1089_v42  ;;  %v1102_v56 = vsel %vm3035_vm4, %v2407_v50, %v1101_v51 }
  0x6b   : > { %2720 = vmatprep.mubr.bf16.mxu0 %v2409_v34  ;;  %v2410_v57 = vcombine.low %v1086_v46, %v1090_v52  ;;  %v1106_v58 = vsel %vm3035_vm4, %v2408_v53, %v1105_v55 }
  0x6c   : > { %2724 = vmatprep.mubr.bf16.mxu1 %v2411_v45  ;;  %v2412_v59 = vcombine.low %v1102_v56, %v1106_v58 }
  0x70   : > { %2725 = vmatmul.mubr.bf16.vlgmr.msra.gmra.mrb[32].mxu1 %v2412_v59 }
  0x72   : > { %2721 = vmatmul.mubr.bf16.vlgmr.msra.gmra.mrb[32].mxu0 %v2410_v57 }
  0xfb   : > { %v2548_v62 = vpop.f32.mrb[0].mxu0 }
  0xfc   : > { %v2588_v60 = vpop.f32.mrb[0].mxu1  ;;  %v2549_v2 = vpop.f32.mrb[1].mxu0 }
  0xfd   : > { %v2589_v61 = vpop.f32.mrb[1].mxu1  ;;  %v2550_v3 = vadd.f32 %v2549_v2, %v2548_v62  ;;  %v2551_v4 = vpop.f32.mrb[2].mxu0 }
  0xfe   : > { %v2590_v63 = vadd.f32 %v2589_v61, %v2588_v60  ;;  %v2591_v0 = vpop.f32.mrb[2].mxu1  ;;  %v2552_v6 = vpop.f32.mrb[3].mxu0 }
  0xff   : > { %v2592_v29 = vpop.f32.mrb[3].mxu1  ;;  %v1781_v49 = vadd.f32 %v2550_v3, %v2413_v1  ;;  %v2553_v7 = vadd.f32 %v2552_v6, %v2551_v4 }
 0x100   : > { %v2593_v5 = vadd.f32 %v2592_v29, %v2591_v0 }
 0x101   : > { %v1846_v8 = vadd.f32 %v2590_v63, %v1781_v49  ;;  %v1784_v9 = vadd.f32 %v2553_v7, %v2413_v1 }
 0x103   : > { %v1849_v10 = vadd.f32 %v2593_v5, %v1784_v9  ;;  %v2554_v13 = vpop.f32.mrb[4].mxu0 }
 0x104   : > { %v2594_v11 = vpop.f32.mrb[4].mxu1  ;;  %v2555_v16 = vpop.f32.mrb[5].mxu0 }
 0x105   : > { %v2595_v12 = vpop.f32.mrb[5].mxu1  ;;  %v2556_v18 = vadd.f32 %v2555_v16, %v2554_v13  ;;  %v2557_v19 = vpop.f32.mrb[6].mxu0 }
 0x106   : > { %v2596_v14 = vadd.f32 %v2595_v12, %v2594_v11  ;;  %v2597_v15 = vpop.f32.mrb[6].mxu1  ;;  %v2558_v21 = vpop.f32.mrb[7].mxu0 }
 0x107   : > { %v2598_v17 = vpop.f32.mrb[7].mxu1  ;;  %v1789_v22 = vadd.f32 %v2556_v18, %v2413_v1  ;;  %v2559_v23 = vadd.f32 %v2558_v21, %v2557_v19 }
 0x108   : > { %v2599_v20 = vadd.f32 %v2598_v17, %v2597_v15 }
 0x109   : > { %v1854_v24 = vadd.f32 %v2596_v14, %v1789_v22  ;;  %v1792_v25 = vadd.f32 %v2559_v23, %v2413_v1 }
 0x10b   : > { %v1857_v26 = vadd.f32 %v2599_v20, %v1792_v25  ;;  %v2560_v28 = vpop.f32.mrb[8].mxu0 }
 0x10c   : > { %v2600_v27 = vpop.f32.mrb[8].mxu1  ;;  %v2561_v31 = vpop.f32.mrb[9].mxu0 }
 0x10d   : > { %v2601_v30 = vpop.f32.mrb[9].mxu1  ;;  %v2562_v33 = vadd.f32 %v2561_v31, %v2560_v28  ;;  %v2563_v34 = vpop.f32.mrb[10].mxu0 }
 0x10e   : > { %v2602_v32 = vadd.f32 %v2601_v30, %v2600_v27  ;;  %v2603_v54 = vpop.f32.mrb[10].mxu1  ;;  %v2564_v36 = vpop.f32.mrb[11].mxu0 }
 0x10f   : > { %v2604_v35 = vpop.f32.mrb[11].mxu1  ;;  %v1797_v38 = vadd.f32 %v2562_v33, %v2413_v1  ;;  %v2565_v39 = vadd.f32 %v2564_v36, %v2563_v34 }
 0x110   : > { %v2605_v37 = vadd.f32 %v2604_v35, %v2603_v54 }
 0x111   : > { %v1862_v40 = vadd.f32 %v2602_v32, %v1797_v38  ;;  %v1800_v41 = vadd.f32 %v2565_v39, %v2413_v1 }
 0x113   : > { %v1865_v42 = vadd.f32 %v2605_v37, %v1800_v41  ;;  %v2566_v45 = vpop.f32.mrb[12].mxu0 }
 0x114   : > { %v2606_v43 = vpop.f32.mrb[12].mxu1  ;;  %v2567_v48 = vpop.f32.mrb[13].mxu0 }
 0x115   : > { %v2607_v44 = vpop.f32.mrb[13].mxu1  ;;  %v2568_v51 = vadd.f32 %v2567_v48, %v2566_v45  ;;  %v2569_v52 = vpop.f32.mrb[14].mxu0 }
 0x116   : > { %v2608_v46 = vadd.f32 %v2607_v44, %v2606_v43  ;;  %v2609_v47 = vpop.f32.mrb[14].mxu1  ;;  %v2570_v55 = vpop.f32.mrb[15].mxu0 }
 0x117   : > { %v2610_v50 = vpop.f32.mrb[15].mxu1  ;;  %v1805_v56 = vadd.f32 %v2568_v51, %v2413_v1  ;;  %v2571_v57 = vadd.f32 %v2570_v55, %v2569_v52 }
 0x118   : > { %v2611_v53 = vadd.f32 %v2610_v50, %v2609_v47 }
 0x119   : > { %v3373_v58 = vadd.f32 %v2608_v46, %v1805_v56  ;;  %v1808_v59 = vadd.f32 %v2571_v57, %v2413_v1 }
 0x11b   : > { %v3375_v60 = vadd.f32 %v2611_v53, %v1808_v59  ;;  %v2628_v2 = vpop.f32.mrb[16].mxu0 }
 0x11c   : > { %v2668_v61 = vpop.f32.mrb[16].mxu1  ;;  %v2629_v3 = vpop.f32.mrb[17].mxu0 }
 0x11d   : > { %v2669_v62 = vpop.f32.mrb[17].mxu1  ;;  %v2630_v5 = vadd.f32 %v2629_v3, %v2628_v2  ;;  %v2631_v6 = vpop.f32.mrb[18].mxu0 }
 0x11e   : > { %v2670_v63 = vadd.f32 %v2669_v62, %v2668_v61  ;;  %v2671_v0 = vpop.f32.mrb[18].mxu1  ;;  %v2632_v49 = vpop.f32.mrb[19].mxu0  ;;  %v2526_v61 = vld [vmem:[%s299_s21 + $0x8] sm:$0xff]   ;;  %v2527_v62 = vld [vmem:[%s299_s21 + $0x10] sm:$0xff]  }
 0x11f   : > { %v2672_v29 = vpop.f32.mrb[19].mxu1  ;;  %v1911_v7 = vadd.f32 %v2630_v5, %v1846_v8  ;;  %v2633_v9 = vadd.f32 %v2632_v49, %v2631_v6  ;;  %v2496_v3 = vunpack.c.l.bf16 %v2526_v61  ;;  %v2500_v5 = vunpack.c.l.bf16 %v2527_v62 }
 0x120   : > { %v2673_v4 = vadd.f32 %v2672_v29, %v2671_v0 }
 0x121   : > { %v1914_v11 = vadd.f32 %v2633_v9, %v1849_v10  ;;  %v3377_v12 = vadd.f32 %v2670_v63, %v1911_v7  ;;  %v2491_v63 = vld [vmem:[%s299_s21] sm:$0xff]  }
 0x122   : > { %v2492_v7 = vunpack.c.l.bf16 %v2491_v63 }
 0x123   : > { %v3379_v13 = vadd.f32 %v2673_v4, %v1914_v11 }
 0x124   : > { %v2674_v1 = vpop.f32.mrb[20].mxu1 }
 0x125   : > { %v2675_v14 = vpop.f32.mrb[21].mxu1 }
 0x126   : > { %v2634_v15 = vpop.f32.mrb[20].mxu0  ;;  %v2676_v16 = vadd.f32 %v2675_v14, %v2674_v1  ;;  %v2677_v17 = vpop.f32.mrb[22].mxu1 }
 0x127   : > { %v2635_v18 = vpop.f32.mrb[21].mxu0  ;;  %v2678_v19 = vpop.f32.mrb[23].mxu1 }
 0x128   : > { %v2636_v20 = vadd.f32 %v2635_v18, %v2634_v15  ;;  %v2637_v21 = vpop.f32.mrb[22].mxu0  ;;  %v2679_v22 = vadd.f32 %v2678_v19, %v2677_v17  ;;  %v2501_v18 = vunpack.c.h.bf16 %v2527_v62 }
 0x129   : > { %v2638_v23 = vpop.f32.mrb[23].mxu0 }
 0x12a   : > { %v1919_v25 = vadd.f32 %v2636_v20, %v1854_v24  ;;  %v2639_v27 = vadd.f32 %v2638_v23, %v2637_v21 }
 0x12c   : > { %v1922_v8 = vadd.f32 %v2639_v27, %v1857_v26  ;;  %v1984_v28 = vadd.f32 %v2676_v16, %v1919_v25  ;;  %v2497_v16 = vunpack.c.h.bf16 %v2526_v61 }
 0x12e   : > { %v1987_v10 = vadd.f32 %v2679_v22, %v1922_v8  ;;  %v2493_v22 = vunpack.c.h.bf16 %v2491_v63 }
 0x12f   : > { %v2680_v30 = vpop.f32.mrb[24].mxu1 }
 0x130   : > { %v2681_v31 = vpop.f32.mrb[25].mxu1 }
 0x131   : > { %v2682_v54 = vadd.f32 %v2681_v31, %v2680_v30  ;;  %v2683_v33 = vpop.f32.mrb[26].mxu1 }
 0x132   : > { %v2640_v32 = vpop.f32.mrb[24].mxu0  ;;  %v2684_v35 = vpop.f32.mrb[27].mxu1 }
 0x133   : > { %v2641_v34 = vpop.f32.mrb[25].mxu0  ;;  %v2685_v38 = vadd.f32 %v2684_v35, %v2683_v33 }
 0x134   : > { %v2642_v36 = vadd.f32 %v2641_v34, %v2640_v32  ;;  %v2643_v37 = vpop.f32.mrb[26].mxu0 }
 0x135   : > { %v2644_v39 = vpop.f32.mrb[27].mxu0 }
 0x136   : > { %v1927_v41 = vadd.f32 %v2642_v36, %v1862_v40  ;;  %v2645_v43 = vadd.f32 %v2644_v39, %v2643_v37 }
 0x138   : > { %v1930_v24 = vadd.f32 %v2645_v43, %v1865_v42  ;;  %v1992_v44 = vadd.f32 %v2682_v54, %v1927_v41  ;;  %v2528_v42 = vld [vmem:[%s299_s21 + $0x18] sm:$0xff]  }
 0x139   : > { %v2504_v29 = vunpack.c.l.bf16 %v2528_v42  ;;  %v2505_v1 = vunpack.c.h.bf16 %v2528_v42 }
 0x13a   : > { %v1995_v26 = vadd.f32 %v2685_v38, %v1930_v24 }
 0x13b   : > { %v2686_v45 = vpop.f32.mrb[28].mxu1 }
 0x13c   : > { %v2687_v46 = vpop.f32.mrb[29].mxu1 }
 0x13d   : > { %v2646_v47 = vpop.f32.mrb[28].mxu0  ;;  %v2688_v48 = vadd.f32 %v2687_v46, %v2686_v45  ;;  %v2689_v50 = vpop.f32.mrb[30].mxu1 }
 0x13e   : > { %v2647_v51 = vpop.f32.mrb[29].mxu0  ;;  %v2690_v52 = vpop.f32.mrb[31].mxu1 }
 0x13f   : > { %v2648_v53 = vadd.f32 %v2647_v51, %v2646_v47  ;;  %v2649_v55 = vpop.f32.mrb[30].mxu0  ;;  %v2691_v40 = vadd.f32 %v2690_v52, %v2689_v50 }
 0x140   : > { %v2650_v56 = vpop.f32.mrb[31].mxu0 }
 0x141   : > { %v1935_v57 = vadd.f32 %v2648_v53, %v3373_v58  ;;  %v2651_v59 = vadd.f32 %v2650_v56, %v2649_v55 }
 0x143   : > { %v1938_v0 = vadd.f32 %v2651_v59, %v3375_v60  ;;  %v2000_v2 = vadd.f32 %v2688_v48, %v1935_v57  ;;  %v2726_v4 = vpop.f32.mrb[32].mxu1 }
 0x144   : > { %v2056_v9 = vpop.f32.mrb[33].mxu1 }
 0x145   : > { %v2722_v6 = vpop.f32.mrb[32].mxu0  ;;  %v2065_v49 = vadd.f32 %v2726_v4, %v2000_v2  ;;  %v2003_v11 = vadd.f32 %v2691_v40, %v1938_v0  ;;  %v2057_v58 = vadd.f32 %v2056_v9, %v1992_v44  ;;  %v2727_v17 = vpop.f32.mrb[34].mxu1 }
 0x146   : > { %v2049_v14 = vadd.f32 %v2722_v6, %v1984_v28  ;;  %v2040_v15 = vpop.f32.mrb[33].mxu0  ;;  %v2059_v23 = vpop.f32.mrb[35].mxu1 }
 0x147   : > { %v2093_v19 = vadd.f32 %v2504_v29, %v2065_v49  ;;  %v2041_v60 = vadd.f32 %v2040_v15, %v3377_v12  ;;  %v2723_v20 = vpop.f32.mrb[34].mxu0  ;;  %v2068_v21 = vadd.f32 %v2727_v17, %v2003_v11  ;;  %v2091_v27 = vadd.f32 %v2500_v5, %v2057_v58 }
 0x148   : > { %v2089_v25 = vadd.f32 %v2496_v3, %v2049_v14  ;;  %v2052_v8 = vadd.f32 %v2723_v20, %v1987_v10  ;;  %v2043_v30 = vpop.f32.mrb[35].mxu0  ;;  %v2060_v31 = vadd.f32 %v2059_v23, %v1995_v26 }
 0x149   : > { %v2087_v32 = vadd.f32 %v2492_v7, %v2041_v60  ;;  %v2094_v28 = vadd.f32 %v2505_v1, %v2068_v21  ;;  %v2044_v54 = vadd.f32 %v2043_v30, %v3379_v13  ;;  %v2101_v35 = vmax.f32 %v2093_v19, 0.0 }
 0x14a   : > { %v2090_v33 = vadd.f32 %v2497_v16, %v2052_v8  ;;  %v2092_v34 = vadd.f32 %v2501_v18, %v2060_v31  ;;  %v2097_v12 = vmax.f32 %v2089_v25, 0.0  ;;  %v2099_v38 = vmax.f32 %v2091_v27, 0.0 }
 0x14b   : > { %v2102_v36 = vmax.f32 %v2094_v28, 0.0  ;;  %v2088_v37 = vadd.f32 %v2493_v22, %v2044_v54  ;;  %v2095_v41 = vmax.f32 %v2087_v32, 0.0 }
 0x14c   : > { %v2098_v39 = vmax.f32 %v2090_v33, 0.0  ;;  %v2100_v10 = vmax.f32 %v2092_v34, 0.0 }
 0x14d   : > { %v2524_v43 = vpack.c.bf16 %v2102_v36, %v2101_v35  ;;  %v2096_v24 = vmax.f32 %v2088_v37, 0.0 }
 0x14e   : > { %v2514_v44 = vpack.c.bf16 %v2098_v39, %v2097_v12  ;;  %v2519_v26 = vpack.c.bf16 %v2100_v10, %v2099_v38 }
 0x14f   : > { %2531 = vst [vmem:[%s312_s24 + $0x18] sm:$0xff] %v2524_v43   ;;  %v2509_v13 = vpack.c.bf16 %v2096_v24, %v2095_v41 }
 0x150   : > { %2529 = vst [vmem:[%s312_s24 + $0x8] sm:$0xff] %v2514_v44   ;;  %2530 = vst [vmem:[%s312_s24 + $0x10] sm:$0xff] %v2519_v26  }
 0x151   : > { %2510 = vst [vmem:[%s312_s24] sm:$0xff] %v2509_v13  }
 0x152 PF: > { %s14_s17 = sadd.s32 1, %s2875_s17   ;;  %s3414_s15 = smov %s2871_s16 }
 0x153   : > { %p11_p5 = scmp.ge.s32.totalorder %s14_s17, 4   ;;  %s3415_s16 = smov %s3417_s18 }
 0x155   :  { %13 = sbr.rel (!%p11_p5) target bundleno = 2 (0x2), region = 77 }

// kernel: _lambda_.8
= control target key start
LH: loop header
LB: loop body
LE: loop exit
PB: predicated region body
PF: predicated region fallthrough
CT: control target
= control target key end

     0   :  { %s2756_s12 = smov 0   ;;  %s2758_s13 = smov 0   ;;  %s3243_s0 = inlined_call_operand.vmem [shape: bf16[2,10,10,128], index: 0, kind: input, shape index: {}]   ;;  %s3244_s1 = inlined_call_operand.vmem [shape: bf16[1152,128], index: 1, kind: input, shape index: {}]   ;;  %s3245_s2 = inlined_call_operand.vmem [shape: f32[1,128], index: 2, kind: input, shape index: {}]   ;;  %s3246_s3 = inlined_call_operand.vmem [shape: bf16[2,8,8,128], index: 3, kind: output, shape index: {}]  }
   0x1   :  { %s2760_s14 = smov 0  }
   0x2 LB: > { %s32_s15 = sadd.s32 1, %s2730_s13  ;;  %p2148_p0 = scmp.ge.s32.totalorder %s2734_s14, 1  ;;  %s2734_s14 = sphi %s2760_s14, %s13_s14   ;;  %s2730_s13 = sphi %s2758_s13, %s3252_s13   ;;  %s2726_s12 = sphi %s2756_s12, %s3251_s12  }
   0x3   : > { %p34_p1 = scmp.ge.s32.totalorder %s32_s15, 2  ;;  %p177_p2 = scmp.lt.s32.totalorder %s2734_s14, 3 }
   0x5   : > { %s3254_s15 = smov (%p34_p1, %s32_s15), 0  ;;  %p178_p3 = pnand %p2148_p0, %p177_p2 }
   0x6   : > { %v2628_v0 = vld [vmem:[%s3244_s1 + $0x40] sm:$0xff] (!%p178_p3)   ;;  %v2632_v4 = vld [vmem:[%s3244_s1 + $0x48] sm:$0xff] (!%p178_p3)   ;;  %v2636_v8 = vld [vmem:[%s3244_s1 + $0x50] sm:$0xff] (!%p178_p3)   ;;  %p215_p4 = scmp.lt.s32.totalorder (!%p178_p3), %s2726_s12, 1  ;;  %vm460_vm0 = vcmask (!%p178_p3), 1042432   ;;  %vm461_vm1 = vcmask (!%p178_p3), 1046532  }
   0x7   : > { %181 = sbr.rel (%p178_p3) target bundleno = 336 (0x150), region = 32  ;;  %v2629_v1 = vld [vmem:[%s3244_s1 + $0xc0] sm:$0xff] (!%p178_p3)   ;;  %2391 = vmatprep.subr.bf16.mxu0 (!%p178_p3), %v2628_v0  ;;  %v2633_v5 = vld [vmem:[%s3244_s1 + $0xc8] sm:$0xff] (!%p178_p3)   ;;  %v2637_v9 = vld [vmem:[%s3244_s1 + $0xd0] sm:$0xff] (!%p178_p3)   ;;  %vm293_vm2 = vsmask.f32 (!%p178_p3), 3328 }
   0x8   : > { %v2630_v2 = vld [vmem:[%s3244_s1] sm:$0xff] (!%p178_p3)   ;;  %2431 = vmatprep.subr.bf16.mxu1 (!%p178_p3), %v2629_v1  ;;  %v2634_v6 = vld [vmem:[%s3244_s1 + $0x8] sm:$0xff] (!%p178_p3)   ;;  %v2638_v10 = vld [vmem:[%s3244_s1 + $0x10] sm:$0xff] (!%p178_p3)   ;;  %vm294_vm3 = vsmask.f32 (!%p178_p3), 7440 }
   0x9   : > { %v2631_v3 = vld [vmem:[%s3244_s1 + $0x80] sm:$0xff] (!%p178_p3)   ;;  %2392 = vmatpush3.bf16.msra.mxu0 (!%p178_p3), %v2630_v2  ;;  %v2635_v7 = vld [vmem:[%s3244_s1 + $0x88] sm:$0xff] (!%p178_p3)   ;;  %v2639_v11 = vld [vmem:[%s3244_s1 + $0x90] sm:$0xff] (!%p178_p3)  }
   0xa   : > { %2432 = vmatpush3.bf16.msra.mxu1 (!%p178_p3), %v2631_v3  ;;  %2393 = vmatprep.subr.bf16.mxu0 (!%p178_p3), %v2632_v4  ;;  %v2640_v12 = vld [vmem:[%s3244_s1 + $0x58] sm:$0xff] (!%p178_p3)   ;;  %v2644_v16 = vld [vmem:[%s3244_s1 + $0x60] sm:$0xff] (!%p178_p3)   ;;  %v2648_v20 = vld [vmem:[%s3244_s1 + $0x68] sm:$0xff] (!%p178_p3)  }
   0xb   : > { %2433 = vmatprep.subr.bf16.mxu1 (!%p178_p3), %v2633_v5  ;;  %v2641_v13 = vld [vmem:[%s3244_s1 + $0xd8] sm:$0xff] (!%p178_p3)   ;;  %v2645_v17 = vld [vmem:[%s3244_s1 + $0xe0] sm:$0xff] (!%p178_p3)   ;;  %v2649_v21 = vld [vmem:[%s3244_s1 + $0xe8] sm:$0xff] (!%p178_p3)  }
   0xc   : > { %v2642_v14 = vld [vmem:[%s3244_s1 + $0x18] sm:$0xff] (!%p178_p3)   ;;  %v2646_v18 = vld [vmem:[%s3244_s1 + $0x20] sm:$0xff] (!%p178_p3)   ;;  %v2650_v22 = vld [vmem:[%s3244_s1 + $0x28] sm:$0xff] (!%p178_p3)  }
   0xd   : > { %2394 = vmatpush3.bf16.msra.mxu0 (!%p178_p3), %v2634_v6  ;;  %v2643_v15 = vld [vmem:[%s3244_s1 + $0x98] sm:$0xff] (!%p178_p3)   ;;  %v2647_v19 = vld [vmem:[%s3244_s1 + $0xa0] sm:$0xff] (!%p178_p3)   ;;  %v2651_v23 = vld [vmem:[%s3244_s1 + $0xa8] sm:$0xff] (!%p178_p3)  }
   0xe   : > { %2434 = vmatpush3.bf16.msra.mxu1 %v2635_v7  ;;  %2395 = vmatprep.subr.bf16.mxu0 %v2636_v8  ;;  %s3256_s12 = smov (!%p215_p4, %s2726_s12), 1  ;;  %v2652_v24 = vld [vmem:[%s3244_s1 + $0x70] sm:$0xff]   ;;  %v2656_v28 = vld [vmem:[%s3244_s1 + $0x78] sm:$0xff]   ;;  %vm2889_vm4 = vmor %vm460_vm0, %vm461_vm1 }
   0xf   : > { %2435 = vmatprep.subr.bf16.mxu1 %v2637_v9  ;;  %v2653_v25 = vld [vmem:[%s3244_s1 + $0xf0] sm:$0xff]   ;;  %s2603_s22 = smul.u32 80, %s3256_s12  ;;  %v2657_v29 = vld [vmem:[%s3244_s1 + $0xf8] sm:$0xff]   ;;  %vm2898_vm5 = vmor %vm293_vm2, %vm294_vm3  ;;  %s2367_s30 = sshll.u32 %s3256_s12, 5 }
  0x10   : > { %v2654_v26 = vld [vmem:[%s3244_s1 + $0x30] sm:$0xff]   ;;  %v2658_v30 = vld [vmem:[%s3244_s1 + $0x38] sm:$0xff]   ;;  %v2662_v60 = vld [vmem:[%s3244_s1 + $0x140] sm:$0xff]   ;;  %s238_s7 = scalar_lea.vmem %s3246_s3, %s2367_s30 }
  0x11   : > { %2396 = vmatpush3.bf16.msra.mxu0 %v2638_v10  ;;  %v2655_v27 = vld [vmem:[%s3244_s1 + $0xb0] sm:$0xff]   ;;  %s2874_s6 = scalar_lea.vmem %s3243_s0, %s2603_s22  ;;  %v2659_v31 = vld [vmem:[%s3244_s1 + $0xb8] sm:$0xff]   ;;  %v2663_v2 = vld [vmem:[%s3244_s1 + $0x1c0] sm:$0xff]  }
  0x12   : > { %2436 = vmatpush3.bf16.msra.mxu1 %v2639_v11  ;;  %2397 = vmatprep.subr.bf16.mxu0 %v2640_v12  ;;  %v277_v32 = vld [vmem:[%s2874_s6] sm:$0xf]  ;;  %v278_v33 = vld [vmem:[%s2874_s6 + $0x4] sm:$0x1]  ;;  %v279_v34 = vld [vmem:[%s2874_s6 + $0x8] sm:$0xf] }
  0x13   : > { %2437 = vmatprep.subr.bf16.mxu1 %v2641_v13  ;;  %v280_v35 = vld [vmem:[%s2874_s6 + $0xc] sm:$0x1]  ;;  %v297_v36 = vshrl.u32 %v277_v32, 16  ;;  %v300_v37 = vshll.u32 %v277_v32, 16  ;;  %v306_v38 = vshll.u32 %v278_v33, 16  ;;  %v311_v39 = vshrl.u32 %v279_v34, 16 }
  0x14   : > { %v314_v40 = vshll.u32 %v279_v34, 16  ;;  %v320_v41 = vshll.u32 %v280_v35, 16  ;;  %v2660_v42 = vld [vmem:[%s2874_s6 + $0x8] ss:$8 sps:$4 sm:$0xff]   ;;  %v428_v51 = vld [vmem:[%s2874_s6] sm:$0xe] }
  0x15   : > { %2398 = vmatpush3.bf16.msra.mxu0 %v2642_v14  ;;  %v299_v43 = vrot.slane %v297_v36, 4  ;;  %v302_v44 = vrot.slane %v300_v37, 5  ;;  %v313_v45 = vrot.slane %v311_v39, 4  ;;  %v308_v46 = vrot.slane %v306_v38, 5  ;;  %1769 = vmatprep.mubr.bf16.mxu1 %v2660_v42  ;;  %v429_v52 = vld [vmem:[%s2874_s6 + $0x4] sm:$0x1] }
  0x16   : > { %2438 = vmatpush3.bf16.msra.mxu1 %v2643_v15  ;;  %2399 = vmatprep.subr.bf16.mxu0 %v2644_v16  ;;  %v316_v47 = vrot.slane %v314_v40, 5  ;;  %v322_v48 = vrot.slane %v320_v41, 5  ;;  %v430_v53 = vld [vmem:[%s2874_s6 + $0x8] sm:$0xe]  ;;  %v431_v56 = vld [vmem:[%s2874_s6 + $0xc] sm:$0x1] }
  0x17   : > { %2439 = vmatprep.subr.bf16.mxu1 %v2645_v17  ;;  %v303_v50 = vor.u32 %v302_v44, %v299_v43  ;;  %v2160_v57 = vrot.slane %v428_v51, 9  ;;  %v465_v58 = vrot.slane %v429_v52, 5  ;;  %v2161_v59 = vrot.slane %v430_v53, 9  ;;  %v2661_v0 = vld [vmem:[%s2874_s6] ss:$8 sps:$4 sm:$0xff]   ;;  %v2672_v42 = vld [vmem:[%s3244_s1 + $0x150] sm:$0xff]  }
  0x18   : > { %v317_v55 = vor.u32 %v316_v47, %v313_v45  ;;  %v469_v62 = vrot.slane %v431_v56, 5  ;;  %v2664_v5 = vld [vmem:[%s3244_s1 + $0x100] sm:$0xff]   ;;  %v2666_v10 = vld [vmem:[%s3244_s1 + $0x148] sm:$0xff]   ;;  %v281_v14 = vld [vmem:[%s2874_s6 + $0x10] sm:$0xf] }
  0x19   : > { %2400 = vmatpush3.bf16.msra.mxu0 %v2646_v18  ;;  %v304_v61 = vrot.slane %v303_v50, 4  ;;  %v466_v1 = vsel %vm2889_vm4, %v2160_v57, %v465_v58  ;;  %v2665_v8 = vld [vmem:[%s3244_s1 + $0x180] sm:$0xff]   ;;  %v2667_v11 = vld [vmem:[%s3244_s1 + $0x1c8] sm:$0xff]   ;;  %v282_v15 = vld [vmem:[%s2874_s6 + $0x14] sm:$0x1]  ;;  %v325_v18 = vshrl.u32 %v281_v14, 16 }
  0x1a   : > { %2440 = vmatpush3.bf16.msra.mxu1 %v2647_v19  ;;  %2401 = vmatprep.subr.bf16.mxu0 %v2648_v20  ;;  %v318_v63 = vrot.slane %v317_v55, 4  ;;  %v470_v4 = vsel %vm2889_vm4, %v2161_v59, %v469_v62  ;;  %v2668_v12 = vld [vmem:[%s3244_s1 + $0x108] sm:$0xff]   ;;  %v283_v16 = vld [vmem:[%s2874_s6 + $0x18] sm:$0xf]  ;;  %v284_v17 = vld [vmem:[%s2874_s6 + $0x1c] sm:$0x1] }
  0x1b   : > { %2441 = vmatprep.subr.bf16.mxu1 %v2649_v21  ;;  %v309_v3 = vsel %vm2898_vm5, %v304_v61, %v308_v46  ;;  %v2168_v7 = vcombine.low %v466_v1, %v470_v4  ;;  %v2669_v13 = vld [vmem:[%s3244_s1 + $0x188] sm:$0xff]   ;;  %v328_v19 = vshll.u32 %v281_v14, 16  ;;  %v334_v20 = vshll.u32 %v282_v15, 16  ;;  %v432_v32 = vld [vmem:[%s2874_s6 + $0x10] sm:$0xe]  ;;  %v2676_v56 = vld [vmem:[%s3244_s1 + $0x158] sm:$0xff]  }
  0x1c   : > { %v323_v6 = vsel %vm2898_vm5, %v318_v63, %v322_v48  ;;  %v339_v21 = vshrl.u32 %v283_v16, 16  ;;  %v433_v33 = vld [vmem:[%s2874_s6 + $0x14] sm:$0x1]  ;;  %v434_v35 = vld [vmem:[%s2874_s6 + $0x18] sm:$0xe]  ;;  %v2162_v37 = vrot.slane %v432_v32, 9 }
  0x1d   : > { %2402 = vmatpush3.bf16.msra.mxu0 %v2650_v22  ;;  %v2156_v9 = vcombine.low %v309_v3, %v323_v6  ;;  %v342_v22 = vshll.u32 %v283_v16, 16  ;;  %v435_v36 = vld [vmem:[%s2874_s6 + $0x1c] sm:$0x1]  ;;  %v473_v38 = vrot.slane %v433_v33, 5  ;;  %v2163_v40 = vrot.slane %v434_v35, 9  ;;  %v2673_v46 = vld [vmem:[%s3244_s1 + $0x1d0] sm:$0xff]  }
  0x1e   : > { %2442 = vmatpush3.bf16.msra.mxu1 %v2651_v23  ;;  %2403 = vmatprep.subr.bf16.mxu0 %v2652_v24  ;;  %v348_v23 = vshll.u32 %v284_v17, 16  ;;  %v327_v24 = vrot.slane %v325_v18, 4  ;;  %v477_v41 = vrot.slane %v435_v36, 5  ;;  %v2671_v44 = vld [vmem:[%s2874_s6 + $0x10] ss:$8 sps:$4 sm:$0xff]   ;;  %v2684_v32 = vld [vmem:[%s3244_s1 + $0x120] sm:$0xff]  }
  0x1f   : > { %2443 = vmatprep.subr.bf16.mxu1 %v2653_v25  ;;  %1704 = vmatprep.mubr.bf16.mxu0 %v2156_v9  ;;  %v330_v25 = vrot.slane %v328_v19, 5  ;;  %v474_v45 = vsel %vm2889_vm4, %v2162_v37, %v473_v38  ;;  %v2674_v52 = vld [vmem:[%s3244_s1 + $0x110] sm:$0xff]   ;;  %v2677_v57 = vld [vmem:[%s3244_s1 + $0x1d8] sm:$0xff]   ;;  %v286_v61 = vld [vmem:[%s2874_s6 + $0x24] sm:$0x1] }
  0x20   : > { %v478_v48 = vsel %vm2889_vm4, %v2163_v40, %v477_v41  ;;  %v2675_v55 = vld [vmem:[%s3244_s1 + $0x190] sm:$0xff]   ;;  %v2678_v58 = vld [vmem:[%s3244_s1 + $0x118] sm:$0xff]   ;;  %v287_v62 = vld [vmem:[%s2874_s6 + $0x28] sm:$0xf] }
  0x21   : > { %2404 = vmatpush3.bf16.msra.mxu0 %v2654_v26  ;;  %v341_v26 = vrot.slane %v339_v21, 4  ;;  %v2169_v51 = vcombine.low %v474_v45, %v478_v48  ;;  %v2679_v59 = vld [vmem:[%s3244_s1 + $0x198] sm:$0xff]   ;;  %v288_v63 = vld [vmem:[%s2874_s6 + $0x2c] sm:$0x1]  ;;  %v367_v3 = vshrl.u32 %v287_v62, 16  ;;  %v370_v4 = vshll.u32 %v287_v62, 16 }
  0x22   : > { %2444 = vmatpush3.bf16.msra.mxu1 %v2655_v27  ;;  %2405 = vmatprep.subr.bf16.mxu0 %v2656_v28  ;;  %v2670_v27 = vld [vmem:[%s2874_s6 + $0x18] ss:$8 sps:$4 sm:$0xff]   ;;  %v344_v28 = vrot.slane %v342_v22, 5  ;;  %v437_v16 = vld [vmem:[%s2874_s6 + $0x24] sm:$0x1]  ;;  %v2686_v36 = vld [vmem:[%s3244_s1 + $0x168] sm:$0xff]  }
  0x23   : > { %2445 = vmatprep.subr.bf16.mxu1 %v2657_v29  ;;  %v331_v29 = vor.u32 %v330_v25, %v327_v24  ;;  %v369_v9 = vrot.slane %v367_v3, 4  ;;  %v436_v14 = vld [vmem:[%s2874_s6 + $0x20] sm:$0xe]  ;;  %v438_v17 = vld [vmem:[%s2874_s6 + $0x28] sm:$0xe]  ;;  %v481_v21 = vrot.slane %v437_v16, 5 }
  0x24   : > { %v345_v34 = vor.u32 %v344_v28, %v341_v26  ;;  %v439_v18 = vld [vmem:[%s2874_s6 + $0x2c] sm:$0x1]  ;;  %v2165_v22 = vrot.slane %v438_v17, 9  ;;  %v2681_v24 = vld [vmem:[%s2874_s6 + $0x20] ss:$8 sps:$4 sm:$0xff]   ;;  %v2695_v16 = vld [vmem:[%s3244_s1 + $0x1b0] sm:$0xff]  }
  0x25   : > { %2406 = vmatpush3.bf16.msra.mxu0 %v2658_v30  ;;  %v336_v30 = vrot.slane %v334_v20, 5  ;;  %v332_v39 = vrot.slane %v331_v29, 4  ;;  %v2164_v20 = vrot.slane %v436_v14, 9  ;;  %v485_v25 = vrot.slane %v439_v18, 5  ;;  %v2682_v26 = vld [vmem:[%s3244_s1 + $0x160] sm:$0xff]   ;;  %v2687_v37 = vld [vmem:[%s3244_s1 + $0x1e8] sm:$0xff]  }
  0x26   : > { %2446 = vmatpush3.bf16.msra.mxu1 %v2659_v31  ;;  %2471 = vmatprep.subr.bf16.mxu0 %v2662_v60  ;;  %v350_v31 = vrot.slane %v348_v23, 5  ;;  %v346_v43 = vrot.slane %v345_v34, 4  ;;  %v285_v60 = vld [vmem:[%s2874_s6 + $0x20] sm:$0xf]  ;;  %v2688_v38 = vld [vmem:[%s3244_s1 + $0x128] sm:$0xff]   ;;  %v2696_v18 = vld [vmem:[%s3244_s1 + $0x178] sm:$0xff]  }
  0x27   : > { %2511 = vmatprep.subr.bf16.mxu1 %v2663_v2  ;;  %v337_v47 = vsel %vm2898_vm5, %v332_v39, %v336_v30  ;;  %v356_v1 = vshll.u32 %v285_v60, 16  ;;  %v362_v2 = vshll.u32 %v286_v61, 16  ;;  %v482_v29 = vsel %vm2889_vm4, %v2164_v20, %v481_v21  ;;  %v2685_v35 = vld [vmem:[%s3244_s1 + $0x1a0] sm:$0xff]   ;;  %v2689_v39 = vld [vmem:[%s3244_s1 + $0x1a8] sm:$0xff]   ;;  %v289_v40 = vld [vmem:[%s2874_s6 + $0x30] sm:$0xf] }
  0x28   : > { %1705 = vmatmul.mubr.bf16.vlgmr.msra.gmra.mrb[0].mxu0 %v2661_v0  ;;  %v351_v50 = vsel %vm2898_vm5, %v346_v43, %v350_v31  ;;  %v353_v0 = vshrl.u32 %v285_v60, 16  ;;  %v486_v31 = vsel %vm2889_vm4, %v2165_v22, %v485_v25  ;;  %v290_v41 = vld [vmem:[%s2874_s6 + $0x34] sm:$0x1]  ;;  %v292_v43 = vld [vmem:[%s2874_s6 + $0x3c] sm:$0x1]  ;;  %v384_v45 = vshll.u32 %v289_v40, 16 }
  0x29   : > { %1770 = vmatmul.mubr.bf16.vlgmr.msra.gmra.mrb[0].mxu1 %v2168_v7  ;;  %2472 = vmatpush3.bf16.msra.mxu0 %v2664_v5  ;;  %v2157_v53 = vcombine.low %v337_v47, %v351_v50  ;;  %v376_v5 = vshll.u32 %v288_v63, 16  ;;  %v358_v7 = vrot.slane %v356_v1, 5  ;;  %v2170_v34 = vcombine.low %v482_v29, %v486_v31  ;;  %v440_v60 = vld [vmem:[%s2874_s6 + $0x30] sm:$0xe]  ;;  %v441_v61 = vld [vmem:[%s2874_s6 + $0x34] sm:$0x1] }
  0x2a   : > { %2512 = vmatpush3.bf16.msra.mxu1 %v2665_v8  ;;  %2473 = vmatprep.subr.bf16.mxu0 %v2666_v10  ;;  %v355_v6 = vrot.slane %v353_v0, 4  ;;  %v2680_v8 = vld [vmem:[%s2874_s6 + $0x28] ss:$8 sps:$4 sm:$0xff]   ;;  %v372_v10 = vrot.slane %v370_v4, 5  ;;  %v404_v50 = vshll.u32 %v292_v43, 16  ;;  %v2166_v1 = vrot.slane %v440_v60, 9 }
  0x2b   : > { %2513 = vmatprep.subr.bf16.mxu1 %v2667_v11  ;;  %1777 = vmatprep.mubr.bf16.mxu1 %v2670_v27  ;;  %v2683_v27 = vld [vmem:[%s3244_s1 + $0x1e0] sm:$0xff]   ;;  %v442_v62 = vld [vmem:[%s2874_s6 + $0x38] sm:$0xe]  ;;  %v443_v0 = vld [vmem:[%s2874_s6 + $0x3c] sm:$0x1] }
  0x2c   : > { %1712 = vmatprep.mubr.bf16.mxu0 %v2157_v53  ;;  %v359_v11 = vor.u32 %v358_v7, %v355_v6  ;;  %v373_v15 = vor.u32 %v372_v10, %v369_v9  ;;  %v386_v53 = vrot.slane %v384_v45, 5  ;;  %v2167_v3 = vrot.slane %v442_v62, 9  ;;  %v2692_v4 = vld [vmem:[%s3244_s1 + $0x170] sm:$0xff]   ;;  %v2698_v20 = vld [vmem:[%s3244_s1 + $0x138] sm:$0xff]   ;;  %v2204_v22 = vld [vmem:[%s2874_s6 + $0x8] sm:$0xe] }
  0x2d   : > { %2474 = vmatpush3.bf16.msra.mxu0 %v2668_v12  ;;  %v364_v12 = vrot.slane %v362_v2, 5  ;;  %v489_v2 = vrot.slane %v441_v61, 5  ;;  %v493_v6 = vrot.slane %v443_v0, 5  ;;  %v2693_v10 = vld [vmem:[%s3244_s1 + $0x1f0] sm:$0xff]   ;;  %v2699_v21 = vld [vmem:[%s3244_s1 + $0x1b8] sm:$0xff]   ;;  %v3069_v29 = vld [vmem:[%s3244_s1 + $0x200] sm:$0xff]  }
  0x2e   : > { %2514 = vmatpush3.bf16.msra.mxu1 %v2669_v13  ;;  %2475 = vmatprep.subr.bf16.mxu0 %v2672_v42  ;;  %v378_v13 = vrot.slane %v376_v5, 5  ;;  %v360_v19 = vrot.slane %v359_v11, 4  ;;  %v374_v23 = vrot.slane %v373_v15, 4  ;;  %v291_v42 = vld [vmem:[%s2874_s6 + $0x38] sm:$0xf] }
  0x2f   : > { %2515 = vmatprep.subr.bf16.mxu1 %v2673_v46  ;;  %v390_v46 = vshll.u32 %v290_v41, 16  ;;  %v395_v47 = vshrl.u32 %v291_v42, 16  ;;  %v398_v48 = vshll.u32 %v291_v42, 16  ;;  %v490_v9 = vsel %vm2889_vm4, %v2166_v1, %v489_v2  ;;  %v2207_v25 = vld [vmem:[%s2874_s6 + $0x14] sm:$0x1] }
  0x30   : > { %1713 = vmatmul.mubr.bf16.gmra.mrb[4].mxu0 %v2671_v44  ;;  %v365_v28 = vsel %vm2898_vm5, %v360_v19, %v364_v12  ;;  %v379_v30 = vsel %vm2898_vm5, %v374_v23, %v378_v13  ;;  %v381_v44 = vshrl.u32 %v289_v40, 16  ;;  %v494_v12 = vsel %vm2889_vm4, %v2167_v3, %v493_v6  ;;  %v2694_v13 = vld [vmem:[%s3244_s1 + $0x130] sm:$0xff]   ;;  %v2697_v19 = vld [vmem:[%s3244_s1 + $0x1f8] sm:$0xff]   ;;  %v2205_v23 = vld [vmem:[%s2874_s6 + $0xc] sm:$0x1] }
  0x31   : > { %1778 = vmatmul.mubr.bf16.gmra.mrb[4].mxu1 %v2169_v51  ;;  %2476 = vmatpush3.bf16.msra.mxu0 %v2674_v52  ;;  %v2158_v33 = vcombine.low %v365_v28, %v379_v30  ;;  %v2690_v51 = vld [vmem:[%s2874_s6 + $0x38] ss:$8 sps:$4 sm:$0xff]   ;;  %v2171_v15 = vcombine.low %v490_v9, %v494_v12  ;;  %v738_v30 = vrot.slane %v2207_v25, 5  ;;  %v2244_v31 = vld [vmem:[%s2874_s6 + $0x10] sm:$0xf] }
  0x32   : > { %2516 = vmatpush3.bf16.msra.mxu1 %v2675_v55  ;;  %2477 = vmatprep.subr.bf16.mxu0 %v2676_v56  ;;  %v383_v52 = vrot.slane %v381_v44, 4  ;;  %v397_v55 = vrot.slane %v395_v47, 4  ;;  %v392_v56 = vrot.slane %v390_v46, 5  ;;  %v2184_v42 = vld [vmem:[%s2874_s6 + $0x8] sm:$0xf] }
  0x33   : > { %2517 = vmatprep.subr.bf16.mxu1 %v2677_v57  ;;  %1785 = vmatprep.mubr.bf16.mxu1 %v2680_v8  ;;  %v400_v57 = vrot.slane %v398_v48, 5  ;;  %v2691_v8 = vld [vmem:[%s2874_s6 + $0x30] ss:$8 sps:$4 sm:$0xff]   ;;  %v2185_v47 = vld [vmem:[%s2874_s6 + $0xc] sm:$0x1] }
  0x34   : > { %1720 = vmatprep.mubr.bf16.mxu0 %v2158_v33  ;;  %v2700_v6 = vld [vmem:[%s2874_s6 + $0x10] ss:$8 sps:$4 sm:$0xff]   ;;  %v2268_v54 = vld [vmem:[%s2874_s6 + $0x20] sm:$0xe] }
  0x35   : > { %2478 = vmatpush3.bf16.msra.mxu0 %v2678_v58  ;;  %v406_v58 = vrot.slane %v404_v50, 5  ;;  %v401_v63 = vor.u32 %v400_v57, %v397_v55  ;;  %v2187_v57 = vld [vmem:[%s2874_s6 + $0x14] sm:$0x1] }
  0x36   : > { %2518 = vmatpush3.bf16.msra.mxu1 %v2679_v59  ;;  %2479 = vmatprep.subr.bf16.mxu0 %v2682_v26  ;;  %v387_v59 = vor.u32 %v386_v53, %v383_v52  ;;  %v2220_v26 = vrot.slane %v2204_v22, 9  ;;  %v2186_v52 = vld [vmem:[%s2874_s6 + $0x10] sm:$0xf]  ;;  %v569_v53 = vshrl.u32 %v2184_v42, 16  ;;  %v592_v2 = vshll.u32 %v2187_v57, 16 }
  0x37   : > { %2519 = vmatprep.subr.bf16.mxu1 %v2683_v27  ;;  %v402_v7 = vrot.slane %v401_v63, 4  ;;  %v734_v27 = vrot.slane %v2205_v23, 5  ;;  %v583_v62 = vshrl.u32 %v2186_v52, 16  ;;  %v586_v63 = vshll.u32 %v2186_v52, 16 }
  0x38   : > { %1721 = vmatmul.mubr.bf16.gmra.mrb[8].mxu0 %v2681_v24  ;;  %v388_v5 = vrot.slane %v387_v59, 4  ;;  %v2206_v24 = vld [vmem:[%s2874_s6 + $0x10] sm:$0xe]  ;;  %v578_v59 = vshll.u32 %v2185_v47, 16  ;;  %v571_v61 = vrot.slane %v569_v53, 4 }
  0x39   : > { %2480 = vmatpush3.bf16.msra.mxu0 %v2684_v32  ;;  %1786 = vmatmul.mubr.bf16.gmra.mrb[8].mxu1 %v2170_v34  ;;  %v407_v14 = vsel %vm2898_vm5, %v402_v7, %v406_v58  ;;  %v2221_v28 = vrot.slane %v2206_v24, 9  ;;  %v2245_v32 = vld [vmem:[%s2874_s6 + $0x14] sm:$0x1]  ;;  %v735_v33 = vsel %vm2889_vm4, %v2220_v26, %v734_v27  ;;  %v2246_v34 = vld [vmem:[%s2874_s6 + $0x18] sm:$0xf]  ;;  %v572_v58 = vshll.u32 %v2184_v42, 16 }
  0x3a   : > { %2520 = vmatpush3.bf16.msra.mxu1 %v2685_v35  ;;  %2481 = vmatprep.subr.bf16.mxu0 %v2686_v36  ;;  %v393_v11 = vsel %vm2898_vm5, %v388_v5, %v392_v56  ;;  %v2247_v35 = vld [vmem:[%s2874_s6 + $0x1c] sm:$0x1]  ;;  %v838_v36 = vshrl.u32 %v2244_v31, 16  ;;  %v852_v40 = vshrl.u32 %v2246_v34, 16  ;;  %v855_v41 = vshll.u32 %v2246_v34, 16 }
  0x3b   : > { %2521 = vmatprep.subr.bf16.mxu1 %v2687_v37  ;;  %1793 = vmatprep.mubr.bf16.mxu1 %v2690_v51  ;;  %v2159_v17 = vcombine.low %v393_v11, %v407_v14  ;;  %v841_v37 = vshll.u32 %v2244_v31, 16  ;;  %v861_v46 = vshll.u32 %v2247_v35, 16  ;;  %v574_v1 = vrot.slane %v572_v58, 5  ;;  %v2248_v26 = vld [vmem:[%s2874_s6 + $0x20] sm:$0xf] }
  0x3c   : > { %v840_v44 = vrot.slane %v838_v36, 4  ;;  %v854_v50 = vrot.slane %v852_v40, 4  ;;  %v857_v51 = vrot.slane %v855_v41, 5  ;;  %v588_v5 = vrot.slane %v586_v63, 5  ;;  %v2249_v27 = vld [vmem:[%s2874_s6 + $0x24] sm:$0x1] }
  0x3d   : > { %2482 = vmatpush3.bf16.msra.mxu0 %v2688_v38  ;;  %1728 = vmatprep.mubr.bf16.mxu0 %v2159_v17  ;;  %v739_v38 = vsel %vm2889_vm4, %v2221_v28, %v738_v30  ;;  %v843_v45 = vrot.slane %v841_v37, 5  ;;  %v863_v56 = vrot.slane %v861_v46, 5  ;;  %v580_v9 = vrot.slane %v578_v59, 5  ;;  %v2210_v17 = vld [vmem:[%s2874_s6 + $0x20] sm:$0xe]  ;;  %v2704_v46 = vld [vmem:[%s3244_s1 + $0x210] sm:$0xff]  }
  0x3e   : > { %2522 = vmatpush3.bf16.msra.mxu1 %v2689_v39  ;;  %2483 = vmatprep.subr.bf16.mxu0 %v2692_v4  ;;  %v847_v39 = vshll.u32 %v2245_v32, 16  ;;  %v2228_v43 = vcombine.low %v735_v33, %v739_v38  ;;  %v858_v60 = vor.u32 %v857_v51, %v854_v50  ;;  %v585_v4 = vrot.slane %v583_v62, 4  ;;  %v2250_v31 = vld [vmem:[%s2874_s6 + $0x28] sm:$0xf]  ;;  %v2251_v32 = vld [vmem:[%s2874_s6 + $0x2c] sm:$0x1] }
  0x3f   : > { %2523 = vmatprep.subr.bf16.mxu1 %v2693_v10  ;;  %v844_v55 = vor.u32 %v843_v45, %v840_v44  ;;  %v594_v10 = vrot.slane %v592_v2, 5  ;;  %v2223_v23 = vrot.slane %v2210_v17, 9  ;;  %v866_v33 = vshrl.u32 %v2248_v26, 16  ;;  %v2189_v40 = vld [vmem:[%s2874_s6 + $0x1c] sm:$0x1] }
  0x40   : > { %1729 = vmatmul.mubr.bf16.gmra.mrb[12].mxu0 %v2691_v8  ;;  %v849_v48 = vrot.slane %v847_v39, 5  ;;  %v859_v3 = vrot.slane %v858_v60, 4  ;;  %v575_v8 = vor.u32 %v574_v1, %v571_v61  ;;  %v589_v12 = vor.u32 %v588_v5, %v585_v4  ;;  %v2188_v39 = vld [vmem:[%s2874_s6 + $0x18] sm:$0xf]  ;;  %v2190_v45 = vld [vmem:[%s2874_s6 + $0x20] sm:$0xf] }
  0x41   : > { %2484 = vmatpush3.bf16.msra.mxu0 %v2694_v13  ;;  %1794 = vmatmul.mubr.bf16.gmra.mrb[12].mxu1 %v2171_v15  ;;  %v845_v0 = vrot.slane %v844_v55, 4  ;;  %v2208_v13 = vld [vmem:[%s2874_s6 + $0x18] sm:$0xe]  ;;  %v869_v34 = vshll.u32 %v2248_v26, 16  ;;  %v875_v37 = vshll.u32 %v2249_v27, 16  ;;  %v880_v38 = vshrl.u32 %v2250_v31, 16 }
  0x42   : > { %2524 = vmatpush3.bf16.msra.mxu1 %v2695_v16  ;;  %2485 = vmatprep.subr.bf16.mxu0 %v2696_v18  ;;  %v864_v11 = vsel %vm2898_vm5, %v859_v3, %v863_v56  ;;  %v576_v15 = vrot.slane %v575_v8, 4  ;;  %v2209_v16 = vld [vmem:[%s2874_s6 + $0x1c] sm:$0x1]  ;;  %v2222_v18 = vrot.slane %v2208_v13, 9  ;;  %v868_v42 = vrot.slane %v866_v33, 4  ;;  %v2707_v26 = vld [vmem:[%s3244_s1 + $0x220] sm:$0xff]  }
  0x43   : > { %2525 = vmatprep.subr.bf16.mxu1 %v2697_v19  ;;  %1834 = vmatprep.mubr.bf16.mxu0 %v2228_v43  ;;  %v850_v7 = vsel %vm2898_vm5, %v845_v0, %v849_v48  ;;  %v590_v19 = vrot.slane %v589_v12, 4  ;;  %v742_v22 = vrot.slane %v2209_v16, 5  ;;  %v871_v43 = vrot.slane %v869_v34, 5  ;;  %v2191_v51 = vld [vmem:[%s2874_s6 + $0x24] sm:$0x1] }
  0x44   : > { %v2260_v14 = vcombine.low %v850_v7, %v864_v11  ;;  %v581_v24 = vsel %vm2898_vm5, %v576_v15, %v580_v9  ;;  %v883_v44 = vshll.u32 %v2250_v31, 16  ;;  %v877_v47 = vrot.slane %v875_v37, 5  ;;  %v2703_v8 = vld [vmem:[%s2874_s6 + $0x20] ss:$8 sps:$4 sm:$0xff]   ;;  %v2214_v15 = vld [vmem:[%s2874_s6 + $0x30] sm:$0xe] }
  0x45   : > { %2486 = vmatpush3.bf16.msra.mxu0 %v2698_v20  ;;  %v2702_v20 = vld [vmem:[%s3244_s1 + $0x208] sm:$0xff]   ;;  %v595_v28 = vsel %vm2898_vm5, %v590_v19, %v594_v10  ;;  %v743_v30 = vsel %vm2889_vm4, %v2222_v18, %v742_v22  ;;  %v882_v48 = vrot.slane %v880_v38, 4  ;;  %v889_v50 = vshll.u32 %v2251_v32, 16  ;;  %v2215_v19 = vld [vmem:[%s2874_s6 + $0x34] sm:$0x1] }
  0x46   : > { %2526 = vmatpush3.bf16.msra.mxu1 %v2699_v21  ;;  %2563 = vmatprep.subr.bf16.mxu0 %v3069_v29  ;;  %v2211_v21 = vld [vmem:[%s2874_s6 + $0x24] sm:$0x1]  ;;  %v2200_v35 = vcombine.low %v581_v24, %v595_v28  ;;  %v597_v52 = vshrl.u32 %v2188_v39, 16  ;;  %v872_v53 = vor.u32 %v871_v43, %v868_v42  ;;  %v885_v55 = vrot.slane %v883_v44, 5  ;;  %v2212_v11 = vld [vmem:[%s2874_s6 + $0x28] sm:$0xe] }
  0x47   : > { %2587 = vmatprep.subr.bf16.mxu1 %v3069_v29  ;;  %1899 = vmatprep.mubr.bf16.mxu1 %v2260_v14  ;;  %v746_v25 = vrot.slane %v2211_v21, 5  ;;  %v600_v56 = vshll.u32 %v2188_v39, 16  ;;  %v606_v57 = vshll.u32 %v2189_v40, 16  ;;  %v611_v59 = vshrl.u32 %v2190_v45, 16  ;;  %v2213_v14 = vld [vmem:[%s2874_s6 + $0x2c] sm:$0x1] }
  0x48   : > { %1835 = vmatmul.mubr.bf16.vlgmr.msra.gmra.mrb[16].mxu0 %v2200_v35  ;;  %v599_v58 = vrot.slane %v597_v52, 4  ;;  %v614_v60 = vshll.u32 %v2190_v45, 16  ;;  %v873_v61 = vrot.slane %v872_v53, 4  ;;  %v886_v62 = vor.u32 %v885_v55, %v882_v48  ;;  %v2252_v24 = vld [vmem:[%s2874_s6 + $0x30] sm:$0xf]  ;;  %v2708_v45 = vld [vmem:[%s3244_s1 + $0x228] sm:$0xff]  }
  0x49   : > { %1900 = vmatmul.mubr.bf16.vlgmr.msra.gmra.mrb[16].mxu1 %v2700_v6  ;;  %v747_v36 = vsel %vm2889_vm4, %v2223_v23, %v746_v25  ;;  %2564 = vmatpush3.bf16.msra.mxu0 %v3069_v29  ;;  %v891_v63 = vrot.slane %v889_v50, 5  ;;  %v602_v0 = vrot.slane %v600_v56, 5  ;;  %v613_v1 = vrot.slane %v611_v59, 4  ;;  %v2253_v25 = vld [vmem:[%s2874_s6 + $0x34] sm:$0x1] }
  0x4a   : > { %2595 = vmatpush3.bf16.msra.mxu1 %v3069_v29  ;;  %v2229_v41 = vcombine.low %v743_v30, %v747_v36  ;;  %2565 = vmatprep.subr.bf16.mxu0 %v2702_v20  ;;  %v2705_v29 = vld [vmem:[%s3244_s1 + $0x218] sm:$0xff]   ;;  %v616_v2 = vrot.slane %v614_v60, 5  ;;  %v620_v3 = vshll.u32 %v2191_v51, 16  ;;  %v878_v4 = vsel %vm2898_vm5, %v873_v61, %v877_v47  ;;  %v2192_v38 = vld [vmem:[%s2874_s6 + $0x28] sm:$0xf] }
  0x4b   : > { %2588 = vmatprep.subr.bf16.mxu1 %v2702_v20  ;;  %v887_v5 = vrot.slane %v886_v62, 4  ;;  %v603_v6 = vor.u32 %v602_v0, %v599_v58  ;;  %v608_v7 = vrot.slane %v606_v57, 5  ;;  %v2224_v16 = vrot.slane %v2212_v11, 9  ;;  %v2254_v30 = vld [vmem:[%s2874_s6 + $0x38] sm:$0xf] }
  0x4c   : > { %1842 = vmatprep.mubr.bf16.mxu0 %v2229_v41  ;;  %v617_v9 = vor.u32 %v616_v2, %v613_v1  ;;  %v622_v10 = vrot.slane %v620_v3, 5  ;;  %v2225_v21 = vrot.slane %v2214_v15, 9  ;;  %v754_v23 = vrot.slane %v2215_v19, 5  ;;  %v2255_v31 = vld [vmem:[%s2874_s6 + $0x3c] sm:$0x1] }
  0x4d   : > { %2566 = vmatpush3.bf16.msra.mxu0 %v2702_v20  ;;  %v892_v12 = vsel %vm2898_vm5, %v887_v5, %v891_v63  ;;  %v604_v13 = vrot.slane %v603_v6, 4  ;;  %v894_v32 = vshrl.u32 %v2252_v24, 16  ;;  %v897_v33 = vshll.u32 %v2252_v24, 16  ;;  %v2193_v39 = vld [vmem:[%s2874_s6 + $0x2c] sm:$0x1] }
  0x4e   : > { %2596 = vmatpush3.bf16.msra.mxu1 %v2702_v20  ;;  %2567 = vmatprep.subr.bf16.mxu0 %v2704_v46  ;;  %v2261_v17 = vcombine.low %v878_v4, %v892_v12  ;;  %v618_v18 = vrot.slane %v617_v9, 4  ;;  %v750_v20 = vrot.slane %v2213_v14, 5  ;;  %v755_v35 = vsel %vm2889_vm4, %v2225_v21, %v754_v23  ;;  %v2194_v44 = vld [vmem:[%s2874_s6 + $0x30] sm:$0xf]  ;;  %v2195_v50 = vld [vmem:[%s2874_s6 + $0x34] sm:$0x1] }
  0x4f   : > { %2589 = vmatprep.subr.bf16.mxu1 %v2704_v46  ;;  %v609_v22 = vsel %vm2898_vm5, %v604_v13, %v608_v7  ;;  %v903_v36 = vshll.u32 %v2253_v25, 16  ;;  %v908_v37 = vshrl.u32 %v2254_v30, 16  ;;  %v896_v41 = vrot.slane %v894_v32, 4  ;;  %v2706_v7 = vld [vmem:[%s2874_s6 + $0x30] ss:$8 sps:$4 sm:$0xff]  }
  0x50   : > { %1907 = vmatprep.mubr.bf16.mxu1 %v2261_v17  ;;  %v623_v27 = vsel %vm2898_vm5, %v618_v18, %v622_v10  ;;  %v751_v28 = vsel %vm2889_vm4, %v2224_v16, %v750_v20  ;;  %v899_v42 = vrot.slane %v897_v33, 5  ;;  %v911_v43 = vshll.u32 %v2254_v30, 16  ;;  %v2216_v10 = vld [vmem:[%s2874_s6 + $0x38] sm:$0xe]  ;;  %v2217_v13 = vld [vmem:[%s2874_s6 + $0x3c] sm:$0x1] }
  0x51   : > { %2568 = vmatpush3.bf16.msra.mxu0 %v2704_v46  ;;  %v2201_v34 = vcombine.low %v609_v22, %v623_v27  ;;  %1908 = vmatmul.mubr.bf16.gmra.mrb[20].mxu1 %v2703_v8  ;;  %v2230_v40 = vcombine.low %v751_v28, %v755_v35  ;;  %v910_v47 = vrot.slane %v908_v37, 4  ;;  %v917_v48 = vshll.u32 %v2255_v31, 16  ;;  %v2218_v14 = vld [vmem:[%s2874_s6 + $0x40] sm:$0xe]  ;;  %v2219_v18 = vld [vmem:[%s2874_s6 + $0x44] sm:$0x1] }
  0x52   : > { %2597 = vmatpush3.bf16.msra.mxu1 %v2704_v46  ;;  %2569 = vmatprep.subr.bf16.mxu0 %v2705_v29  ;;  %v905_v46 = vrot.slane %v903_v36, 5  ;;  %v625_v51 = vshrl.u32 %v2192_v38, 16  ;;  %v900_v52 = vor.u32 %v899_v42, %v896_v41  ;;  %v913_v53 = vrot.slane %v911_v43, 5  ;;  %v2256_v23 = vld [vmem:[%s2874_s6 + $0x40] sm:$0xf]  ;;  %v2711_v25 = vld [vmem:[%s3244_s1 + $0x238] sm:$0xff]  }
  0x53   : > { %2590 = vmatprep.subr.bf16.mxu1 %v2705_v29  ;;  %1843 = vmatmul.mubr.bf16.gmra.mrb[20].mxu0 %v2201_v34  ;;  %v628_v55 = vshll.u32 %v2192_v38, 16  ;;  %v634_v56 = vshll.u32 %v2193_v39, 16  ;;  %v639_v58 = vshrl.u32 %v2194_v44, 16  ;;  %v642_v59 = vshll.u32 %v2194_v44, 16  ;;  %v2257_v24 = vld [vmem:[%s2874_s6 + $0x44] sm:$0x1] }
  0x54   : > { %1850 = vmatprep.mubr.bf16.mxu0 %v2230_v40  ;;  %v627_v57 = vrot.slane %v625_v51, 4  ;;  %v901_v60 = vrot.slane %v900_v52, 4  ;;  %v914_v61 = vor.u32 %v913_v53, %v910_v47  ;;  %v919_v62 = vrot.slane %v917_v48, 5  ;;  %v2258_v28 = vld [vmem:[%s2874_s6 + $0x48] sm:$0xf] }
  0x55   : > { %2570 = vmatpush3.bf16.msra.mxu0 %v2705_v29  ;;  %v630_v63 = vrot.slane %v628_v55, 5  ;;  %v641_v0 = vrot.slane %v639_v58, 4  ;;  %v644_v1 = vrot.slane %v642_v59, 5  ;;  %v648_v2 = vshll.u32 %v2195_v50, 16  ;;  %v2259_v30 = vld [vmem:[%s2874_s6 + $0x4c] sm:$0x1] }
  0x56   : > { %2598 = vmatpush3.bf16.msra.mxu1 %v2705_v29  ;;  %2571 = vmatprep.subr.bf16.mxu0 %v2707_v26  ;;  %v2710_v29 = vld [vmem:[%s3244_s1 + $0x230] sm:$0xff]   ;;  %v906_v3 = vsel %vm2898_vm5, %v901_v60, %v905_v46  ;;  %v915_v4 = vrot.slane %v914_v61, 4  ;;  %v636_v6 = vrot.slane %v634_v56, 5  ;;  %v2226_v15 = vrot.slane %v2216_v10, 9  ;;  %v2196_v37 = vld [vmem:[%s2874_s6 + $0x38] sm:$0xf] }
  0x57   : > { %2591 = vmatprep.subr.bf16.mxu1 %v2707_v26  ;;  %v631_v5 = vor.u32 %v630_v63, %v627_v57  ;;  %v645_v8 = vor.u32 %v644_v1, %v641_v0  ;;  %v650_v9 = vrot.slane %v648_v2, 5  ;;  %v758_v19 = vrot.slane %v2217_v13, 5  ;;  %v2197_v38 = vld [vmem:[%s2874_s6 + $0x3c] sm:$0x1]  ;;  %v2198_v43 = vld [vmem:[%s2874_s6 + $0x40] sm:$0xf] }
  0x58   : > { %v920_v11 = vsel %vm2898_vm5, %v915_v4, %v919_v62  ;;  %v2227_v20 = vrot.slane %v2218_v14, 9  ;;  %v762_v22 = vrot.slane %v2219_v18, 5  ;;  %v922_v31 = vshrl.u32 %v2256_v23, 16  ;;  %v2199_v47 = vld [vmem:[%s2874_s6 + $0x44] sm:$0x1] }
  0x59   : > { %2572 = vmatpush3.bf16.msra.mxu0 %v2707_v26  ;;  %v632_v12 = vrot.slane %v631_v5, 4  ;;  %v2262_v16 = vcombine.low %v906_v3, %v920_v11  ;;  %v646_v17 = vrot.slane %v645_v8, 4  ;;  %v759_v27 = vsel %vm2889_vm4, %v2226_v15, %v758_v19  ;;  %v2709_v4 = vld [vmem:[%s2874_s6 + $0x40] ss:$8 sps:$4 sm:$0xff]   ;;  %v2265_v10 = vld [vmem:[%s2874_s6 + $0x14] sm:$0x1] }
  0x5a   : > { %2599 = vmatpush3.bf16.msra.mxu1 %v2707_v26  ;;  %2573 = vmatprep.subr.bf16.mxu0 %v2708_v45  ;;  %v925_v32 = vshll.u32 %v2256_v23, 16  ;;  %v763_v34 = vsel %vm2889_vm4, %v2227_v20, %v762_v22  ;;  %v931_v35 = vshll.u32 %v2257_v24, 16  ;;  %v936_v36 = vshrl.u32 %v2258_v28, 16  ;;  %v2266_v11 = vld [vmem:[%s2874_s6 + $0x18] sm:$0xe] }
  0x5b   : > { %2592 = vmatprep.subr.bf16.mxu1 %v2708_v45  ;;  %v637_v21 = vsel %vm2898_vm5, %v632_v12, %v636_v6  ;;  %1915 = vmatprep.mubr.bf16.mxu1 %v2262_v16  ;;  %v651_v26 = vsel %vm2898_vm5, %v646_v17, %v650_v9  ;;  %v2231_v39 = vcombine.low %v759_v27, %v763_v34  ;;  %v924_v40 = vrot.slane %v922_v31, 4  ;;  %v2267_v15 = vld [vmem:[%s2874_s6 + $0x1c] sm:$0x1]  ;;  %v2272_v20 = vld [vmem:[%s2874_s6 + $0x30] sm:$0xe] }
  0x5c   : > { %v2202_v33 = vcombine.low %v637_v21, %v651_v26  ;;  %1916 = vmatmul.mubr.bf16.gmra.mrb[24].mxu1 %v2706_v7  ;;  %v927_v41 = vrot.slane %v925_v32, 5  ;;  %v939_v42 = vshll.u32 %v2258_v28, 16  ;;  %v933_v44 = vrot.slane %v931_v35, 5  ;;  %v2264_v7 = vld [vmem:[%s2874_s6 + $0x10] sm:$0xe] }
  0x5d   : > { %2574 = vmatpush3.bf16.msra.mxu0 %v2708_v45  ;;  %v945_v46 = vshll.u32 %v2259_v30, 16  ;;  %v653_v48 = vshrl.u32 %v2196_v37, 16  ;;  %v656_v52 = vshll.u32 %v2196_v37, 16  ;;  %v662_v53 = vshll.u32 %v2197_v38, 16  ;;  %v2273_v21 = vld [vmem:[%s2874_s6 + $0x34] sm:$0x1] }
  0x5e   : > { %2600 = vmatpush3.bf16.msra.mxu1 %v2708_v45  ;;  %2575 = vmatprep.subr.bf16.mxu0 %v2710_v29  ;;  %v938_v45 = vrot.slane %v936_v36, 4  ;;  %v928_v50 = vor.u32 %v927_v41, %v924_v40  ;;  %v941_v51 = vrot.slane %v939_v42, 5  ;;  %v667_v56 = vshrl.u32 %v2198_v43, 16  ;;  %v2274_v24 = vld [vmem:[%s2874_s6 + $0x38] sm:$0xe] }
  0x5f   : > { %2593 = vmatprep.subr.bf16.mxu1 %v2710_v29  ;;  %1851 = vmatmul.mubr.bf16.gmra.mrb[24].mxu0 %v2202_v33  ;;  %v655_v55 = vrot.slane %v653_v48, 4  ;;  %v670_v57 = vshll.u32 %v2198_v43, 16  ;;  %v947_v60 = vrot.slane %v945_v46, 5  ;;  %v658_v61 = vrot.slane %v656_v52, 5  ;;  %v2269_v33 = vld [vmem:[%s2874_s6 + $0x24] sm:$0x1] }
  0x60   : > { %1858 = vmatprep.mubr.bf16.mxu0 %v2231_v39  ;;  %v929_v58 = vrot.slane %v928_v50, 4  ;;  %v942_v59 = vor.u32 %v941_v51, %v938_v45  ;;  %v669_v62 = vrot.slane %v667_v56, 4  ;;  %v676_v0 = vshll.u32 %v2199_v47, 16  ;;  %v2270_v36 = vld [vmem:[%s2874_s6 + $0x28] sm:$0xe] }
  0x61   : > { %2576 = vmatpush3.bf16.msra.mxu0 %v2710_v29  ;;  %v672_v63 = vrot.slane %v670_v57, 5  ;;  %v664_v3 = vrot.slane %v662_v53, 5  ;;  %v2280_v12 = vrot.slane %v2264_v7, 9  ;;  %v1003_v16 = vrot.slane %v2265_v10, 5  ;;  %v2271_v37 = vld [vmem:[%s2874_s6 + $0x2c] sm:$0x1] }
  0x62   : > { %2601 = vmatpush3.bf16.msra.mxu1 %v2710_v29  ;;  %2577 = vmatprep.subr.bf16.mxu0 %v2711_v25  ;;  %v934_v1 = vsel %vm2898_vm5, %v929_v58, %v933_v44  ;;  %v943_v2 = vrot.slane %v942_v59, 4  ;;  %v659_v29 = vor.u32 %v658_v61, %v655_v55  ;;  %v678_v6 = vrot.slane %v676_v0, 5  ;;  %v2276_v43 = vld [vmem:[%s2874_s6 + $0x40] sm:$0xe]  ;;  %v2277_v44 = vld [vmem:[%s2874_s6 + $0x44] sm:$0x1] }
  0x63   : > { %2594 = vmatprep.subr.bf16.mxu1 %v2711_v25  ;;  %v673_v5 = vor.u32 %v672_v63, %v669_v62  ;;  %v2281_v17 = vrot.slane %v2266_v11, 9  ;;  %v1007_v19 = vrot.slane %v2267_v15, 5  ;;  %v1004_v23 = vsel %vm2889_vm4, %v2280_v12, %v1003_v16  ;;  %v2278_v47 = vld [vmem:[%s2874_s6 + $0x48] sm:$0xe]  ;;  %v2279_v48 = vld [vmem:[%s2874_s6 + $0x4c] sm:$0x1] }
  0x64   : > { %v948_v8 = vsel %vm2898_vm5, %v943_v2, %v947_v60  ;;  %v660_v9 = vrot.slane %v659_v29, 4  ;;  %v2284_v26 = vrot.slane %v2272_v20, 9  ;;  %v1019_v27 = vrot.slane %v2273_v21, 5 }
  0x65   : > { %2578 = vmatpush3.bf16.msra.mxu0 %v2711_v25  ;;  %v2263_v13 = vcombine.low %v934_v1, %v948_v8  ;;  %v674_v14 = vrot.slane %v673_v5, 4  ;;  %v1008_v30 = vsel %vm2889_vm4, %v2281_v17, %v1007_v19  ;;  %v2285_v31 = vrot.slane %v2274_v24, 9  ;;  %v2292_v1 = vld [vmem:[%s3245_s2] ss:$0 sm:$0xff] }
  0x66   : > { %2602 = vmatpush3.bf16.msra.mxu1 %v2711_v25  ;;  %v665_v18 = vsel %vm2898_vm5, %v660_v9, %v664_v3  ;;  %v2275_v25 = vld [vmem:[%s2874_s6 + $0x3c] sm:$0x1]  ;;  %v2288_v34 = vcombine.low %v1004_v23, %v1008_v30  ;;  %v1020_v35 = vsel %vm2889_vm4, %v2284_v26, %v1019_v27  ;;  %v2282_v38 = vrot.slane %v2268_v54, 9 }
  0x67   : > { %1923 = vmatprep.mubr.bf16.mxu1 %v2263_v13  ;;  %v679_v22 = vsel %vm2898_vm5, %v674_v14, %v678_v6  ;;  %v1023_v32 = vrot.slane %v2275_v25, 5  ;;  %v1011_v39 = vrot.slane %v2269_v33, 5  ;;  %v2283_v41 = vrot.slane %v2270_v36, 9 }
  0x68   : > { %v2203_v28 = vcombine.low %v665_v18, %v679_v22  ;;  %1924 = vmatmul.mubr.bf16.gmra.mrb[28].mxu1 %v2709_v4  ;;  %v1015_v42 = vrot.slane %v2271_v37, 5  ;;  %v2286_v50 = vrot.slane %v2276_v43, 9  ;;  %v1027_v51 = vrot.slane %v2277_v44, 5 }
  0x69   : > { %v1024_v40 = vsel %vm2889_vm4, %v2285_v31, %v1023_v32  ;;  %v1012_v46 = vsel %vm2889_vm4, %v2282_v38, %v1011_v39  ;;  %v2287_v53 = vrot.slane %v2278_v47, 9  ;;  %v1031_v55 = vrot.slane %v2279_v48, 5 }
  0x6a   : > { %1859 = vmatmul.mubr.bf16.gmra.mrb[28].mxu0 %v2203_v28  ;;  %v2290_v45 = vcombine.low %v1020_v35, %v1024_v40  ;;  %v1016_v52 = vsel %vm2889_vm4, %v2283_v41, %v1015_v42  ;;  %v1028_v56 = vsel %vm2889_vm4, %v2286_v50, %v1027_v51 }
  0x6b   : > { %2579 = vmatprep.mubr.bf16.mxu0 %v2288_v34  ;;  %v2289_v57 = vcombine.low %v1012_v46, %v1016_v52  ;;  %v1032_v58 = vsel %vm2889_vm4, %v2287_v53, %v1031_v55 }
  0x6c   : > { %2583 = vmatprep.mubr.bf16.mxu1 %v2290_v45  ;;  %v2291_v59 = vcombine.low %v1028_v56, %v1032_v58 }
  0x70   : > { %2584 = vmatmul.mubr.bf16.vlgmr.msra.gmra.mrb[32].mxu1 %v2291_v59 }
  0x72   : > { %2580 = vmatmul.mubr.bf16.vlgmr.msra.gmra.mrb[32].mxu0 %v2289_v57 }
  0xfb   : > { %v2407_v62 = vpop.f32.mrb[0].mxu0 }
  0xfc   : > { %v2447_v60 = vpop.f32.mrb[0].mxu1  ;;  %v2408_v2 = vpop.f32.mrb[1].mxu0 }
  0xfd   : > { %v2448_v61 = vpop.f32.mrb[1].mxu1  ;;  %v2409_v3 = vadd.f32 %v2408_v2, %v2407_v62  ;;  %v2410_v4 = vpop.f32.mrb[2].mxu0 }
  0xfe   : > { %v2449_v63 = vadd.f32 %v2448_v61, %v2447_v60  ;;  %v2450_v0 = vpop.f32.mrb[2].mxu1  ;;  %v2411_v6 = vpop.f32.mrb[3].mxu0 }
  0xff   : > { %v2451_v29 = vpop.f32.mrb[3].mxu1  ;;  %v1707_v49 = vadd.f32 %v2409_v3, %v2292_v1  ;;  %v2412_v7 = vadd.f32 %v2411_v6, %v2410_v4 }
 0x100   : > { %v2452_v5 = vadd.f32 %v2451_v29, %v2450_v0 }
 0x101   : > { %v1772_v8 = vadd.f32 %v2449_v63, %v1707_v49  ;;  %v1710_v9 = vadd.f32 %v2412_v7, %v2292_v1 }
 0x103   : > { %v1775_v10 = vadd.f32 %v2452_v5, %v1710_v9  ;;  %v2413_v13 = vpop.f32.mrb[4].mxu0 }
 0x104   : > { %v2453_v11 = vpop.f32.mrb[4].mxu1  ;;  %v2414_v16 = vpop.f32.mrb[5].mxu0 }
 0x105   : > { %v2454_v12 = vpop.f32.mrb[5].mxu1  ;;  %v2415_v18 = vadd.f32 %v2414_v16, %v2413_v13  ;;  %v2416_v19 = vpop.f32.mrb[6].mxu0 }
 0x106   : > { %v2455_v14 = vadd.f32 %v2454_v12, %v2453_v11  ;;  %v2456_v15 = vpop.f32.mrb[6].mxu1  ;;  %v2417_v21 = vpop.f32.mrb[7].mxu0 }
 0x107   : > { %v2457_v17 = vpop.f32.mrb[7].mxu1  ;;  %v1715_v22 = vadd.f32 %v2415_v18, %v2292_v1  ;;  %v2418_v23 = vadd.f32 %v2417_v21, %v2416_v19 }
 0x108   : > { %v2458_v20 = vadd.f32 %v2457_v17, %v2456_v15 }
 0x109   : > { %v1780_v24 = vadd.f32 %v2455_v14, %v1715_v22  ;;  %v1718_v25 = vadd.f32 %v2418_v23, %v2292_v1 }
 0x10b   : > { %v1783_v26 = vadd.f32 %v2458_v20, %v1718_v25  ;;  %v2419_v28 = vpop.f32.mrb[8].mxu0 }
 0x10c   : > { %v2459_v27 = vpop.f32.mrb[8].mxu1  ;;  %v2420_v31 = vpop.f32.mrb[9].mxu0 }
 0x10d   : > { %v2460_v30 = vpop.f32.mrb[9].mxu1  ;;  %v2421_v33 = vadd.f32 %v2420_v31, %v2419_v28  ;;  %v2422_v34 = vpop.f32.mrb[10].mxu0 }
 0x10e   : > { %v2461_v32 = vadd.f32 %v2460_v30, %v2459_v27  ;;  %v2462_v54 = vpop.f32.mrb[10].mxu1  ;;  %v2423_v36 = vpop.f32.mrb[11].mxu0 }
 0x10f   : > { %v2463_v35 = vpop.f32.mrb[11].mxu1  ;;  %v1723_v38 = vadd.f32 %v2421_v33, %v2292_v1  ;;  %v2424_v39 = vadd.f32 %v2423_v36, %v2422_v34 }
 0x110   : > { %v2464_v37 = vadd.f32 %v2463_v35, %v2462_v54 }
 0x111   : > { %v1788_v40 = vadd.f32 %v2461_v32, %v1723_v38  ;;  %v1726_v41 = vadd.f32 %v2424_v39, %v2292_v1 }
 0x113   : > { %v1791_v42 = vadd.f32 %v2464_v37, %v1726_v41  ;;  %v2425_v45 = vpop.f32.mrb[12].mxu0 }
 0x114   : > { %v2465_v43 = vpop.f32.mrb[12].mxu1  ;;  %v2426_v48 = vpop.f32.mrb[13].mxu0 }
 0x115   : > { %v2466_v44 = vpop.f32.mrb[13].mxu1  ;;  %v2427_v51 = vadd.f32 %v2426_v48, %v2425_v45  ;;  %v2428_v52 = vpop.f32.mrb[14].mxu0 }
 0x116   : > { %v2467_v46 = vadd.f32 %v2466_v44, %v2465_v43  ;;  %v2468_v47 = vpop.f32.mrb[14].mxu1  ;;  %v2429_v55 = vpop.f32.mrb[15].mxu0 }
 0x117   : > { %v2469_v50 = vpop.f32.mrb[15].mxu1  ;;  %v1731_v56 = vadd.f32 %v2427_v51, %v2292_v1  ;;  %v2430_v57 = vadd.f32 %v2429_v55, %v2428_v52 }
 0x118   : > { %v2470_v53 = vadd.f32 %v2469_v50, %v2468_v47 }
 0x119   : > { %v1796_v58 = vadd.f32 %v2467_v46, %v1731_v56  ;;  %v1734_v59 = vadd.f32 %v2430_v57, %v2292_v1 }
 0x11b   : > { %v1799_v60 = vadd.f32 %v2470_v53, %v1734_v59  ;;  %v2487_v2 = vpop.f32.mrb[16].mxu0 }
 0x11c   : > { %v2527_v61 = vpop.f32.mrb[16].mxu1  ;;  %v2488_v3 = vpop.f32.mrb[17].mxu0 }
 0x11d   : > { %v2528_v62 = vpop.f32.mrb[17].mxu1  ;;  %v2489_v5 = vadd.f32 %v2488_v3, %v2487_v2  ;;  %v2490_v6 = vpop.f32.mrb[18].mxu0 }
 0x11e   : > { %v2529_v63 = vadd.f32 %v2528_v62, %v2527_v61  ;;  %v2530_v0 = vpop.f32.mrb[18].mxu1  ;;  %v2491_v49 = vpop.f32.mrb[19].mxu0 }
 0x11f   : > { %v2531_v29 = vpop.f32.mrb[19].mxu1  ;;  %v1837_v7 = vadd.f32 %v2489_v5, %v1772_v8  ;;  %v2492_v9 = vadd.f32 %v2491_v49, %v2490_v6 }
 0x120   : > { %v2532_v4 = vadd.f32 %v2531_v29, %v2530_v0 }
 0x121   : > { %v1840_v11 = vadd.f32 %v2492_v9, %v1775_v10  ;;  %v1902_v12 = vadd.f32 %v2529_v63, %v1837_v7 }
 0x123   : > { %v3227_v13 = vadd.f32 %v2532_v4, %v1840_v11 }
 0x124   : > { %v2533_v14 = vpop.f32.mrb[20].mxu1 }
 0x125   : > { %v2534_v1 = vpop.f32.mrb[21].mxu1 }
 0x126   : > { %v2493_v15 = vpop.f32.mrb[20].mxu0  ;;  %v2535_v16 = vadd.f32 %v2534_v1, %v2533_v14  ;;  %v2536_v17 = vpop.f32.mrb[22].mxu1 }
 0x127   : > { %v2494_v18 = vpop.f32.mrb[21].mxu0  ;;  %v2537_v19 = vpop.f32.mrb[23].mxu1 }
 0x128   : > { %v2495_v20 = vadd.f32 %v2494_v18, %v2493_v15  ;;  %v2496_v21 = vpop.f32.mrb[22].mxu0  ;;  %v2538_v22 = vadd.f32 %v2537_v19, %v2536_v17 }
 0x129   : > { %v2497_v23 = vpop.f32.mrb[23].mxu0 }
 0x12a   : > { %v1845_v25 = vadd.f32 %v2495_v20, %v1780_v24  ;;  %v2498_v27 = vadd.f32 %v2497_v23, %v2496_v21 }
 0x12c   : > { %v1848_v28 = vadd.f32 %v2498_v27, %v1783_v26  ;;  %v1910_v8 = vadd.f32 %v2535_v16, %v1845_v25 }
 0x12e   : > { %v1913_v30 = vadd.f32 %v2538_v22, %v1848_v28 }
 0x12f   : > { %v2539_v10 = vpop.f32.mrb[24].mxu1 }
 0x130   : > { %v2540_v31 = vpop.f32.mrb[25].mxu1 }
 0x131   : > { %v2541_v54 = vadd.f32 %v2540_v31, %v2539_v10  ;;  %v2542_v33 = vpop.f32.mrb[26].mxu1 }
 0x132   : > { %v2499_v32 = vpop.f32.mrb[24].mxu0  ;;  %v2543_v35 = vpop.f32.mrb[27].mxu1 }
 0x133   : > { %v2500_v34 = vpop.f32.mrb[25].mxu0  ;;  %v2544_v38 = vadd.f32 %v2543_v35, %v2542_v33 }
 0x134   : > { %v2501_v36 = vadd.f32 %v2500_v34, %v2499_v32  ;;  %v2502_v37 = vpop.f32.mrb[26].mxu0 }
 0x135   : > { %v2503_v39 = vpop.f32.mrb[27].mxu0 }
 0x136   : > { %v1853_v41 = vadd.f32 %v2501_v36, %v1788_v40  ;;  %v2504_v43 = vadd.f32 %v2503_v39, %v2502_v37 }
 0x138   : > { %v1856_v44 = vadd.f32 %v2504_v43, %v1791_v42  ;;  %v1918_v45 = vadd.f32 %v2541_v54, %v1853_v41 }
 0x13a   : > { %v1921_v24 = vadd.f32 %v2544_v38, %v1856_v44 }
 0x13b   : > { %v2545_v46 = vpop.f32.mrb[28].mxu1 }
 0x13c   : > { %v2546_v26 = vpop.f32.mrb[29].mxu1 }
 0x13d   : > { %v2505_v47 = vpop.f32.mrb[28].mxu0  ;;  %v2547_v48 = vadd.f32 %v2546_v26, %v2545_v46  ;;  %v2548_v50 = vpop.f32.mrb[30].mxu1 }
 0x13e   : > { %v2506_v51 = vpop.f32.mrb[29].mxu0  ;;  %v2549_v52 = vpop.f32.mrb[31].mxu1 }
 0x13f   : > { %v2507_v53 = vadd.f32 %v2506_v51, %v2505_v47  ;;  %v2508_v55 = vpop.f32.mrb[30].mxu0  ;;  %v2550_v56 = vadd.f32 %v2549_v52, %v2548_v50 }
 0x140   : > { %v2509_v57 = vpop.f32.mrb[31].mxu0 }
 0x141   : > { %v1861_v59 = vadd.f32 %v2507_v53, %v1796_v58  ;;  %v2510_v61 = vadd.f32 %v2509_v57, %v2508_v55 }
 0x143   : > { %v1864_v62 = vadd.f32 %v2510_v61, %v1799_v60  ;;  %v1926_v40 = vadd.f32 %v2547_v48, %v1861_v59  ;;  %v2585_v63 = vpop.f32.mrb[32].mxu1 }
 0x144   : > { %v1982_v2 = vpop.f32.mrb[33].mxu1 }
 0x145   : > { %v2581_v42 = vpop.f32.mrb[32].mxu0  ;;  %v1991_v0 = vadd.f32 %v2585_v63, %v1926_v40  ;;  %v1929_v29 = vadd.f32 %v2550_v56, %v1864_v62  ;;  %v1983_v5 = vadd.f32 %v1982_v2, %v1918_v45  ;;  %v2586_v6 = vpop.f32.mrb[34].mxu1 }
 0x146   : > { %v1975_v3 = vadd.f32 %v2581_v42, %v1910_v8  ;;  %v1966_v4 = vpop.f32.mrb[33].mxu0  ;;  %v1985_v11 = vpop.f32.mrb[35].mxu1 }
 0x147   : > { %v1967_v49 = vadd.f32 %v1966_v4, %v1902_v12  ;;  %v2582_v7 = vpop.f32.mrb[34].mxu0  ;;  %v1994_v9 = vadd.f32 %v2586_v6, %v1929_v29  ;;  %v1986_v58 = vadd.f32 %v1985_v11, %v1921_v24  ;;  %v2003_v15 = vmax.f32 %v1991_v0, 0.0 }
 0x148   : > { %v1978_v14 = vadd.f32 %v2582_v7, %v1913_v30  ;;  %v1969_v1 = vpop.f32.mrb[35].mxu0  ;;  %v1999_v17 = vmax.f32 %v1975_v3, 0.0  ;;  %v2001_v18 = vmax.f32 %v1983_v5, 0.0 }
 0x149   : > { %v2004_v60 = vmax.f32 %v1994_v9, 0.0  ;;  %v1970_v16 = vadd.f32 %v1969_v1, %v3227_v13  ;;  %v2002_v20 = vmax.f32 %v1986_v58, 0.0  ;;  %v1997_v12 = vmax.f32 %v1967_v49, 0.0 }
 0x14a   : > { %v2000_v19 = vmax.f32 %v1978_v14, 0.0 }
 0x14b   : > { %v2386_v21 = vpack.c.bf16 %v2004_v60, %v2003_v15  ;;  %v1998_v22 = vmax.f32 %v1970_v16, 0.0  ;;  %v2381_v25 = vpack.c.bf16 %v2002_v20, %v2001_v18 }
 0x14c   : > { %v2376_v23 = vpack.c.bf16 %v2000_v19, %v1999_v17 }
 0x14d   : > { %2390 = vst [vmem:[%s238_s7 + $0x18] sm:$0xff] %v2386_v21   ;;  %v2371_v27 = vpack.c.bf16 %v1998_v22, %v1997_v12  ;;  %2389 = vst [vmem:[%s238_s7 + $0x10] sm:$0xff] %v2381_v25  }
 0x14e   : > { %2388 = vst [vmem:[%s238_s7 + $0x8] sm:$0xff] %v2376_v23  }
 0x14f   : > { %2372 = vst [vmem:[%s238_s7] sm:$0xff] %v2371_v27  }
 0x150 PF: > { %s13_s14 = sadd.s32 1, %s2734_s14   ;;  %s3251_s12 = smov %s2730_s13 }
 0x151   : > { %p10_p5 = scmp.ge.s32.totalorder %s13_s14, 4   ;;  %s3252_s13 = smov %s3254_s15 }
 0x153   :  { %12 = sbr.rel (!%p10_p5) target bundleno = 2 (0x2), region = 70 }

</bundles_post_ra>
